<compile_context>
chip_gen: v7x
topology: tpu7x:2x2x1
jax: 0.10.0
libtpu: 0.0.40
codegen_flags: <defaults>
</compile_context>

<pallas_src>
import jax
import jax.numpy as jnp
from jax.experimental import pallas as pl
from jax.experimental.pallas import tpu as pltpu

_HI = jax.lax.Precision.HIGHEST


def _dot(a, b):
    return jnp.dot(a, b, preferred_element_type=jnp.float32, precision=_HI)


def _conv_rows(x_ref, m_ref):
    """3x3 conv (stride 1, pad 1) of one image in row-flattened layout.

    x_ref: (1, H+2, W*Cin) rows with a zero halo row top/bottom.
    m_ref: (3, W*Cin, W*Cout) banded per-kh weights (kw taps + width padding folded in).
    Returns the pre-BN conv output as an (H, W*Cout) f32 value.
    """
    H = x_ref.shape[1] - 2
    acc = _dot(x_ref[0, 0:H, :], m_ref[0])
    acc = acc + _dot(x_ref[0, 1:H + 1, :], m_ref[1])
    acc = acc + _dot(x_ref[0, 2:H + 2, :], m_ref[2])
    return acc


def _stats_kernel(x_ref, m_ref, fold_ref, stats_ref):
    # fold_ref: (W*Cout, Cout) 0/1 matrix folding the W lane-groups back onto channels.
    acc = _conv_rows(x_ref, m_ref)                       # (H, W*Cout)
    ch_sum = _dot(acc, fold_ref[...])                    # (H, Cout)  per-row channel sums
    ch_sq = _dot(acc * acc, fold_ref[...])               # (H, Cout)  per-row channel sumsq
    stats_ref[0, 0:1, :] = jnp.sum(ch_sum, axis=0, keepdims=True)
    stats_ref[0, 1:2, :] = jnp.sum(ch_sq, axis=0, keepdims=True)


def _apply_kernel(x_ref, m_ref, scale_ref, shift_ref, wsel_ref, hsel_ref, s_ref, p_ref):
    acc = _conv_rows(x_ref, m_ref)                                    # (H, W*Cout)
    # BatchNorm folded into one per-channel FMA (scale/shift pre-tiled across W) + ReLU.
    y = jnp.maximum(acc * scale_ref[...] + shift_ref[...], 0.0)
    s_ref[0] = y                                                      # lane-dense store
    # 2x2 max pool from registers: even/odd column-group max via 0/1 selection matmuls,
    # then even/odd row max the same way (no strided reload of s_ref).
    wmax = jnp.maximum(_dot(y, wsel_ref[0]), _dot(y, wsel_ref[1]))    # (H, (W//2)*Cout)
    p_ref[0] = jnp.maximum(_dot(hsel_ref[0], wmax), _dot(hsel_ref[1], wmax))


def encoder_block_forward(x_nchw, w_oihw, bias, gamma, beta, eps=1e-5):
    """Pallas implementation of encoder_block.forward (training-mode BN). NCHW in/out."""
    del bias  # exactly cancelled by training-mode BatchNorm's batch-mean subtraction
    N, Cin, H, W = x_nchw.shape
    Cout = w_oihw.shape[0]
    assert H % 2 == 0 and W % 2 == 0, "MaxPool2d(2,2) needs even spatial dims"
    f32 = jnp.float32
    WCin, WCout, WhCout, Hh = W * Cin, W * Cout, (W // 2) * Cout, H // 2

    # NCHW -> row-flattened NHWC with a 1-row zero halo top/bottom: (N, H+2, W*Cin).
    x_rows = jnp.pad(jnp.transpose(x_nchw.astype(f32), (0, 2, 3, 1)),
                     ((0, 0), (1, 1), (0, 0), (0, 0))).reshape(N, H + 2, WCin)

    # Banded conv weights: m[kh, w'*Cin+ci, w*Cout+co] = W[co, ci, kh, w'-w+1] in the band.
    wt = jnp.transpose(w_oihw.astype(f32), (2, 3, 1, 0))              # (kh, kw, Cin, Cout)
    kw = jnp.arange(W)[:, None] - jnp.arange(W)[None, :] + 1          # (W_in, W_out)
    band = wt[:, jnp.clip(kw, 0, 2)] * \
        ((kw >= 0) & (kw <= 2)).astype(f32)[None, :, :, None, None]  # (3, W, W, Cin, Cout)
    m_band = jnp.transpose(band, (0, 1, 3, 2, 4)).reshape(3, WCin, WCout)

    # 0/1 helper matrices: channel fold (stats) and even/odd pair selection (pool).
    lane = jnp.arange(WCout)
    fold = (lane[:, None] % Cout == jnp.arange(Cout)[None, :]).astype(f32)     # (WCout, Cout)
    lane_o = jnp.arange(WhCout)
    same_c = (lane[:, None] % Cout) == (lane_o[None, :] % Cout)
    wsel = jnp.stack(
        [(lane[:, None] // Cout == 2 * (lane_o[None, :] // Cout)) & same_c,
         (lane[:, None] // Cout == 2 * (lane_o[None, :] // Cout) + 1) & same_c],
        axis=0).astype(f32)                                                    # (2, WCout, WhCout)
    rows = jnp.arange(H)
    hsel = jnp.stack([rows[None, :] == 2 * jnp.arange(Hh)[:, None],
                      rows[None, :] == 2 * jnp.arange(Hh)[:, None] + 1],
                     axis=0).astype(f32)                                       # (2, Hh, H)

    conv_flops = 2 * N * 3 * H * WCin * WCout
    parallel = pltpu.CompilerParams(dimension_semantics=("parallel",))

    # ---- pass 1: per-image channel sum / sum-of-squares of the conv output ----------
    stats = pl.pallas_call(
        _stats_kernel,
        grid=(N,),
        in_specs=[
            pl.BlockSpec((1, H + 2, WCin), lambda n: (n, 0, 0)),
            pl.BlockSpec((3, WCin, WCout), lambda n: (0, 0, 0)),
            pl.BlockSpec((WCout, Cout), lambda n: (0, 0)),
        ],
        out_specs=pl.BlockSpec((1, 2, Cout), lambda n: (n, 0, 0)),
        out_shape=jax.ShapeDtypeStruct((N, 2, Cout), f32),
        compiler_params=parallel,
        cost_estimate=pl.CostEstimate(
            flops=conv_flops, transcendentals=0,
            bytes_accessed=4 * (x_rows.size + m_band.size + fold.size + N * 2 * Cout)),
    )(x_rows, m_band, fold)

    # ---- global batch stats -> single per-channel scale / shift (tiny, plain JAX) ----
    # TODO(synk): BatchNorm running_mean/running_var momentum updates (training-time side
    #             effect) are not modeled; they do not affect the returned forward values.
    cnt = N * H * W
    mean = jnp.sum(stats[:, 0, :], axis=0) / cnt
    var = jnp.maximum(jnp.sum(stats[:, 1, :], axis=0) / cnt - mean * mean, 0.0)
    scale = gamma.astype(f32) * jax.lax.rsqrt(var + eps)
    shift = beta.astype(f32) - mean * scale
    scale_row = jnp.tile(scale, W).reshape(1, WCout)
    shift_row = jnp.tile(shift, W).reshape(1, WCout)

    # ---- pass 2: conv + folded BN + ReLU + 2x2 max pool -------------------------------
    s_flat, p_flat = pl.pallas_call(
        _apply_kernel,
        grid=(N,),
        in_specs=[
            pl.BlockSpec((1, H + 2, WCin), lambda n: (n, 0, 0)),
            pl.BlockSpec((3, WCin, WCout), lambda n: (0, 0, 0)),
            pl.BlockSpec((1, WCout), lambda n: (0, 0)),
            pl.BlockSpec((1, WCout), lambda n: (0, 0)),
            pl.BlockSpec((2, WCout, WhCout), lambda n: (0, 0, 0)),
            pl.BlockSpec((2, Hh, H), lambda n: (0, 0, 0)),
        ],
        out_specs=(
            pl.BlockSpec((1, H, WCout), lambda n: (n, 0, 0)),
            pl.BlockSpec((1, Hh, WhCout), lambda n: (n, 0, 0)),
        ),
        out_shape=(
            jax.ShapeDtypeStruct((N, H, WCout), f32),
            jax.ShapeDtypeStruct((N, Hh, WhCout), f32),
        ),
        compiler_params=parallel,
        cost_estimate=pl.CostEstimate(
            flops=conv_flops + 4 * N * H * WCout + 2 * N * H * WCout * WhCout,
            transcendentals=0,
            bytes_accessed=4 * (x_rows.size + m_band.size + 2 * WCout + wsel.size
                                + hsel.size + N * H * WCout + N * Hh * WhCout)),
    )(x_rows, m_band, scale_row, shift_row, wsel, hsel)

    # back to the module's NCHW convention
    s = jnp.transpose(s_flat.reshape(N, H, W, Cout), (0, 3, 1, 2))
    p = jnp.transpose(p_flat.reshape(N, Hh, W // 2, Cout), (0, 3, 1, 2))
    return s, p


def _reference(x, w, b, gamma, beta, eps=1e-5):
    """Pure-JAX reference of the PyTorch forward (training-mode BN)."""
    s = jax.lax.conv_general_dilated(
        x, w, window_strides=(1, 1), padding=((1, 1), (1, 1)),
        dimension_numbers=("NCHW", "OIHW", "NCHW"),
        precision=jax.lax.Precision.HIGHEST,
    ) + b[None, :, None, None]
    mean = jnp.mean(s, axis=(0, 2, 3), keepdims=True)
    var = jnp.mean((s - mean) ** 2, axis=(0, 2, 3), keepdims=True)
    s = (s - mean) * jax.lax.rsqrt(var + eps)
    s = s * gamma[None, :, None, None] + beta[None, :, None, None]
    s = jnp.maximum(s, 0.0)
    N, C, H, W = s.shape
    p = jnp.max(s.reshape(N, C, H // 2, 2, W // 2, 2), axis=(3, 5))
    return s, p


if __name__ == "__main__":
    # encoder_block(inc=4, outc=8), x: (2, 4, 16, 16) NCHW.
    N, Cin, H, W, Cout = 2, 4, 16, 16, 8
    key = jax.random.PRNGKey(0)
    kx, kweight, kb, kg, kbt = jax.random.split(key, 5)

    x = jax.random.normal(kx, (N, Cin, H, W), jnp.float32)
    conv_w = 0.1 * jax.random.normal(kweight, (Cout, Cin, 3, 3), jnp.float32)
    conv_b = 0.1 * jax.random.normal(kb, (Cout,), jnp.float32)
    bn_gamma = 1.0 + 0.1 * jax.random.normal(kg, (Cout,), jnp.float32)
    bn_beta = 0.1 * jax.random.normal(kbt, (Cout,), jnp.float32)

    s, p = jax.jit(encoder_block_forward)(x, conv_w, conv_b, bn_gamma, bn_beta)
    s, p = jax.block_until_ready((s, p))

    assert s.shape == (N, Cout, H, W), s.shape
    assert p.shape == (N, Cout, H // 2, W // 2), p.shape

    s_ref, p_ref = _reference(x, conv_w, conv_b, bn_gamma, bn_beta)
    assert jnp.allclose(s, s_ref, atol=1e-4, rtol=1e-4), float(jnp.max(jnp.abs(s - s_ref)))
    assert jnp.allclose(p, p_ref, atol=1e-4, rtol=1e-4), float(jnp.max(jnp.abs(p - p_ref)))

    print("KERNEL_OK")
</pallas_src>

<mosaic_0001>
module attributes {stable_mosaic.version = 11 : i64} {
  func.func @_stats_kernel(%arg0: i32, %arg1: memref<1x18x64xf32, #tpu.memory_space<vmem>>, %arg2: memref<3x64x128xf32, #tpu.memory_space<vmem>>, %arg3: memref<128x8xf32, #tpu.memory_space<vmem>>, %arg4: memref<1x2x8xf32, #tpu.memory_space<vmem>>) attributes {dimension_semantics = [#tpu.dimension_semantics<parallel>], iteration_bounds = array<i64: 2>, scalar_prefetch = 0 : i64, scratch_operands = 0 : i64, tpu.core_type = #tpu.core_type<tc>, window_params = [{transform_indices = @transform_0, window_bounds = array<i64: 1, 18, 64>}, {pipeline_mode = #tpu.pipeline_mode<synchronous>, transform_indices = @transform_1, window_bounds = array<i64: 3, 64, 128>}, {pipeline_mode = #tpu.pipeline_mode<synchronous>, transform_indices = @transform_2, window_bounds = array<i64: 128, 8>}, {transform_indices = @transform_3, window_bounds = array<i64: 1, 2, 8>}]} {
    %c0 = arith.constant 0 : index
    %c0_0 = arith.constant 0 : index
    %c0_1 = arith.constant 0 : index
    %0 = vector.load %arg1[%c0, %c0_0, %c0_1] : memref<1x18x64xf32, #tpu.memory_space<vmem>>, vector<1x16x64xf32>
    %1 = vector.shape_cast %0 : vector<1x16x64xf32> to vector<16x64xf32>
    %c0_2 = arith.constant 0 : index
    %c0_3 = arith.constant 0 : index
    %c0_4 = arith.constant 0 : index
    %2 = vector.load %arg2[%c0_2, %c0_3, %c0_4] : memref<3x64x128xf32, #tpu.memory_space<vmem>>, vector<1x64x128xf32>
    %3 = vector.shape_cast %2 : vector<1x64x128xf32> to vector<64x128xf32>
    %cst = arith.constant dense<0.000000e+00> : vector<16x128xf32>
    %4 = tpu.matmul %1, %3, %cst {dimension_numbers = #tpu.dot_dimension_numbers<[1], [0], [0], [1], [0, 0, 1, 1], [], []>, precision = #tpu.contract_precision<fp32>} : vector<16x64xf32>, vector<64x128xf32>, vector<16x128xf32> -> vector<16x128xf32>
    %c0_5 = arith.constant 0 : index
    %c1 = arith.constant 1 : index
    %c0_6 = arith.constant 0 : index
    %5 = vector.load %arg1[%c0_5, %c1, %c0_6] : memref<1x18x64xf32, #tpu.memory_space<vmem>>, vector<1x16x64xf32>
    %6 = vector.shape_cast %5 : vector<1x16x64xf32> to vector<16x64xf32>
    %c1_7 = arith.constant 1 : index
    %c0_8 = arith.constant 0 : index
    %c0_9 = arith.constant 0 : index
    %7 = vector.load %arg2[%c1_7, %c0_8, %c0_9] : memref<3x64x128xf32, #tpu.memory_space<vmem>>, vector<1x64x128xf32>
    %8 = vector.shape_cast %7 : vector<1x64x128xf32> to vector<64x128xf32>
    %cst_10 = arith.constant dense<0.000000e+00> : vector<16x128xf32>
    %9 = tpu.matmul %6, %8, %cst_10 {dimension_numbers = #tpu.dot_dimension_numbers<[1], [0], [0], [1], [0, 0, 1, 1], [], []>, precision = #tpu.contract_precision<fp32>} : vector<16x64xf32>, vector<64x128xf32>, vector<16x128xf32> -> vector<16x128xf32>
    %10 = arith.addf %4, %9 : vector<16x128xf32>
    %c0_11 = arith.constant 0 : index
    %c2 = arith.constant 2 : index
    %c0_12 = arith.constant 0 : index
    %11 = vector.load %arg1[%c0_11, %c2, %c0_12] : memref<1x18x64xf32, #tpu.memory_space<vmem>>, vector<1x16x64xf32>
    %12 = vector.shape_cast %11 : vector<1x16x64xf32> to vector<16x64xf32>
    %c2_13 = arith.constant 2 : index
    %c0_14 = arith.constant 0 : index
    %c0_15 = arith.constant 0 : index
    %13 = vector.load %arg2[%c2_13, %c0_14, %c0_15] : memref<3x64x128xf32, #tpu.memory_space<vmem>>, vector<1x64x128xf32>
    %14 = vector.shape_cast %13 : vector<1x64x128xf32> to vector<64x128xf32>
    %cst_16 = arith.constant dense<0.000000e+00> : vector<16x128xf32>
    %15 = tpu.matmul %12, %14, %cst_16 {dimension_numbers = #tpu.dot_dimension_numbers<[1], [0], [0], [1], [0, 0, 1, 1], [], []>, precision = #tpu.contract_precision<fp32>} : vector<16x64xf32>, vector<64x128xf32>, vector<16x128xf32> -> vector<16x128xf32>
    %16 = arith.addf %10, %15 : vector<16x128xf32>
    %c0_17 = arith.constant 0 : index
    %c0_18 = arith.constant 0 : index
    %17 = vector.load %arg3[%c0_17, %c0_18] : memref<128x8xf32, #tpu.memory_space<vmem>>, vector<128x8xf32>
    %cst_19 = arith.constant dense<0.000000e+00> : vector<16x8xf32>
    %18 = tpu.matmul %16, %17, %cst_19 {dimension_numbers = #tpu.dot_dimension_numbers<[1], [0], [0], [1], [0, 0, 1, 1], [], []>, precision = #tpu.contract_precision<fp32>} : vector<16x128xf32>, vector<128x8xf32>, vector<16x8xf32> -> vector<16x8xf32>
    %19 = arith.mulf %16, %16 : vector<16x128xf32>
    %c0_20 = arith.constant 0 : index
    %c0_21 = arith.constant 0 : index
    %20 = vector.load %arg3[%c0_20, %c0_21] : memref<128x8xf32, #tpu.memory_space<vmem>>, vector<128x8xf32>
    %cst_22 = arith.constant dense<0.000000e+00> : vector<16x8xf32>
    %21 = tpu.matmul %19, %20, %cst_22 {dimension_numbers = #tpu.dot_dimension_numbers<[1], [0], [0], [1], [0, 0, 1, 1], [], []>, precision = #tpu.contract_precision<fp32>} : vector<16x128xf32>, vector<128x8xf32>, vector<16x8xf32> -> vector<16x8xf32>
    %cst_23 = arith.constant dense<0.000000e+00> : vector<8xf32>
    %22 = vector.multi_reduction <add>, %18, %cst_23 [0] : vector<16x8xf32> to vector<8xf32>
    %23 = vector.shape_cast %22 : vector<8xf32> to vector<1x8xf32>
    %c0_24 = arith.constant 0 : index
    %c0_25 = arith.constant 0 : index
    %c0_26 = arith.constant 0 : index
    %24 = vector.load %arg4[%c0_24, %c0_25, %c0_26] : memref<1x2x8xf32, #tpu.memory_space<vmem>>, vector<1x1x8xf32>
    %25 = vector.shape_cast %24 : vector<1x1x8xf32> to vector<1x8xf32>
    %26 = vector.shape_cast %23 : vector<1x8xf32> to vector<1x1x8xf32>
    tpu.vector_store %arg4[%c0_24, %c0_25, %c0_26], %26 {strides = array<i32>} : memref<1x2x8xf32, #tpu.memory_space<vmem>>, vector<1x1x8xf32>,
    %cst_27 = arith.constant dense<0.000000e+00> : vector<8xf32>
    %27 = vector.multi_reduction <add>, %21, %cst_27 [0] : vector<16x8xf32> to vector<8xf32>
    %28 = vector.shape_cast %27 : vector<8xf32> to vector<1x8xf32>
    %c0_28 = arith.constant 0 : index
    %c1_29 = arith.constant 1 : index
    %c0_30 = arith.constant 0 : index
    %29 = vector.load %arg4[%c0_28, %c1_29, %c0_30] : memref<1x2x8xf32, #tpu.memory_space<vmem>>, vector<1x1x8xf32>
    %30 = vector.shape_cast %29 : vector<1x1x8xf32> to vector<1x8xf32>
    %31 = vector.shape_cast %28 : vector<1x8xf32> to vector<1x1x8xf32>
    tpu.vector_store %arg4[%c0_28, %c1_29, %c0_30], %31 {strides = array<i32>} : memref<1x2x8xf32, #tpu.memory_space<vmem>>, vector<1x1x8xf32>,
    return
  }
  func.func @transform_0(%arg0: i32) -> (i32, i32, i32) {
    %c0_i32 = arith.constant 0 : i32
    %c0_i32_0 = arith.constant 0 : i32
    %c0_i32_1 = arith.constant 0 : i32
    return %arg0, %c0_i32, %c0_i32_0 : i32, i32, i32
  }
  func.func @transform_1(%arg0: i32) -> (i32, i32, i32) {
    %c0_i32 = arith.constant 0 : i32
    %c0_i32_0 = arith.constant 0 : i32
    %c0_i32_1 = arith.constant 0 : i32
    %c0_i32_2 = arith.constant 0 : i32
    return %c0_i32, %c0_i32_0, %c0_i32_1 : i32, i32, i32
  }
  func.func @transform_2(%arg0: i32) -> (i32, i32) {
    %c0_i32 = arith.constant 0 : i32
    %c0_i32_0 = arith.constant 0 : i32
    %c0_i32_1 = arith.constant 0 : i32
    return %c0_i32, %c0_i32_0 : i32, i32
  }
  func.func @transform_3(%arg0: i32) -> (i32, i32, i32) {
    %c0_i32 = arith.constant 0 : i32
    %c0_i32_0 = arith.constant 0 : i32
    %c0_i32_1 = arith.constant 0 : i32
    return %arg0, %c0_i32, %c0_i32_0 : i32, i32, i32
  }
}

module attributes {stable_mosaic.version = 11 : i64} {
  func.func @_apply_kernel(%arg0: i32, %arg1: memref<1x18x64xf32, #tpu.memory_space<vmem>>, %arg2: memref<3x64x128xf32, #tpu.memory_space<vmem>>, %arg3: memref<1x128xf32, #tpu.memory_space<vmem>>, %arg4: memref<1x128xf32, #tpu.memory_space<vmem>>, %arg5: memref<2x128x64xf32, #tpu.memory_space<vmem>>, %arg6: memref<2x8x16xf32, #tpu.memory_space<vmem>>, %arg7: memref<1x16x128xf32, #tpu.memory_space<vmem>>, %arg8: memref<1x8x64xf32, #tpu.memory_space<vmem>>) attributes {dimension_semantics = [#tpu.dimension_semantics<parallel>], iteration_bounds = array<i64: 2>, scalar_prefetch = 0 : i64, scratch_operands = 0 : i64, tpu.core_type = #tpu.core_type<tc>, window_params = [{transform_indices = @transform_0, window_bounds = array<i64: 1, 18, 64>}, {pipeline_mode = #tpu.pipeline_mode<synchronous>, transform_indices = @transform_1, window_bounds = array<i64: 3, 64, 128>}, {pipeline_mode = #tpu.pipeline_mode<synchronous>, transform_indices = @transform_2, window_bounds = array<i64: 1, 128>}, {pipeline_mode = #tpu.pipeline_mode<synchronous>, transform_indices = @transform_3, window_bounds = array<i64: 1, 128>}, {pipeline_mode = #tpu.pipeline_mode<synchronous>, transform_indices = @transform_4, window_bounds = array<i64: 2, 128, 64>}, {pipeline_mode = #tpu.pipeline_mode<synchronous>, transform_indices = @transform_5, window_bounds = array<i64: 2, 8, 16>}, {transform_indices = @transform_6, window_bounds = array<i64: 1, 16, 128>}, {transform_indices = @transform_7, window_bounds = array<i64: 1, 8, 64>}]} {
    %c0 = arith.constant 0 : index
    %c0_0 = arith.constant 0 : index
    %c0_1 = arith.constant 0 : index
    %0 = vector.load %arg1[%c0, %c0_0, %c0_1] : memref<1x18x64xf32, #tpu.memory_space<vmem>>, vector<1x16x64xf32>
    %1 = vector.shape_cast %0 : vector<1x16x64xf32> to vector<16x64xf32>
    %c0_2 = arith.constant 0 : index
    %c0_3 = arith.constant 0 : index
    %c0_4 = arith.constant 0 : index
    %2 = vector.load %arg2[%c0_2, %c0_3, %c0_4] : memref<3x64x128xf32, #tpu.memory_space<vmem>>, vector<1x64x128xf32>
    %3 = vector.shape_cast %2 : vector<1x64x128xf32> to vector<64x128xf32>
    %cst = arith.constant dense<0.000000e+00> : vector<16x128xf32>
    %4 = tpu.matmul %1, %3, %cst {dimension_numbers = #tpu.dot_dimension_numbers<[1], [0], [0], [1], [0, 0, 1, 1], [], []>, precision = #tpu.contract_precision<fp32>} : vector<16x64xf32>, vector<64x128xf32>, vector<16x128xf32> -> vector<16x128xf32>
    %c0_5 = arith.constant 0 : index
    %c1 = arith.constant 1 : index
    %c0_6 = arith.constant 0 : index
    %5 = vector.load %arg1[%c0_5, %c1, %c0_6] : memref<1x18x64xf32, #tpu.memory_space<vmem>>, vector<1x16x64xf32>
    %6 = vector.shape_cast %5 : vector<1x16x64xf32> to vector<16x64xf32>
    %c1_7 = arith.constant 1 : index
    %c0_8 = arith.constant 0 : index
    %c0_9 = arith.constant 0 : index
    %7 = vector.load %arg2[%c1_7, %c0_8, %c0_9] : memref<3x64x128xf32, #tpu.memory_space<vmem>>, vector<1x64x128xf32>
    %8 = vector.shape_cast %7 : vector<1x64x128xf32> to vector<64x128xf32>
    %cst_10 = arith.constant dense<0.000000e+00> : vector<16x128xf32>
    %9 = tpu.matmul %6, %8, %cst_10 {dimension_numbers = #tpu.dot_dimension_numbers<[1], [0], [0], [1], [0, 0, 1, 1], [], []>, precision = #tpu.contract_precision<fp32>} : vector<16x64xf32>, vector<64x128xf32>, vector<16x128xf32> -> vector<16x128xf32>
    %10 = arith.addf %4, %9 : vector<16x128xf32>
    %c0_11 = arith.constant 0 : index
    %c2 = arith.constant 2 : index
    %c0_12 = arith.constant 0 : index
    %11 = vector.load %arg1[%c0_11, %c2, %c0_12] : memref<1x18x64xf32, #tpu.memory_space<vmem>>, vector<1x16x64xf32>
    %12 = vector.shape_cast %11 : vector<1x16x64xf32> to vector<16x64xf32>
    %c2_13 = arith.constant 2 : index
    %c0_14 = arith.constant 0 : index
    %c0_15 = arith.constant 0 : index
    %13 = vector.load %arg2[%c2_13, %c0_14, %c0_15] : memref<3x64x128xf32, #tpu.memory_space<vmem>>, vector<1x64x128xf32>
    %14 = vector.shape_cast %13 : vector<1x64x128xf32> to vector<64x128xf32>
    %cst_16 = arith.constant dense<0.000000e+00> : vector<16x128xf32>
    %15 = tpu.matmul %12, %14, %cst_16 {dimension_numbers = #tpu.dot_dimension_numbers<[1], [0], [0], [1], [0, 0, 1, 1], [], []>, precision = #tpu.contract_precision<fp32>} : vector<16x64xf32>, vector<64x128xf32>, vector<16x128xf32> -> vector<16x128xf32>
    %16 = arith.addf %10, %15 : vector<16x128xf32>
    %c0_17 = arith.constant 0 : index
    %c0_18 = arith.constant 0 : index
    %17 = vector.load %arg3[%c0_17, %c0_18] : memref<1x128xf32, #tpu.memory_space<vmem>>, vector<1x128xf32>
    %18 = vector.broadcast %17 : vector<1x128xf32> to vector<16x128xf32>
    %19 = arith.mulf %16, %18 : vector<16x128xf32>
    %c0_19 = arith.constant 0 : index
    %c0_20 = arith.constant 0 : index
    %20 = vector.load %arg4[%c0_19, %c0_20] : memref<1x128xf32, #tpu.memory_space<vmem>>, vector<1x128xf32>
    %21 = vector.broadcast %20 : vector<1x128xf32> to vector<16x128xf32>
    %22 = arith.addf %19, %21 : vector<16x128xf32>
    %cst_21 = arith.constant 0.000000e+00 : f32
    %23 = vector.broadcast %cst_21 : f32 to vector<16x128xf32>
    %24 = arith.maximumf %22, %23 : vector<16x128xf32>
    %c0_22 = arith.constant 0 : index
    %c0_23 = arith.constant 0 : index
    %c0_24 = arith.constant 0 : index
    %25 = vector.load %arg7[%c0_22, %c0_23, %c0_24] : memref<1x16x128xf32, #tpu.memory_space<vmem>>, vector<1x16x128xf32>
    %26 = vector.shape_cast %25 : vector<1x16x128xf32> to vector<16x128xf32>
    %27 = vector.shape_cast %24 : vector<16x128xf32> to vector<1x16x128xf32>
    tpu.vector_store %arg7[%c0_22, %c0_23, %c0_24], %27 {strides = array<i32>} : memref<1x16x128xf32, #tpu.memory_space<vmem>>, vector<1x16x128xf32>,
    %c0_25 = arith.constant 0 : index
    %c0_26 = arith.constant 0 : index
    %c0_27 = arith.constant 0 : index
    %28 = vector.load %arg5[%c0_25, %c0_26, %c0_27] : memref<2x128x64xf32, #tpu.memory_space<vmem>>, vector<1x128x64xf32>
    %29 = vector.shape_cast %28 : vector<1x128x64xf32> to vector<128x64xf32>
    %cst_28 = arith.constant dense<0.000000e+00> : vector<16x64xf32>
    %30 = tpu.matmul %24, %29, %cst_28 {dimension_numbers = #tpu.dot_dimension_numbers<[1], [0], [0], [1], [0, 0, 1, 1], [], []>, precision = #tpu.contract_precision<fp32>} : vector<16x128xf32>, vector<128x64xf32>, vector<16x64xf32> -> vector<16x64xf32>
    %c1_29 = arith.constant 1 : index
    %c0_30 = arith.constant 0 : index
    %c0_31 = arith.constant 0 : index
    %31 = vector.load %arg5[%c1_29, %c0_30, %c0_31] : memref<2x128x64xf32, #tpu.memory_space<vmem>>, vector<1x128x64xf32>
    %32 = vector.shape_cast %31 : vector<1x128x64xf32> to vector<128x64xf32>
    %cst_32 = arith.constant dense<0.000000e+00> : vector<16x64xf32>
    %33 = tpu.matmul %24, %32, %cst_32 {dimension_numbers = #tpu.dot_dimension_numbers<[1], [0], [0], [1], [0, 0, 1, 1], [], []>, precision = #tpu.contract_precision<fp32>} : vector<16x128xf32>, vector<128x64xf32>, vector<16x64xf32> -> vector<16x64xf32>
    %34 = arith.maximumf %30, %33 : vector<16x64xf32>
    %c0_33 = arith.constant 0 : index
    %c0_34 = arith.constant 0 : index
    %c0_35 = arith.constant 0 : index
    %35 = vector.load %arg6[%c0_33, %c0_34, %c0_35] : memref<2x8x16xf32, #tpu.memory_space<vmem>>, vector<1x8x16xf32>
    %36 = vector.shape_cast %35 : vector<1x8x16xf32> to vector<8x16xf32>
    %cst_36 = arith.constant dense<0.000000e+00> : vector<8x64xf32>
    %37 = tpu.matmul %36, %34, %cst_36 {dimension_numbers = #tpu.dot_dimension_numbers<[1], [0], [0], [1], [0, 0, 1, 1], [], []>, precision = #tpu.contract_precision<fp32>} : vector<8x16xf32>, vector<16x64xf32>, vector<8x64xf32> -> vector<8x64xf32>
    %c1_37 = arith.constant 1 : index
    %c0_38 = arith.constant 0 : index
    %c0_39 = arith.constant 0 : index
    %38 = vector.load %arg6[%c1_37, %c0_38, %c0_39] : memref<2x8x16xf32, #tpu.memory_space<vmem>>, vector<1x8x16xf32>
    %39 = vector.shape_cast %38 : vector<1x8x16xf32> to vector<8x16xf32>
    %cst_40 = arith.constant dense<0.000000e+00> : vector<8x64xf32>
    %40 = tpu.matmul %39, %34, %cst_40 {dimension_numbers = #tpu.dot_dimension_numbers<[1], [0], [0], [1], [0, 0, 1, 1], [], []>, precision = #tpu.contract_precision<fp32>} : vector<8x16xf32>, vector<16x64xf32>, vector<8x64xf32> -> vector<8x64xf32>
    %41 = arith.maximumf %37, %40 : vector<8x64xf32>
    %c0_41 = arith.constant 0 : index
    %c0_42 = arith.constant 0 : index
    %c0_43 = arith.constant 0 : index
    %42 = vector.load %arg8[%c0_41, %c0_42, %c0_43] : memref<1x8x64xf32, #tpu.memory_space<vmem>>, vector<1x8x64xf32>
    %43 = vector.shape_cast %42 : vector<1x8x64xf32> to vector<8x64xf32>
    %44 = vector.shape_cast %41 : vector<8x64xf32> to vector<1x8x64xf32>
    tpu.vector_store %arg8[%c0_41, %c0_42, %c0_43], %44 {strides = array<i32>} : memref<1x8x64xf32, #tpu.memory_space<vmem>>, vector<1x8x64xf32>,
    return
  }
  func.func @transform_0(%arg0: i32) -> (i32, i32, i32) {
    %c0_i32 = arith.constant 0 : i32
    %c0_i32_0 = arith.constant 0 : i32
    %c0_i32_1 = arith.constant 0 : i32
    return %arg0, %c0_i32, %c0_i32_0 : i32, i32, i32
  }
  func.func @transform_1(%arg0: i32) -> (i32, i32, i32) {
    %c0_i32 = arith.constant 0 : i32
    %c0_i32_0 = arith.constant 0 : i32
    %c0_i32_1 = arith.constant 0 : i32
    %c0_i32_2 = arith.constant 0 : i32
    return %c0_i32, %c0_i32_0, %c0_i32_1 : i32, i32, i32
  }
  func.func @transform_2(%arg0: i32) -> (i32, i32) {
    %c0_i32 = arith.constant 0 : i32
    %c0_i32_0 = arith.constant 0 : i32
    %c0_i32_1 = arith.constant 0 : i32
    return %c0_i32, %c0_i32_0 : i32, i32
  }
  func.func @transform_3(%arg0: i32) -> (i32, i32) {
    %c0_i32 = arith.constant 0 : i32
    %c0_i32_0 = arith.constant 0 : i32
    %c0_i32_1 = arith.constant 0 : i32
    return %c0_i32, %c0_i32_0 : i32, i32
  }
  func.func @transform_4(%arg0: i32) -> (i32, i32, i32) {
    %c0_i32 = arith.constant 0 : i32
    %c0_i32_0 = arith.constant 0 : i32
    %c0_i32_1 = arith.constant 0 : i32
    %c0_i32_2 = arith.constant 0 : i32
    return %c0_i32, %c0_i32_0, %c0_i32_1 : i32, i32, i32
  }
  func.func @transform_5(%arg0: i32) -> (i32, i32, i32) {
    %c0_i32 = arith.constant 0 : i32
    %c0_i32_0 = arith.constant 0 : i32
    %c0_i32_1 = arith.constant 0 : i32
    %c0_i32_2 = arith.constant 0 : i32
    return %c0_i32, %c0_i32_0, %c0_i32_1 : i32, i32, i32
  }
  func.func @transform_6(%arg0: i32) -> (i32, i32, i32) {
    %c0_i32 = arith.constant 0 : i32
    %c0_i32_0 = arith.constant 0 : i32
    %c0_i32_1 = arith.constant 0 : i32
    return %arg0, %c0_i32, %c0_i32_0 : i32, i32, i32
  }
  func.func @transform_7(%arg0: i32) -> (i32, i32, i32) {
    %c0_i32 = arith.constant 0 : i32
    %c0_i32_0 = arith.constant 0 : i32
    %c0_i32_1 = arith.constant 0 : i32
    return %arg0, %c0_i32, %c0_i32_0 : i32, i32, i32
  }
}

</mosaic_0001>

<bundles_post_ra>
// kernel: tile.13
= control target key start
LH: loop header
LB: loop body
LE: loop exit
PB: predicated region body
PF: predicated region fallthrough
CT: control target
= control target key end

     0   :  { %s28_s0 = inlined_call_operand.vmem [shape: f32[8], index: 0, kind: input, shape index: {}]   ;;  %s29_s1 = inlined_call_operand.vmem [shape: f32[16,8], index: 1, kind: output, shape index: {}]  }
   0x1   :  { %v4_v0 = vld [vmem:[%s28_s0] ss:$0 sm:$0xff] }
   0x2   :  { %5 = vst [vmem:[%s29_s1] sm:$0xff] %v4_v0  ;;  %8 = vst [vmem:[%s29_s1 + $0x8] sm:$0xff] %v4_v0 }

// kernel: tile.14
= control target key start
LH: loop header
LB: loop body
LE: loop exit
PB: predicated region body
PF: predicated region fallthrough
CT: control target
= control target key end

     0   :  { %s131_s10 = smov 120   ;;  %s132_s11 = smov 104   ;;  %vm3_vm0 = vcmask 64512   ;;  %vm9_vm1 = vcmask 1048512   ;;  %vm15_vm2 = vcmask 982912   ;;  %vm21_vm3 = vcmask 917312   ;;  %s207_s0 = inlined_call_operand.vmem [shape: f32[16,8], index: 0, kind: input, shape index: {}]   ;;  %s208_s1 = inlined_call_operand.vmem [shape: f32[1,128], index: 1, kind: output, shape index: {}]  }
   0x1   :  { %v101_v0 = vld [vmem:[%s207_s0 + $0xf] sm:$0x1]   ;;  %v103_v1 = vld [vmem:[%s207_s0 + $0xd] sm:$0x1]   ;;  %v102_v2 = vld [vmem:[%s207_s0 + $0xe] sm:$0x1]  }
   0x2   :  { %7 = vrot.lane.b32.xlu0 %v101_v0, %s131_s10  ;;  %19 = vrot.lane.b32.xlu1 %v103_v1, %s132_s11  ;;  %v104_v3 = vld [vmem:[%s207_s0 + $0xc] sm:$0x1]   ;;  %s133_s16 = smov 112   ;;  %s134_s17 = smov 96   ;;  %v105_v4 = vld [vmem:[%s207_s0 + $0xb] sm:$0x1]  }
   0x3   :  { %v106_v5 = vld [vmem:[%s207_s0 + $0xa] sm:$0x1]   ;;  %v2_v6 = vld [vmem:[%s207_s0] sm:$0x1]   ;;  %s135_s24 = smov 88   ;;  %s136_s25 = smov 80  }
   0x4   :  { %4 = vst.msk [vmem:[#allocation0] sm:$0x1] %vm3_vm0, %v2_v6   ;;  %v107_v7 = vld [vmem:[%s207_s0 + $0x9] sm:$0x1]   ;;  %v108_v8 = vld [vmem:[%s207_s0 + $0x8] sm:$0x1]  }
   0x5   :  { %s137_s30 = smov 72   ;;  %s138_s2 = smov 64   ;;  %v109_v9 = vld [vmem:[%s207_s0 + $0x7] sm:$0x1]   ;;  %v110_v10 = vld [vmem:[%s207_s0 + $0x6] sm:$0x1]  }
   0x6   :  { %13 = vrot.lane.b32.xlu0 %v102_v2, %s133_s16  ;;  %25 = vrot.lane.b32.xlu1 %v104_v3, %s134_s17  ;;  %s139_s7 = smov 56   ;;  %s140_s8 = smov 48   ;;  %v111_v11 = vld [vmem:[%s207_s0 + $0x5] sm:$0x1]   ;;  %v112_v12 = vld [vmem:[%s207_s0 + $0x4] sm:$0x1]  }
   0x7   :  { %s141_s13 = smov 40   ;;  %s142_s14 = smov 32   ;;  %v113_v13 = vld [vmem:[%s207_s0 + $0x3] sm:$0x1]   ;;  %v114_v14 = vld [vmem:[%s207_s0 + $0x2] sm:$0x1]  }
   0x8   :  { %s143_s19 = smov 24   ;;  %s144_s20 = smov 16   ;;  %v115_v15 = vld [vmem:[%s207_s0 + $0x1] sm:$0x1]   ;;  %vm27_vm4 = vcmask 851712   ;;  %vm33_vm5 = vcmask 786112  }
   0x9   :  { %s145_s0 = smov 8   ;;  %vm39_vm6 = vcmask 720512   ;;  %vm45_vm7 = vcmask 654912   ;;  %vm51_vm8 = vcmask 589312   ;;  %vm57_vm9 = vcmask 523712  }
   0xa   :  { %31 = vrot.lane.b32.xlu0 %v105_v4, %s135_s24  ;;  %37 = vrot.lane.b32.xlu1 %v106_v5, %s136_s25  ;;  %vm63_vm10 = vcmask 458112   ;;  %vm69_vm11 = vcmask 392512   ;;  %vm75_vm12 = vcmask 326912   ;;  %vm81_vm13 = vcmask 261312  }
   0xb   :  { %vm87_vm14 = vcmask 195712   ;;  %vm93_vm15 = vcmask 130112  }
   0xe   :  { %43 = vrot.lane.b32.xlu0 %v107_v7, %s137_s30  ;;  %49 = vrot.lane.b32.xlu1 %v108_v8, %s138_s2 }
  0x12   :  { %55 = vrot.lane.b32.xlu0 %v109_v9, %s139_s7  ;;  %61 = vrot.lane.b32.xlu1 %v110_v10, %s140_s8 }
  0x16   :  { %67 = vrot.lane.b32.xlu0 %v111_v11, %s141_s13  ;;  %73 = vrot.lane.b32.xlu1 %v112_v12, %s142_s14 }
  0x1a   :  { %79 = vrot.lane.b32.xlu0 %v113_v13, %s143_s19  ;;  %85 = vrot.lane.b32.xlu1 %v114_v14, %s144_s20 }
  0x1e   :  { %91 = vrot.lane.b32.xlu0 %v115_v15, %s145_s0 }
  0x74   :  { %v8_v16 = vpop.permute.xlu0 %7   ;;  %v20_v17 = vpop.permute.xlu1 %19  }
  0x75   :  { %10 = vst.msk [vmem:[#allocation0] sm:$0x1] %vm9_vm1, %v8_v16  }
  0x78   :  { %v14_v18 = vpop.permute.xlu0 %13   ;;  %v26_v19 = vpop.permute.xlu1 %25  }
  0x79   :  { %16 = vst.msk [vmem:[#allocation0] sm:$0x1] %vm15_vm2, %v14_v18  }
  0x7a   :  { %22 = vst.msk [vmem:[#allocation0] sm:$0x1] %vm21_vm3, %v20_v17  }
  0x7b   :  { %28 = vst.msk [vmem:[#allocation0] sm:$0x1] %vm27_vm4, %v26_v19  }
  0x7c   :  { %v32_v20 = vpop.permute.xlu0 %31   ;;  %v38_v21 = vpop.permute.xlu1 %37  }
  0x7d   :  { %34 = vst.msk [vmem:[#allocation0] sm:$0x1] %vm33_vm5, %v32_v20  }
  0x7e   :  { %40 = vst.msk [vmem:[#allocation0] sm:$0x1] %vm39_vm6, %v38_v21  }
  0x80   :  { %v44_v22 = vpop.permute.xlu0 %43   ;;  %v50_v23 = vpop.permute.xlu1 %49  }
  0x81   :  { %46 = vst.msk [vmem:[#allocation0] sm:$0x1] %vm45_vm7, %v44_v22  }
  0x82   :  { %52 = vst.msk [vmem:[#allocation0] sm:$0x1] %vm51_vm8, %v50_v23  }
  0x84   :  { %v56_v24 = vpop.permute.xlu0 %55   ;;  %v62_v25 = vpop.permute.xlu1 %61  }
  0x85   :  { %58 = vst.msk [vmem:[#allocation0] sm:$0x1] %vm57_vm9, %v56_v24  }
  0x86   :  { %64 = vst.msk [vmem:[#allocation0] sm:$0x1] %vm63_vm10, %v62_v25  }
  0x88   :  { %v68_v26 = vpop.permute.xlu0 %67   ;;  %v74_v27 = vpop.permute.xlu1 %73  }
  0x89   :  { %70 = vst.msk [vmem:[#allocation0] sm:$0x1] %vm69_vm11, %v68_v26  }
  0x8a   :  { %76 = vst.msk [vmem:[#allocation0] sm:$0x1] %vm75_vm12, %v74_v27  }
  0x8c   :  { %v80_v28 = vpop.permute.xlu0 %79   ;;  %v86_v29 = vpop.permute.xlu1 %85  }
  0x8d   :  { %82 = vst.msk [vmem:[#allocation0] sm:$0x1] %vm81_vm13, %v80_v28  }
  0x8e   :  { %88 = vst.msk [vmem:[#allocation0] sm:$0x1] %vm87_vm14, %v86_v29  }
  0x90   :  { %v92_v30 = vpop.permute.xlu0 %91  }
  0x91   :  { %94 = vst.msk [vmem:[#allocation0] sm:$0x1] %vm93_vm15, %v92_v30  }
  0x98   :  { %v98_v31 = vld [vmem:[#allocation0] sm:$0x1] }
  0x99   :  { %100 = vst [vmem:[%s208_s1] sm:$0x1] %v98_v31 }

// kernel: encoder_block_forward.2
= control target key start
LH: loop header
LB: loop body
LE: loop exit
PB: predicated region body
PF: predicated region fallthrough
CT: control target
= control target key end

     0   :  { %s5369_s12 = smov 0   ;;  %s6351_s0 = inlined_call_operand.vmem [shape: f32[2,18,64], index: 0, kind: input, shape index: {}]   ;;  %s6352_s1 = inlined_call_operand.vmem [shape: f32[3,64,128], index: 1, kind: input, shape index: {}]   ;;  %s6353_s2 = inlined_call_operand.vmem [shape: f32[128,8], index: 2, kind: input, shape index: {}]   ;;  %s6354_s3 = inlined_call_operand.vmem [shape: f32[2,2,8], index: 3, kind: output, shape index: {}]  }
   0x1 LB: > { %s3423_s13 = sadd.s32 4294967295, %s5347_s12   ;;  %p3427_p0 = scmp.ge.s32.totalorder %s5347_s12, 1  ;;  %s5347_s12 = sphi %s5369_s12, %s13_s12  }
   0x2   : > { %p137_p1 = scmp.lt.s32.totalorder %s5347_s12, 3 }
   0x4   : > { %p138_p2 = pnand %p3427_p0, %p137_p1 }
   0x5   : > { %v3430_v0 = vld [vmem:[%s6352_s1 + $0x40] sm:$0xff] (!%p138_p2)  ;;  %v3431_v1 = vld [vmem:[%s6352_s1 + $0x48] sm:$0xff] (!%p138_p2)  ;;  %v3432_v2 = vld [vmem:[%s6352_s1 + $0x50] sm:$0xff] (!%p138_p2)  ;;  %p160_p3 = scmp.lt.s32.totalorder (!%p138_p2), %s3423_s13, 1  ;;  %vm190_vm0 = vcmask (!%p138_p2), 523264   ;;  %vm3348_vm1 = vcmask (!%p138_p2), 64512  }
   0x6   : > { %141 = sbr.rel (%p138_p2) target bundleno = 1067 (0x42b), region = 32  ;;  %v198_v3 = vand.u32 (!%p138_p2), 4294901760, %v3430_v0  ;;  %v201_v4 = vand.u32 (!%p138_p2), 4294901760, %v3431_v1  ;;  %v3433_v5 = vld [vmem:[%s6352_s1 + $0x58] sm:$0xff] (!%p138_p2)  ;;  %v204_v6 = vand.u32 (!%p138_p2), 4294901760, %v3432_v2  ;;  %v3434_v7 = vld [vmem:[%s6352_s1 + $0x60] sm:$0xff] (!%p138_p2) }
   0x7   : > { %v3435_v8 = vld [vmem:[%s6352_s1 + $0x68] sm:$0xff] (!%p138_p2)  ;;  %v207_v9 = vand.u32 (!%p138_p2), 4294901760, %v3433_v5  ;;  %v210_v10 = vand.u32 (!%p138_p2), 4294901760, %v3434_v7  ;;  %v3436_v11 = vld [vmem:[%s6352_s1 + $0x70] sm:$0xff] (!%p138_p2)  ;;  %v3437_v12 = vld [vmem:[%s6352_s1 + $0x78] sm:$0xff] (!%p138_p2)  ;;  %vm3358_vm2 = vcmask (!%p138_p2), 57344  }
   0x8   : > { %v5403_v13 = vpack.c.bf16 (!%p138_p2), %v201_v4, %v198_v3  ;;  %v213_v14 = vand.u32 (!%p138_p2), 4294901760, %v3435_v8  ;;  %v216_v15 = vand.u32 (!%p138_p2), 4294901760, %v3436_v11  ;;  %v5405_v16 = vsub.f32 (!%p138_p2), %v3430_v0, %v198_v3 }
   0x9   : > { %v5407_v17 = vpack.c.bf16 (!%p138_p2), %v207_v9, %v204_v6  ;;  %v219_v18 = vand.u32 (!%p138_p2), 4294901760, %v3437_v12  ;;  %v5410_v19 = vsub.f32 (!%p138_p2), %v3431_v1, %v201_v4  ;;  %v5412_v20 = vsub.f32 (!%p138_p2), %v3432_v2, %v204_v6 }
   0xa   : > { %4607 = vmatprep.subr.bf16.mxu0 (!%p138_p2), %v5403_v13  ;;  %v293_v21 = vand.u32 (!%p138_p2), 4294901760, %v5405_v16  ;;  %v5416_v22 = vsub.f32 (!%p138_p2), %v3433_v5, %v207_v9  ;;  %v5426_v25 = vsub.f32 (!%p138_p2), %v3434_v7, %v210_v10  ;;  %v5429_v26 = vpack.c.bf16 (!%p138_p2), %v213_v14, %v210_v10 }
   0xb   : > { %4609 = vmatpush3.bf16.msra.mxu0 (!%p138_p2), %v5403_v13  ;;  %v300_v23 = vand.u32 (!%p138_p2), 4294901760, %v5410_v19  ;;  %v307_v24 = vand.u32 (!%p138_p2), 4294901760, %v5412_v20  ;;  %v5437_v31 = vsub.f32 (!%p138_p2), %v3435_v8, %v213_v14  ;;  %v5439_v32 = vpack.c.bf16 (!%p138_p2), %v219_v18, %v216_v15 }
   0xc   : > { %4611 = vmatprep.subr.bf16.mxu0 (!%p138_p2), %v5407_v17  ;;  %v294_v28 = vsub.f32 (!%p138_p2), %v5405_v16, %v293_v21  ;;  %v314_v30 = vand.u32 (!%p138_p2), 4294901760, %v5416_v22  ;;  %v5453_v39 = vsub.f32 (!%p138_p2), %v3436_v11, %v216_v15  ;;  %v321_v43 = vand.u32 (!%p138_p2), 4294901760, %v5426_v25 }
   0xd   : > { %s6394_s13 = smov (!%p160_p3, %s3423_s13), 1  ;;  %v301_v34 = vsub.f32 %v5410_v19, %v300_v23  ;;  %v308_v38 = vsub.f32 %v5412_v20, %v307_v24  ;;  %v328_v46 = vand.u32 4294901760, %v5437_v31  ;;  %v5466_v47 = vsub.f32 %v3437_v12, %v219_v18 }
   0xe   : > { %s5332_s30 = smul.u32 24, %s6394_s13  ;;  %v295_v40 = vand.u32 4294901760, %v294_v28  ;;  %v315_v42 = vsub.f32 %v5416_v22, %v314_v30  ;;  %v322_v53 = vsub.f32 %v5426_v25, %v321_v43  ;;  %v335_v54 = vand.u32 4294901760, %v5453_v39  ;;  %s3429_s24 = sshll.u32 %s6394_s13, 1 }
   0xf   : > { %4613 = vmatpush3.bf16.msra.mxu0 %v5407_v17  ;;  %v302_v41 = vand.u32 4294901760, %v301_v34  ;;  %v309_v50 = vand.u32 4294901760, %v308_v38  ;;  %v329_v57 = vsub.f32 %v5437_v31, %v328_v46  ;;  %v342_v58 = vand.u32 4294901760, %v5466_v47  ;;  %v175_v34 = vld [vmem:[%s6352_s1 + $0x20] sm:$0xff]  ;;  %s168_s27 = scalar_lea.vmem %s6354_s3, %s3429_s24 }
  0x10   : > { %s5422_s6 = scalar_lea.vmem %s6351_s0, %s5332_s30  ;;  %4615 = vmatprep.subr.bf16.mxu0 %v5429_v26  ;;  %v316_v52 = vand.u32 4294901760, %v315_v42  ;;  %v323_v61 = vand.u32 4294901760, %v322_v53  ;;  %v336_v0 = vsub.f32 %v5453_v39, %v335_v54  ;;  %v4638_v6 = vpack.c.bf16 %v5410_v19, %v5405_v16 }
  0x11   : > { %v179_v27 = vld [vmem:[%s5422_s6 + $0x1] sm:$0xff]  ;;  %v180_v29 = vld [vmem:[%s5422_s6 + $0x9] sm:$0xff]  ;;  %v4622_v51 = vpack.c.bf16 %v302_v41, %v295_v40  ;;  %v330_v63 = vand.u32 4294901760, %v329_v57  ;;  %v343_v1 = vsub.f32 %v5466_v47, %v342_v58  ;;  %v4642_v7 = vpack.c.bf16 %v5416_v22, %v5412_v20  ;;  %v178_v40 = vld [vmem:[%s6352_s1 + $0x38] sm:$0xff] }
  0x12   : > { %v192_v33 = vsel %vm190_vm0, %v179_v27, 0  ;;  %v195_v35 = vsel %vm190_vm0, %v180_v29, 0  ;;  %v4626_v62 = vpack.c.bf16 %v316_v52, %v309_v50  ;;  %v337_v3 = vand.u32 4294901760, %v336_v0  ;;  %v169_v15 = vld [vmem:[%s5422_s6] sm:$0xff]  ;;  %v174_v27 = vld [vmem:[%s6352_s1 + $0x18] sm:$0xff] }
  0x13   : > { %v5446_v36 = vand.u32 4294901760, %v192_v33  ;;  %v5448_v37 = vand.u32 4294901760, %v195_v35  ;;  %4617 = vmatpush3.bf16.msra.mxu0 %v5429_v26  ;;  %v4630_v2 = vpack.c.bf16 %v330_v63, %v323_v61  ;;  %v344_v4 = vand.u32 4294901760, %v343_v1  ;;  %v171_v20 = vld [vmem:[%s6352_s1] sm:$0xff] }
  0x14   : > { %4619 = vmatprep.subr.bf16.mxu0 %v5439_v32  ;;  %v4646_v8 = vpack.c.bf16 %v5437_v31, %v5426_v25  ;;  %v4650_v9 = vpack.c.bf16 %v5466_v47, %v5453_v39  ;;  %v4670_v10 = vpack.c.bf16 %v300_v23, %v293_v21  ;;  %v4674_v11 = vpack.c.bf16 %v314_v30, %v307_v24  ;;  %v172_v21 = vld [vmem:[%s6352_s1 + $0x8] sm:$0xff]  ;;  %v173_v25 = vld [vmem:[%s6352_s1 + $0x10] sm:$0xff] }
  0x15   : > { %v271_v44 = vsub.f32 %v192_v33, %v5446_v36  ;;  %v5463_v45 = vsub.f32 %v195_v35, %v5448_v37  ;;  %v4634_v5 = vpack.c.bf16 %v344_v4, %v337_v3  ;;  %v4678_v12 = vpack.c.bf16 %v328_v46, %v321_v43  ;;  %v170_v24 = vld [vmem:[%s5422_s6 + $0x8] sm:$0xff]  ;;  %v177_v39 = vld [vmem:[%s6352_s1 + $0x30] sm:$0xff] }
  0x16   : > { %v4682_v14 = vpack.c.bf16 %v342_v58, %v335_v54  ;;  %v778_v16 = vsel %vm190_vm0, %v169_v15, 0  ;;  %v787_v23 = vand.u32 4294901760, %v172_v21  ;;  %v781_v29 = vsel %vm190_vm0, %v170_v24, 0 }
  0x17   : > { %v272_v48 = vand.u32 4294901760, %v271_v44  ;;  %v282_v49 = vand.u32 4294901760, %v5463_v45  ;;  %4621 = vmatpush3.bf16.msra.mxu0 %v5439_v32  ;;  %v5521_v18 = vand.u32 4294901760, %v778_v16  ;;  %v790_v31 = vand.u32 4294901760, %v173_v25 }
  0x18   : > { %4623 = vmatprep.subr.bf16.mxu0 %v4622_v51  ;;  %v793_v33 = vand.u32 4294901760, %v174_v27  ;;  %v5560_v35 = vsub.f32 %v172_v21, %v787_v23  ;;  %v796_v38 = vand.u32 4294901760, %v175_v34  ;;  %v802_v47 = vand.u32 4294901760, %v177_v39 }
  0x19   : > { %v273_v55 = vsub.f32 %v271_v44, %v272_v48  ;;  %v283_v56 = vsub.f32 %v5463_v45, %v282_v49  ;;  %v5528_v19 = vsub.f32 %v778_v16, %v5521_v18  ;;  %v5575_v43 = vsub.f32 %v173_v25, %v790_v31 }
  0x1a   : > { %v5581_v46 = vsub.f32 %v174_v27, %v793_v33  ;;  %v5592_v52 = vsub.f32 %v175_v34, %v796_v38  ;;  %v5616_v0 = vsub.f32 %v177_v39, %v802_v47  ;;  %v1963_v34 = vld [vmem:[%s6353_s2 + $0x8] sm:$0xff] }
  0x1b   : > { %v274_v59 = vand.u32 4294901760, %v273_v55  ;;  %v284_v60 = vand.u32 4294901760, %v283_v56  ;;  %v858_v22 = vand.u32 4294901760, %v5528_v19  ;;  %v1982_v39 = vand.u32 4294901760, %v1963_v34 }
  0x1c   : > { %v900_v55 = vand.u32 4294901760, %v5581_v46  ;;  %v4738_v25 = vpack.c.bf16 %v5581_v46, %v5575_v43 }
  0x1d   : > { %3860 = vmatprep.mubr.f32.mxu0 %v274_v59 }
  0x1e   : > { %3861 = vmatmul.mubr.f32.vlgmr.msra.gmra.mrb[0].mxu0 %v284_v60  ;;  %v907_v60 = vand.u32 4294901760, %v5592_v52  ;;  %v901_v63 = vsub.f32 %v5581_v46, %v900_v55 }
  0x1f   : > { %4625 = vmatpush3.bf16.msra.mxu0 %v4622_v51  ;;  %3879 = vmatprep.mubr.f32.mxu0 %v5446_v36  ;;  %v893_v51 = vand.u32 4294901760, %v5575_v43 }
  0x20   : > { %4627 = vmatprep.subr.bf16.mxu0 %v4626_v62  ;;  %v908_v4 = vsub.f32 %v5592_v52, %v907_v60 }
  0x21   : > { %v894_v59 = vsub.f32 %v5575_v43, %v893_v51  ;;  %v1967_v43 = vld [vmem:[%s6353_s2 + $0x28] sm:$0xff] }
  0x23   : > { %4629 = vmatpush3.bf16.msra.mxu0 %v4626_v62  ;;  %v895_v3 = vand.u32 4294901760, %v894_v59 }
  0x24   : > { %4631 = vmatprep.subr.bf16.mxu0 %v4630_v2 }
  0x27   : > { %4633 = vmatpush3.bf16.msra.mxu0 %v4630_v2 }
  0x28   : > { %4635 = vmatprep.subr.bf16.mxu0 %v4634_v5 }
  0x2b   : > { %4637 = vmatpush3.bf16.msra.mxu0 %v4634_v5 }
  0x2c   : > { %4639 = vmatprep.subr.bf16.mxu0 %v4638_v6 }
  0x2e   : > { %3880 = vmatmul.mubr.f32.vlgmr.msra.gmra.mrb[0].mxu0 %v5448_v37 }
  0x2f   : > { %4641 = vmatpush3.bf16.msra.mxu0 %v4638_v6  ;;  %3898 = vmatprep.mubr.f32.mxu0 %v271_v44  ;;  %v5578_v44 = vpack.c.bf16 %v793_v33, %v790_v31  ;;  %v1363_v31 = vld [vmem:[%s5422_s6 + $0x2] sm:$0xff] }
  0x30   : > { %4643 = vmatprep.subr.bf16.mxu0 %v4642_v7  ;;  %v1962_v33 = vld [vmem:[%s6353_s2] sm:$0xff] }
  0x33   : > { %4645 = vmatpush3.bf16.msra.mxu0 %v4642_v7  ;;  %v902_v7 = vand.u32 4294901760, %v901_v63 }
  0x34   : > { %4647 = vmatprep.subr.bf16.mxu0 %v4646_v8 }
  0x37   : > { %4649 = vmatpush3.bf16.msra.mxu0 %v4646_v8  ;;  %v921_v8 = vand.u32 4294901760, %v5616_v0 }
  0x38   : > { %4651 = vmatprep.subr.bf16.mxu0 %v4650_v9 }
  0x39   : > { %v922_v15 = vsub.f32 %v5616_v0, %v921_v8 }
  0x3b   : > { %4653 = vmatpush3.bf16.msra.mxu0 %v4650_v9  ;;  %v923_v21 = vand.u32 4294901760, %v922_v15 }
  0x3c   : > { %4655 = vmatprep.subr.bf16.mxu0 %v5403_v13 }
  0x3e   : > { %3899 = vmatmul.mubr.f32.vlgmr.msra.gmra.mrb[0].mxu0 %v5463_v45 }
  0x3f   : > { %4657 = vmatpush3.bf16.msra.mxu0 %v5403_v13  ;;  %3917 = vmatprep.mubr.f32.mxu0 %v272_v48  ;;  %v805_v48 = vand.u32 4294901760, %v178_v40 }
  0x40   : > { %4659 = vmatprep.subr.bf16.mxu0 %v5407_v17 }
  0x41   : > { %v5603_v56 = vpack.c.bf16 %v805_v48, %v802_v47  ;;  %v5618_v1 = vsub.f32 %v178_v40, %v805_v48  ;;  %v1965_v40 = vld [vmem:[%s6353_s2 + $0x18] sm:$0xff]  ;;  %v1994_v47 = vand.u32 4294901760, %v1967_v43 }
  0x43   : > { %4661 = vmatpush3.bf16.msra.mxu0 %v5407_v17  ;;  %v928_v9 = vand.u32 4294901760, %v5618_v1 }
  0x44   : > { %4663 = vmatprep.subr.bf16.mxu0 %v5429_v26 }
  0x45   : > { %v929_v16 = vsub.f32 %v5618_v1, %v928_v9 }
  0x47   : > { %4665 = vmatpush3.bf16.msra.mxu0 %v5429_v26 }
  0x48   : > { %4667 = vmatprep.subr.bf16.mxu0 %v5439_v32 }
  0x4b   : > { %4669 = vmatpush3.bf16.msra.mxu0 %v5439_v32 }
  0x4c   : > { %4671 = vmatprep.subr.bf16.mxu0 %v4670_v10 }
  0x4e   : > { %3918 = vmatmul.mubr.f32.vlgmr.msra.gmra.mrb[0].mxu0 %v282_v49 }
  0x4f   : > { %4673 = vmatpush3.bf16.msra.mxu0 %v4670_v10  ;;  %3936 = vmatprep.mubr.f32.mxu0 %v5446_v36 }
  0x50   : > { %4675 = vmatprep.subr.bf16.mxu0 %v4674_v11 }
  0x53   : > { %4677 = vmatpush3.bf16.msra.mxu0 %v4674_v11  ;;  %v909_v11 = vand.u32 4294901760, %v908_v4 }
  0x54   : > { %4679 = vmatprep.subr.bf16.mxu0 %v4678_v12 }
  0x57   : > { %4681 = vmatpush3.bf16.msra.mxu0 %v4678_v12  ;;  %v4722_v12 = vpack.c.bf16 %v902_v7, %v895_v3 }
  0x58   : > { %4683 = vmatprep.subr.bf16.mxu0 %v4682_v14 }
  0x5b   : > { %4685 = vmatpush3.bf16.msra.mxu0 %v4682_v14 }
  0x5c   : > { %4687 = vmatprep.subr.bf16.mxu0 %v5403_v13 }
  0x5e   : > { %3937 = vmatmul.mubr.f32.vlgmr.msra.gmra.mrb[0].mxu0 %v5448_v37 }
  0x5f   : > { %4689 = vmatpush3.bf16.msra.mxu0 %v5403_v13  ;;  %3955 = vmatprep.mubr.f32.mxu0 %v5446_v36  ;;  %v784_v13 = vand.u32 4294901760, %v171_v20  ;;  %v5565_v36 = vand.u32 4294901760, %v781_v29 }
  0x60   : > { %4691 = vmatprep.subr.bf16.mxu0 %v5407_v17 }
  0x61   : > { %v5551_v28 = vsub.f32 %v171_v20, %v784_v13  ;;  %v5555_v30 = vpack.c.bf16 %v787_v23, %v784_v13  ;;  %v5585_v49 = vsub.f32 %v781_v29, %v5565_v36  ;;  %v930_v13 = vand.u32 4294901760, %v929_v16 }
  0x63   : > { %4693 = vmatpush3.bf16.msra.mxu0 %v5407_v17  ;;  %v859_v17 = vsub.f32 %v5528_v19, %v858_v22  ;;  %v879_v42 = vand.u32 4294901760, %v5551_v28  ;;  %v868_v57 = vand.u32 4294901760, %v5585_v49  ;;  %v4730_v23 = vpack.c.bf16 %v930_v13, %v923_v21  ;;  %v1972_v21 = vld [vmem:[%s6353_s2 + $0x50] sm:$0xff] }
  0x64   : > { %4695 = vmatprep.subr.bf16.mxu0 %v5429_v26  ;;  %v4734_v24 = vpack.c.bf16 %v5560_v35, %v5551_v28 }
  0x65   : > { %v860_v41 = vand.u32 4294901760, %v859_v17  ;;  %v880_v50 = vsub.f32 %v5551_v28, %v879_v42  ;;  %v869_v2 = vsub.f32 %v5585_v49, %v868_v57  ;;  %v4746_v17 = vpack.c.bf16 %v5618_v1, %v5616_v0 }
  0x67   : > { %4697 = vmatpush3.bf16.msra.mxu0 %v5429_v26  ;;  %v176_v26 = vld [vmem:[%s6352_s1 + $0x28] sm:$0xff]  ;;  %v881_v58 = vand.u32 4294901760, %v880_v50  ;;  %v870_v10 = vand.u32 4294901760, %v869_v2  ;;  %v5702_v50 = vsub.f32 %v1963_v34, %v1982_v39 }
  0x68   : > { %4699 = vmatprep.subr.bf16.mxu0 %v5439_v32  ;;  %v799_v45 = vand.u32 4294901760, %v176_v26 }
  0x6a   : > { %v5594_v53 = vsub.f32 %v176_v26, %v799_v45  ;;  %v4778_v26 = vpack.c.bf16 %v928_v9, %v921_v8 }
  0x6b   : > { %4701 = vmatpush3.bf16.msra.mxu0 %v5439_v32  ;;  %v886_v32 = vand.u32 4294901760, %v5560_v35 }
  0x6c   : > { %4703 = vmatprep.subr.bf16.mxu0 %v5555_v30  ;;  %v914_v61 = vand.u32 4294901760, %v5594_v53  ;;  %v4742_v27 = vpack.c.bf16 %v5594_v53, %v5592_v52  ;;  %v1968_v52 = vld [vmem:[%s6353_s2 + $0x30] sm:$0xff] }
  0x6d   : > { %v887_v54 = vsub.f32 %v5560_v35, %v886_v32  ;;  %v4766_v29 = vpack.c.bf16 %v886_v32, %v879_v42  ;;  %v1964_v35 = vld [vmem:[%s6353_s2 + $0x10] sm:$0xff]  ;;  %v1966_v42 = vld [vmem:[%s6353_s2 + $0x20] sm:$0xff]  ;;  %v1988_v32 = vand.u32 4294901760, %v1965_v40  ;;  %v1997_v1 = vand.u32 4294901760, %v1968_v52 }
  0x6e   : > { %3956 = vmatmul.mubr.f32.vlgmr.msra.gmra.mrb[0].mxu0 %v5448_v37  ;;  %v5597_v37 = vpack.c.bf16 %v799_v45, %v796_v38  ;;  %v915_v5 = vsub.f32 %v5594_v53, %v914_v61  ;;  %v4774_v28 = vpack.c.bf16 %v914_v61, %v907_v60  ;;  %v1979_v38 = vand.u32 4294901760, %v1962_v33  ;;  %v1969_v53 = vld [vmem:[%s6353_s2 + $0x38] sm:$0xff] }
  0x6f   : > { %4705 = vmatpush3.bf16.msra.mxu0 %v5555_v30  ;;  %3974 = vmatprep.mubr.f32.mxu0 %v860_v41  ;;  %v888_v62 = vand.u32 4294901760, %v887_v54  ;;  %v1985_v41 = vand.u32 4294901760, %v1964_v35  ;;  %v1991_v46 = vand.u32 4294901760, %v1966_v42  ;;  %v6367_v60 = vand.u32 4294901760, %v5702_v50 }
  0x70   : > { %4707 = vmatprep.subr.bf16.mxu0 %v5578_v44  ;;  %v916_v14 = vand.u32 4294901760, %v915_v5  ;;  %v5698_v48 = vpack.c.bf16 %v1982_v39, %v1979_v38  ;;  %v2000_v2 = vand.u32 4294901760, %v1969_v53 }
  0x71   : > { %v4718_v6 = vpack.c.bf16 %v888_v62, %v881_v58  ;;  %v5712_v54 = vpack.c.bf16 %v1988_v32, %v1985_v41  ;;  %v5718_v58 = vsub.f32 %v1966_v42, %v1991_v46  ;;  %v5723_v62 = vsub.f32 %v1967_v43, %v1994_v47  ;;  %v1974_v42 = vld [vmem:[%s6353_s2 + $0x60] sm:$0xff]  ;;  %v1975_v43 = vld [vmem:[%s6353_s2 + $0x68] sm:$0xff] }
  0x72   : > { %v4726_v20 = vpack.c.bf16 %v916_v14, %v909_v11  ;;  %v2090_v4 = vsub.f32 %v5702_v50, %v6367_v60  ;;  %v5743_v9 = vpack.c.bf16 %v2000_v2, %v1997_v1  ;;  %v1970_v11 = vld [vmem:[%s6353_s2 + $0x40] sm:$0xff] }
  0x73   : > { %4709 = vmatpush3.bf16.msra.mxu0 %v5578_v44  ;;  %v6364_v0 = vand.u32 4294901760, %v5718_v58 }
  0x74   : > { %4711 = vmatprep.subr.bf16.mxu0 %v5597_v37  ;;  %v2091_v15 = vand.u32 4294901760, %v2090_v4 }
  0x75   : > { %v2111_v8 = vsub.f32 %v5718_v58, %v6364_v0 }
  0x77   : > { %4713 = vmatpush3.bf16.msra.mxu0 %v5597_v37 }
  0x78   : > { %4715 = vmatprep.subr.bf16.mxu0 %v5603_v56 }
  0x7b   : > { %4717 = vmatpush3.bf16.msra.mxu0 %v5603_v56 }
  0x7c   : > { %4719 = vmatprep.subr.bf16.mxu0 %v4718_v6 }
  0x7e   : > { %3975 = vmatmul.mubr.f32.vlgmr.msra.gmra.mrb[0].mxu0 %v870_v10  ;;  %v5745_v10 = vsub.f32 %v1968_v52, %v1997_v1 }
  0x7f   : > { %4721 = vmatpush3.bf16.msra.mxu0 %v4718_v6  ;;  %3993 = vmatprep.mubr.f32.mxu0 %v5521_v18  ;;  %v6363_v6 = vand.u32 4294901760, %v5723_v62 }
  0x80   : > { %4723 = vmatprep.subr.bf16.mxu0 %v4722_v12 }
  0x83   : > { %4725 = vmatpush3.bf16.msra.mxu0 %v4722_v12  ;;  %v1971_v12 = vld [vmem:[%s6353_s2 + $0x48] sm:$0xff] }
  0x84   : > { %4727 = vmatprep.subr.bf16.mxu0 %v4726_v20 }
  0x87   : > { %4729 = vmatpush3.bf16.msra.mxu0 %v4726_v20  ;;  %v2118_v20 = vsub.f32 %v5723_v62, %v6363_v6 }
  0x88   : > { %4731 = vmatprep.subr.bf16.mxu0 %v4730_v23 }
  0x8b   : > { %4733 = vmatpush3.bf16.msra.mxu0 %v4730_v23  ;;  %v2112_v23 = vand.u32 4294901760, %v2111_v8 }
  0x8c   : > { %4735 = vmatprep.subr.bf16.mxu0 %v4734_v24 }
  0x8e   : > { %3994 = vmatmul.mubr.f32.vlgmr.msra.gmra.mrb[0].mxu0 %v5565_v36 }
  0x8f   : > { %4737 = vmatpush3.bf16.msra.mxu0 %v4734_v24  ;;  %4012 = vmatprep.mubr.f32.mxu0 %v5528_v19  ;;  %v4770_v19 = vpack.c.bf16 %v900_v55, %v893_v51  ;;  %v5704_v51 = vsub.f32 %v1964_v35, %v1985_v41  ;;  %v5714_v55 = vsub.f32 %v1965_v40, %v1988_v32  ;;  %v6362_v24 = vand.u32 4294901760, %v5745_v10 }
  0x90   : > { %4739 = vmatprep.subr.bf16.mxu0 %v4738_v25  ;;  %v2009_v35 = vand.u32 4294901760, %v1972_v21 }
  0x91   : > { %v6366_v61 = vand.u32 4294901760, %v5704_v51  ;;  %v6365_v63 = vand.u32 4294901760, %v5714_v55 }
  0x93   : > { %4741 = vmatpush3.bf16.msra.mxu0 %v4738_v25  ;;  %v2097_v5 = vsub.f32 %v5704_v51, %v6366_v61  ;;  %v2104_v7 = vsub.f32 %v5714_v55, %v6365_v63  ;;  %v5760_v25 = vsub.f32 %v1969_v53, %v2000_v2  ;;  %v2015_v2 = vand.u32 4294901760, %v1974_v42 }
  0x94   : > { %4743 = vmatprep.subr.bf16.mxu0 %v4742_v27 }
  0x95   : > { %v2098_v16 = vand.u32 4294901760, %v2097_v5  ;;  %v2105_v13 = vand.u32 4294901760, %v2104_v7  ;;  %v6361_v34 = vand.u32 4294901760, %v5760_v25  ;;  %v2018_v7 = vand.u32 4294901760, %v1975_v43 }
  0x97   : > { %4745 = vmatpush3.bf16.msra.mxu0 %v4742_v27  ;;  %v1973_v27 = vld [vmem:[%s6353_s2 + $0x58] sm:$0xff]  ;;  %v2132_v32 = vsub.f32 %v5760_v25, %v6361_v34 }
  0x98   : > { %4747 = vmatprep.subr.bf16.mxu0 %v4746_v17  ;;  %v2012_v41 = vand.u32 4294901760, %v1973_v27 }
  0x9a   : > { %v5797_v53 = vpack.c.bf16 %v2012_v41, %v2009_v35  ;;  %v5799_v1 = vsub.f32 %v1973_v27, %v2012_v41 }
  0x9b   : > { %4749 = vmatpush3.bf16.msra.mxu0 %v4746_v17 }
  0x9c   : > { %4751 = vmatprep.subr.bf16.mxu0 %v5555_v30 }
  0x9e   : > { %4013 = vmatmul.mubr.f32.vlgmr.msra.gmra.mrb[0].mxu0 %v5585_v49  ;;  %v5700_v49 = vsub.f32 %v1962_v33, %v1979_v38  ;;  %v2125_v33 = vsub.f32 %v5745_v10, %v6362_v24 }
  0x9f   : > { %4753 = vmatpush3.bf16.msra.mxu0 %v5555_v30  ;;  %4031 = vmatprep.mubr.f32.mxu0 %v858_v22  ;;  %v5668_v22 = vsel %vm190_vm0, %v1363_v31, 0  ;;  %v2003_v31 = vand.u32 4294901760, %v1970_v11 }
  0xa0   : > { %4755 = vmatprep.subr.bf16.mxu0 %v5578_v44  ;;  %v5696_v45 = vand.u32 4294901760, %v5668_v22  ;;  %v6368_v59 = vand.u32 4294901760, %v5700_v49 }
  0xa1   : > { %v5778_v40 = vsub.f32 %v1970_v11, %v2003_v31 }
  0xa2   : > { %v2083_v3 = vsub.f32 %v5700_v49, %v6368_v59  ;;  %v5808_v8 = vsub.f32 %v5668_v22, %v5696_v45  ;;  %v3438_v22 = vld [vmem:[%s6352_s1 + $0x80] sm:$0xff] }
  0xa3   : > { %4757 = vmatpush3.bf16.msra.mxu0 %v5578_v44  ;;  %v6360_v52 = vand.u32 4294901760, %v5778_v40 }
  0xa4   : > { %4759 = vmatprep.subr.bf16.mxu0 %v5597_v37  ;;  %v2084_v14 = vand.u32 4294901760, %v2083_v3  ;;  %v2133_v3 = vand.u32 4294901760, %v2132_v32 }
  0xa5   : > { %v2139_v11 = vsub.f32 %v5778_v40, %v6360_v52 }
  0xa6   : > { %v5765_v17 = vpack.c.bf16 %v2091_v15, %v2084_v14  ;;  %v5814_v14 = vsub.f32 %v1974_v42, %v2015_v2  ;;  %v3440_v42 = vld [vmem:[%s6352_s1 + $0x90] sm:$0xff] }
  0xa7   : > { %4761 = vmatpush3.bf16.msra.mxu0 %v5597_v37 }
  0xa8   : > { %4763 = vmatprep.subr.bf16.mxu0 %v5603_v56  ;;  %4927 = vmatprep.subr.bf16.mxu1 %v5765_v17 }
  0xa9   : > { %4929 = vmatpush3.bf16.msra.mxu1 %v5765_v17 }
  0xab   : > { %4765 = vmatpush3.bf16.msra.mxu0 %v5603_v56 }
  0xac   : > { %4767 = vmatprep.subr.bf16.mxu0 %v4766_v29 }
  0xae   : > { %4032 = vmatmul.mubr.f32.vlgmr.msra.gmra.mrb[0].mxu0 %v868_v57  ;;  %v5716_v57 = vpack.c.bf16 %v1994_v47, %v1991_v46  ;;  %v5793_v47 = vsub.f32 %v1972_v21, %v2009_v35  ;;  %v1364_v35 = vld [vmem:[%s5422_s6 + $0xa] sm:$0xff] }
  0xaf   : > { %4769 = vmatpush3.bf16.msra.mxu0 %v4766_v29  ;;  %4050 = vmatprep.mubr.f32.mxu0 %v5521_v18  ;;  %v2119_v29 = vand.u32 4294901760, %v2118_v20  ;;  %v2140_v20 = vand.u32 4294901760, %v2139_v11 }
  0xb0   : > { %4771 = vmatprep.subr.bf16.mxu0 %v4770_v19  ;;  %v6358_v5 = vand.u32 4294901760, %v5793_v47 }
  0xb1   : > { %v5774_v38 = vpack.c.bf16 %v2119_v29, %v2112_v23  ;;  %v6356_v23 = vand.u32 4294901760, %v5814_v14  ;;  %v5839_v29 = vsub.f32 %v1975_v43, %v2018_v7  ;;  %v3441_v43 = vld [vmem:[%s6352_s1 + $0x98] sm:$0xff] }
  0xb3   : > { %4773 = vmatpush3.bf16.msra.mxu0 %v4770_v19  ;;  %v2006_v19 = vand.u32 4294901760, %v1971_v12  ;;  %v6355_v41 = vand.u32 4294901760, %v5839_v29 }
  0xb4   : > { %4775 = vmatprep.subr.bf16.mxu0 %v4774_v28 }
  0xb5   : > { %v5776_v39 = vpack.c.bf16 %v2006_v19, %v2003_v31  ;;  %v5791_v46 = vsub.f32 %v1971_v12, %v2006_v19  ;;  %v6357_v12 = vand.u32 4294901760, %v5799_v1  ;;  %v1455_v31 = vand.u32 4294901760, %v5808_v8 }
  0xb6   : > { %v1381_v19 = vand.u32 4294901760, %v3438_v22 }
  0xb7   : > { %4777 = vmatpush3.bf16.msra.mxu0 %v4774_v28  ;;  %v5767_v28 = vpack.c.bf16 %v2105_v13, %v2098_v16  ;;  %v6359_v4 = vand.u32 4294901760, %v5791_v46  ;;  %v3439_v16 = vld [vmem:[%s6352_s1 + $0x88] sm:$0xff]  ;;  %v2160_v21 = vsub.f32 %v5799_v1, %v6357_v12  ;;  %v5836_v13 = vpack.c.bf16 %v2018_v7, %v2015_v2  ;;  %v3445_v12 = vld [vmem:[%s6352_s1 + $0xb8] sm:$0xff] }
  0xb8   : > { %4779 = vmatprep.subr.bf16.mxu0 %v4778_v26  ;;  %v2167_v2 = vsub.f32 %v5814_v14, %v6356_v23  ;;  %v2174_v7 = vsub.f32 %v5839_v29, %v6355_v41  ;;  %v1456_v11 = vsub.f32 %v5808_v8, %v1455_v31  ;;  %v3444_v23 = vld [vmem:[%s6352_s1 + $0xb0] sm:$0xff]  ;;  %v1402_v34 = vand.u32 4294901760, %v3445_v12 }
  0xb9   : > { %4931 = vmatprep.subr.bf16.mxu1 %v5767_v28  ;;  %v2161_v32 = vand.u32 4294901760, %v2160_v21  ;;  %v1390_v21 = vand.u32 4294901760, %v3441_v43 }
  0xba   : > { %4933 = vmatpush3.bf16.msra.mxu1 %v5767_v28  ;;  %v2175_v41 = vand.u32 4294901760, %v2174_v7  ;;  %v5943_v61 = vsub.f32 %v3445_v12, %v1402_v34 }
  0xbb   : > { %4781 = vmatpush3.bf16.msra.mxu0 %v4778_v26  ;;  %v2126_v26 = vand.u32 4294901760, %v2125_v33  ;;  %4935 = vmatprep.subr.bf16.mxu1 %v5774_v38  ;;  %v1384_v33 = vand.u32 4294901760, %v3439_v16 }
  0xbc   : > { %4783 = vmatprep.subr.bf16.mxu0 %v5555_v30 }
  0xbd   : > { %v5818_v15 = vpack.c.bf16 %v2133_v3, %v2126_v26  ;;  %v5859_v3 = vsub.f32 %v3438_v22, %v1381_v19  ;;  %v1387_v22 = vand.u32 4294901760, %v3440_v42 }
  0xbe   : > { %4051 = vmatmul.mubr.f32.vlgmr.msra.gmra.mrb[0].mxu0 %v5565_v36  ;;  %4937 = vmatpush3.bf16.msra.mxu1 %v5774_v38 }
  0xbf   : > { %4785 = vmatpush3.bf16.msra.mxu0 %v5555_v30  ;;  %4069 = vmatprep.mubr.f32.mxu0 %v5521_v18  ;;  %v2146_v18 = vsub.f32 %v5791_v46, %v6359_v4  ;;  %v2153_v30 = vsub.f32 %v5793_v47, %v6358_v5  ;;  %v1457_v5 = vand.u32 4294901760, %v1456_v11  ;;  %v5900_v7 = vpack.c.bf16 %v1390_v21, %v1387_v22 }
  0xc0   : > { %4787 = vmatprep.subr.bf16.mxu0 %v5578_v44  ;;  %4939 = vmatprep.subr.bf16.mxu1 %v5818_v15  ;;  %v1399_v11 = vand.u32 4294901760, %v3444_v23 }
  0xc1   : > { %v2147_v27 = vand.u32 4294901760, %v2146_v18  ;;  %v2154_v26 = vand.u32 4294901760, %v2153_v30  ;;  %v5868_v18 = vsub.f32 %v3439_v16, %v1384_v33  ;;  %v1378_v30 = vsel %vm190_vm0, %v1364_v35, 0 }
  0xc2   : > { %4941 = vmatpush3.bf16.msra.mxu1 %v5818_v15  ;;  %v2168_v35 = vand.u32 4294901760, %v2167_v2  ;;  %v5897_v2 = vsub.f32 %v3441_v43, %v1390_v21 }
  0xc3   : > { %4789 = vmatpush3.bf16.msra.mxu0 %v5578_v44  ;;  %v5854_v44 = vpack.c.bf16 %v2147_v27, %v2140_v20  ;;  %v5872_v20 = vpack.c.bf16 %v1384_v33, %v1381_v19  ;;  %v3443_v27 = vld [vmem:[%s6352_s1 + $0xa8] sm:$0xff]  ;;  %v5882_v16 = vpack.c.bf16 %v2161_v32, %v2154_v26  ;;  %v1476_v19 = vand.u32 4294901760, %v5859_v3 }
  0xc4   : > { %4791 = vmatprep.subr.bf16.mxu0 %v5597_v37  ;;  %v5885_v33 = vand.u32 4294901760, %v1378_v30  ;;  %v1483_v26 = vand.u32 4294901760, %v5868_v18  ;;  %v5895_v32 = vsub.f32 %v3440_v42, %v1387_v22  ;;  %v1396_v4 = vand.u32 4294901760, %v3443_v27 }
  0xc5   : > { %4943 = vmatprep.subr.bf16.mxu1 %v5854_v44  ;;  %v5904_v52 = vpack.c.bf16 %v2175_v41, %v2168_v35  ;;  %v1477_v43 = vsub.f32 %v5859_v3, %v1476_v19 }
  0xc6   : > { %4945 = vmatpush3.bf16.msra.mxu1 %v5854_v44  ;;  %v5908_v42 = vsub.f32 %v1378_v30, %v5885_v33  ;;  %v1484_v22 = vsub.f32 %v5868_v18, %v1483_v26  ;;  %v6373_v41 = vand.u32 4294901760, %v5895_v32  ;;  %v5924_v35 = vsub.f32 %v3443_v27, %v1396_v4 }
  0xc7   : > { %4793 = vmatpush3.bf16.msra.mxu0 %v5597_v37  ;;  %v3442_v37 = vld [vmem:[%s6352_s1 + $0xa0] sm:$0xff]  ;;  %4947 = vmatprep.subr.bf16.mxu1 %v5882_v16  ;;  %v1478_v6 = vand.u32 4294901760, %v1477_v43 }
  0xc8   : > { %4795 = vmatprep.subr.bf16.mxu0 %v5603_v56  ;;  %v6369_v24 = vand.u32 4294901760, %v5908_v42  ;;  %v1485_v0 = vand.u32 4294901760, %v1484_v22  ;;  %v1491_v63 = vsub.f32 %v5895_v32, %v6373_v41  ;;  %v6371_v27 = vand.u32 4294901760, %v5924_v35 }
  0xca   : > { %4949 = vmatpush3.bf16.msra.mxu1 %v5882_v16  ;;  %v1466_v43 = vsub.f32 %v5908_v42, %v6369_v24  ;;  %v4814_v22 = vpack.c.bf16 %v1485_v0, %v1478_v6  ;;  %v1492_v60 = vand.u32 4294901760, %v1491_v63 }
  0xcb   : > { %4797 = vmatpush3.bf16.msra.mxu0 %v5603_v56  ;;  %v1393_v56 = vand.u32 4294901760, %v3442_v37  ;;  %4951 = vmatprep.subr.bf16.mxu1 %v5904_v52 }
  0xcc   : > { %4799 = vmatprep.subr.bf16.mxu0 %v5872_v20  ;;  %v1467_v24 = vand.u32 4294901760, %v1466_v43 }
  0xcd   : > { %v5920_v21 = vpack.c.bf16 %v1396_v4, %v1393_v56  ;;  %v5922_v30 = vsub.f32 %v3442_v37, %v1393_v56  ;;  %v5941_v56 = vsub.f32 %v3444_v23, %v1399_v11 }
  0xce   : > { %4070 = vmatmul.mubr.f32.vlgmr.msra.gmra.mrb[0].mxu0 %v5565_v36  ;;  %v6370_v36 = vand.u32 4294901760, %v5897_v2  ;;  %4953 = vmatpush3.bf16.msra.mxu1 %v5904_v52 }
  0xcf   : > { %4801 = vmatpush3.bf16.msra.mxu0 %v5872_v20  ;;  %4088 = vmatprep.mubr.f32.mxu0 %v1457_v5  ;;  %v5928_v5 = vpack.c.bf16 %v1402_v34, %v1399_v11  ;;  %v6372_v37 = vand.u32 4294901760, %v5922_v30  ;;  %v1512_v34 = vsub.f32 %v5924_v35, %v6371_v27  ;;  %v1518_v12 = vand.u32 4294901760, %v5941_v56 }
  0xd0   : > { %4803 = vmatprep.subr.bf16.mxu0 %v5900_v7  ;;  %v1498_v4 = vsub.f32 %v5897_v2, %v6370_v36  ;;  %v1525_v11 = vand.u32 4294901760, %v5943_v61 }
  0xd1   : > { %v1505_v23 = vsub.f32 %v5922_v30, %v6372_v37  ;;  %v1513_v6 = vand.u32 4294901760, %v1512_v34 }
  0xd2   : > { %v1499_v59 = vand.u32 4294901760, %v1498_v4  ;;  %v1519_v4 = vsub.f32 %v5941_v56, %v1518_v12  ;;  %v1526_v36 = vsub.f32 %v5943_v61, %v1525_v11 }
  0xd3   : > { %4805 = vmatpush3.bf16.msra.mxu0 %v5900_v7  ;;  %v1506_v63 = vand.u32 4294901760, %v1505_v23 }
  0xd4   : > { %4807 = vmatprep.subr.bf16.mxu0 %v5920_v21  ;;  %v4818_v0 = vpack.c.bf16 %v1499_v59, %v1492_v60  ;;  %v1520_v37 = vand.u32 4294901760, %v1519_v4  ;;  %v1527_v41 = vand.u32 4294901760, %v1526_v36  ;;  %v4830_v59 = vpack.c.bf16 %v5868_v18, %v5859_v3 }
  0xd5   : > { %v4822_v27 = vpack.c.bf16 %v1513_v6, %v1506_v63  ;;  %v4834_v60 = vpack.c.bf16 %v5897_v2, %v5895_v32  ;;  %v6377_v3 = vand.u32 4294901760, %v5922_v30  ;;  %v6378_v18 = vand.u32 4294901760, %v5924_v35 }
  0xd6   : > { %v4826_v43 = vpack.c.bf16 %v1527_v41, %v1520_v37  ;;  %v4842_v41 = vpack.c.bf16 %v5943_v61, %v5941_v56  ;;  %v4862_v61 = vpack.c.bf16 %v1483_v26, %v1476_v19  ;;  %v6376_v37 = vand.u32 4294901760, %v5908_v42 }
  0xd7   : > { %4809 = vmatpush3.bf16.msra.mxu0 %v5920_v21  ;;  %v4870_v19 = vpack.c.bf16 %v6378_v18, %v6377_v3  ;;  %v4874_v26 = vpack.c.bf16 %v1525_v11, %v1518_v12  ;;  %v6073_v4 = vpack.c.bf16 %v5714_v55, %v5704_v51  ;;  %v6101_v3 = vpack.c.bf16 %v5799_v1, %v5793_v47 }
  0xd8   : > { %4811 = vmatprep.subr.bf16.mxu0 %v5928_v5  ;;  %v6107_v18 = vpack.c.bf16 %v5839_v29, %v5814_v14 }
  0xdb   : > { %4813 = vmatpush3.bf16.msra.mxu0 %v5928_v5 }
  0xdc   : > { %4815 = vmatprep.subr.bf16.mxu0 %v4814_v22 }
  0xde   : > { %4089 = vmatmul.mubr.f32.vlgmr.msra.gmra.mrb[0].mxu0 %v1467_v24  ;;  %v4838_v24 = vpack.c.bf16 %v5924_v35, %v5922_v30 }
  0xdf   : > { %4817 = vmatpush3.bf16.msra.mxu0 %v4814_v22  ;;  %4107 = vmatprep.mubr.f32.mxu0 %v5696_v45  ;;  %v6048_v22 = vpack.c.bf16 %v5702_v50, %v5700_v49 }
  0xe0   : > { %4819 = vmatprep.subr.bf16.mxu0 %v4818_v0 }
  0xe3   : > { %4821 = vmatpush3.bf16.msra.mxu0 %v4818_v0 }
  0xe4   : > { %4823 = vmatprep.subr.bf16.mxu0 %v4822_v27 }
  0xe7   : > { %4825 = vmatpush3.bf16.msra.mxu0 %v4822_v27 }
  0xe8   : > { %4827 = vmatprep.subr.bf16.mxu0 %v4826_v43 }
  0xeb   : > { %4829 = vmatpush3.bf16.msra.mxu0 %v4826_v43 }
  0xec   : > { %4831 = vmatprep.subr.bf16.mxu0 %v4830_v59 }
  0xee   : > { %4108 = vmatmul.mubr.f32.vlgmr.msra.gmra.mrb[0].mxu0 %v5885_v33 }
  0xef   : > { %4833 = vmatpush3.bf16.msra.mxu0 %v4830_v59  ;;  %4126 = vmatprep.mubr.f32.mxu0 %v5808_v8  ;;  %v6374_v8 = vand.u32 4294901760, %v5895_v32 }
  0xf0   : > { %4835 = vmatprep.subr.bf16.mxu0 %v4834_v60 }
  0xf3   : > { %4837 = vmatpush3.bf16.msra.mxu0 %v4834_v60 }
  0xf4   : > { %4839 = vmatprep.subr.bf16.mxu0 %v4838_v24 }
  0xf7   : > { %4841 = vmatpush3.bf16.msra.mxu0 %v4838_v24  ;;  %v6083_v24 = vpack.c.bf16 %v5723_v62, %v5718_v58 }
  0xf8   : > { %4843 = vmatprep.subr.bf16.mxu0 %v4842_v41 }
  0xfb   : > { %4845 = vmatpush3.bf16.msra.mxu0 %v4842_v41 }
  0xfc   : > { %4847 = vmatprep.subr.bf16.mxu0 %v5872_v20 }
  0xfe   : > { %4127 = vmatmul.mubr.f32.vlgmr.msra.gmra.mrb[0].mxu0 %v5908_v42 }
  0xff   : > { %4849 = vmatpush3.bf16.msra.mxu0 %v5872_v20  ;;  %4145 = vmatprep.mubr.f32.mxu0 %v1455_v31  ;;  %v6375_v31 = vand.u32 4294901760, %v5897_v2 }
 0x100   : > { %4851 = vmatprep.subr.bf16.mxu0 %v5900_v7 }
 0x101   : > { %v4866_v36 = vpack.c.bf16 %v6375_v31, %v6374_v8 }
 0x103   : > { %4853 = vmatpush3.bf16.msra.mxu0 %v5900_v7 }
 0x104   : > { %4855 = vmatprep.subr.bf16.mxu0 %v5920_v21 }
 0x107   : > { %4857 = vmatpush3.bf16.msra.mxu0 %v5920_v21 }
 0x108   : > { %4859 = vmatprep.subr.bf16.mxu0 %v5928_v5 }
 0x10b   : > { %4861 = vmatpush3.bf16.msra.mxu0 %v5928_v5 }
 0x10c   : > { %4863 = vmatprep.subr.bf16.mxu0 %v4862_v61 }
 0x10e   : > { %4146 = vmatmul.mubr.f32.vlgmr.msra.gmra.mrb[0].mxu0 %v6376_v37  ;;  %v6095_v37 = vpack.c.bf16 %v5791_v46, %v5778_v40 }
 0x10f   : > { %4865 = vmatpush3.bf16.msra.mxu0 %v4862_v61  ;;  %4164 = vmatprep.mubr.f32.mxu0 %v5696_v45 }
 0x110   : > { %4867 = vmatprep.subr.bf16.mxu0 %v4866_v36 }
 0x113   : > { %4869 = vmatpush3.bf16.msra.mxu0 %v4866_v36  ;;  %v6089_v36 = vpack.c.bf16 %v5760_v25, %v5745_v10 }
 0x114   : > { %4871 = vmatprep.subr.bf16.mxu0 %v4870_v19 }
 0x117   : > { %4873 = vmatpush3.bf16.msra.mxu0 %v4870_v19  ;;  %v6379_v19 = vand.u32 4294901760, %v5700_v49  ;;  %v6383_v49 = vand.u32 4294901760, %v5718_v58  ;;  %v6387_v58 = vand.u32 4294901760, %v5778_v40  ;;  %v6391_v40 = vand.u32 4294901760, %v5814_v14 }
 0x118   : > { %4875 = vmatprep.subr.bf16.mxu0 %v4874_v26 }
 0x11b   : > { %4877 = vmatpush3.bf16.msra.mxu0 %v4874_v26  ;;  %v6380_v26 = vand.u32 4294901760, %v5702_v50  ;;  %v6384_v50 = vand.u32 4294901760, %v5723_v62  ;;  %v6388_v62 = vand.u32 4294901760, %v5791_v46  ;;  %v6392_v46 = vand.u32 4294901760, %v5839_v29 }
 0x11c   : > { %4879 = vmatprep.subr.bf16.mxu0 %v5872_v20 }
 0x11e   : > { %4165 = vmatmul.mubr.f32.vlgmr.msra.gmra.mrb[0].mxu0 %v5885_v33 }
 0x11f   : > { %4881 = vmatpush3.bf16.msra.mxu0 %v5872_v20  ;;  %4183 = vmatprep.mubr.f32.mxu0 %v5696_v45  ;;  %v1976_v45 = vld [vmem:[%s6353_s2 + $0x70] sm:$0xff]  ;;  %v1977_v20 = vld [vmem:[%s6353_s2 + $0x78] sm:$0xff] }
 0x120   : > { %4883 = vmatprep.subr.bf16.mxu0 %v5900_v7  ;;  %v2024_v32 = vand.u32 4294901760, %v1977_v20 }
 0x123   : > { %4885 = vmatpush3.bf16.msra.mxu0 %v5900_v7  ;;  %v6032_v7 = vsub.f32 %v1977_v20, %v2024_v32  ;;  %v6381_v20 = vand.u32 4294901760, %v5704_v51  ;;  %v6385_v51 = vand.u32 4294901760, %v5745_v10  ;;  %v6389_v10 = vand.u32 4294901760, %v5793_v47 }
 0x124   : > { %4887 = vmatprep.subr.bf16.mxu0 %v5920_v21 }
 0x127   : > { %4889 = vmatpush3.bf16.msra.mxu0 %v5920_v21  ;;  %v2187_v21 = vand.u32 4294901760, %v6032_v7 }
 0x128   : > { %4891 = vmatprep.subr.bf16.mxu0 %v5928_v5 }
 0x129   : > { %v2188_v35 = vsub.f32 %v6032_v7, %v2187_v21 }
 0x12b   : > { %4893 = vmatpush3.bf16.msra.mxu0 %v5928_v5  ;;  %v2189_v27 = vand.u32 4294901760, %v2188_v35 }
 0x12c   : > { %4895 = vmatprep.subr.bf16.mxu0 %v5698_v48 }
 0x12e   : > { %4184 = vmatmul.mubr.f32.vlgmr.msra.gmra.mrb[0].mxu0 %v5885_v33  ;;  %v2021_v33 = vand.u32 4294901760, %v1976_v45 }
 0x12f   : > { %4897 = vmatpush3.bf16.msra.mxu0 %v5698_v48 }
 0x130   : > { %4899 = vmatprep.subr.bf16.mxu0 %v5712_v54  ;;  %v6030_v2 = vsub.f32 %v1976_v45, %v2021_v33  ;;  %v6051_v23 = vpack.c.bf16 %v2024_v32, %v2021_v33  ;;  %v6133_v45 = vpack.c.bf16 %v6380_v26, %v6379_v19  ;;  %v6382_v33 = vand.u32 4294901760, %v5714_v55 }
 0x131   : > { %v6386_v55 = vand.u32 4294901760, %v5760_v25  ;;  %v6390_v25 = vand.u32 4294901760, %v5799_v1 }
 0x132   : > { %v2180_v42 = vand.u32 4294901760, %v6030_v2  ;;  %v6057_v34 = vpack.c.bf16 %v6032_v7, %v6030_v2  ;;  %v6141_v32 = vpack.c.bf16 %v6382_v33, %v6381_v20 }
 0x133   : > { %4901 = vmatpush3.bf16.msra.mxu0 %v5712_v54  ;;  %v6158_v35 = vpack.c.bf16 %v6386_v55, %v6385_v51 }
 0x134   : > { %4903 = vmatprep.subr.bf16.mxu0 %v5716_v57  ;;  %v2181_v30 = vsub.f32 %v6030_v2, %v2180_v42  ;;  %v6190_v47 = vpack.c.bf16 %v2187_v21, %v2180_v42 }
 0x136   : > { %v2182_v5 = vand.u32 4294901760, %v2181_v30  ;;  %v6150_v30 = vpack.c.bf16 %v6384_v50, %v6383_v49 }
 0x137   : > { %4905 = vmatpush3.bf16.msra.mxu0 %v5716_v57 }
 0x138   : > { %4907 = vmatprep.subr.bf16.mxu0 %v5743_v9  ;;  %v6042_v56 = vpack.c.bf16 %v2189_v27, %v2182_v5  ;;  %v6166_v5 = vpack.c.bf16 %v6388_v62, %v6387_v58  ;;  %v6174_v27 = vpack.c.bf16 %v6390_v25, %v6389_v10 }
 0x13a   : > { %4955 = vmatprep.subr.bf16.mxu1 %v6042_v56 }
 0x13b   : > { %4909 = vmatpush3.bf16.msra.mxu0 %v5743_v9  ;;  %4957 = vmatpush3.bf16.msra.mxu1 %v6042_v56 }
 0x13c   : > { %4911 = vmatprep.subr.bf16.mxu0 %v5776_v39  ;;  %4959 = vmatprep.subr.bf16.mxu1 %v6048_v22 }
 0x13f   : > { %4913 = vmatpush3.bf16.msra.mxu0 %v5776_v39 }
 0x140   : > { %4915 = vmatprep.subr.bf16.mxu0 %v5797_v53 }
 0x143   : > { %4917 = vmatpush3.bf16.msra.mxu0 %v5797_v53 }
 0x144   : > { %4919 = vmatprep.subr.bf16.mxu0 %v5836_v13 }
 0x147   : > { %4921 = vmatpush3.bf16.msra.mxu0 %v5836_v13 }
 0x148   : > { %4923 = vmatprep.subr.bf16.mxu0 %v6051_v23 }
 0x14b   : > { %4925 = vmatpush3.bf16.msra.mxu0 %v6051_v23 }
 0x201   : > { %v6059_v12 = vpop.f32.mrb[0].mxu0 }
 0x202   : > { %v6062_v11 = vand.u32 4294901760, %v6059_v12  ;;  %v6064_v0 = vpop.f32.mrb[1].mxu0  ;;  %v2663_v21 = vmul.f32 %v6059_v12, %v6059_v12 }
 0x203   : > { %v6067_v63 = vand.u32 4294901760, %v6064_v0  ;;  %v2662_v1 = vmul.f32 %v6064_v0, %v6064_v0 }
 0x204   : > { %v2070_v6 = vsub.f32 %v6059_v12, %v6062_v11 }
 0x205   : > { %v2060_v43 = vsub.f32 %v6064_v0, %v6067_v63  ;;  %4253 = vmatprep.mubr.f32.mxu1 %v6067_v63  ;;  %v6208_v14 = vand.u32 4294901760, %v2662_v1  ;;  %v6235_v0 = vand.u32 4294901760, %v2663_v21 }
 0x206   : > { %v2071_v59 = vand.u32 4294901760, %v2070_v6  ;;  %4254 = vmatmul.mubr.f32.vlgmr.msra.gmra.mrb[0].mxu1 %v6062_v11 }
 0x207   : > { %4961 = vmatpush3.bf16.msra.mxu1 %v6048_v22  ;;  %4288 = vmatprep.mubr.f32.mxu1 %v2060_v43  ;;  %v2061_v60 = vand.u32 4294901760, %v2060_v43  ;;  %v6213_v29 = vsub.f32 %v2662_v1, %v6208_v14 }
 0x208   : > { %4963 = vmatprep.subr.bf16.mxu1 %v6073_v4  ;;  %v2072_v41 = vsub.f32 %v2070_v6, %v2071_v59 }
 0x209   : > { %v2062_v61 = vsub.f32 %v2060_v43, %v2061_v60  ;;  %v2747_v2 = vand.u32 4294901760, %v6213_v29 }
 0x20a   : > { %v2073_v31 = vand.u32 4294901760, %v2072_v41 }
 0x20b   : > { %4965 = vmatpush3.bf16.msra.mxu1 %v6073_v4  ;;  %v2063_v8 = vand.u32 4294901760, %v2062_v61  ;;  %v2748_v7 = vsub.f32 %v6213_v29, %v2747_v2 }
 0x20c   : > { %4967 = vmatprep.subr.bf16.mxu1 %v6083_v24 }
 0x20d   : > { %4218 = vmatprep.mubr.f32.mxu0 %v2063_v8  ;;  %v2749_v42 = vand.u32 4294901760, %v2748_v7 }
 0x20e   : > { %4219 = vmatmul.mubr.f32.vlgmr.msra.gmra.mrb[2].mxu0 %v2073_v31 }
 0x20f   : > { %4969 = vmatpush3.bf16.msra.mxu1 %v6083_v24 }
 0x210   : > { %4971 = vmatprep.subr.bf16.mxu1 %v6089_v36 }
 0x213   : > { %4973 = vmatpush3.bf16.msra.mxu1 %v6089_v36 }
 0x214   : > { %4975 = vmatprep.subr.bf16.mxu1 %v6095_v37 }
 0x217   : > { %4977 = vmatpush3.bf16.msra.mxu1 %v6095_v37 }
 0x218   : > { %4979 = vmatprep.subr.bf16.mxu1 %v6101_v3 }
 0x21b   : > { %4981 = vmatpush3.bf16.msra.mxu1 %v6101_v3 }
 0x21c   : > { %4983 = vmatprep.subr.bf16.mxu1 %v6107_v18 }
 0x21f   : > { %4985 = vmatpush3.bf16.msra.mxu1 %v6107_v18 }
 0x220   : > { %4987 = vmatprep.subr.bf16.mxu1 %v6057_v34 }
 0x223   : > { %4989 = vmatpush3.bf16.msra.mxu1 %v6057_v34 }
 0x224   : > { %4991 = vmatprep.subr.bf16.mxu1 %v5698_v48 }
 0x226   : > { %4289 = vmatmul.mubr.f32.vlgmr.msra.gmra.mrb[0].mxu1 %v2070_v6  ;;  %v6182_v6 = vpack.c.bf16 %v6392_v46, %v6391_v40 }
 0x227   : > { %4993 = vmatpush3.bf16.msra.mxu1 %v5698_v48  ;;  %4323 = vmatprep.mubr.f32.mxu1 %v2061_v60 }
 0x228   : > { %4995 = vmatprep.subr.bf16.mxu1 %v5712_v54 }
 0x22b   : > { %4997 = vmatpush3.bf16.msra.mxu1 %v5712_v54 }
 0x22c   : > { %4999 = vmatprep.subr.bf16.mxu1 %v5716_v57 }
 0x22f   : > { %5001 = vmatpush3.bf16.msra.mxu1 %v5716_v57 }
 0x230   : > { %5003 = vmatprep.subr.bf16.mxu1 %v5743_v9 }
 0x233   : > { %5005 = vmatpush3.bf16.msra.mxu1 %v5743_v9 }
 0x234   : > { %5007 = vmatprep.subr.bf16.mxu1 %v5776_v39 }
 0x237   : > { %5009 = vmatpush3.bf16.msra.mxu1 %v5776_v39 }
 0x238   : > { %5011 = vmatprep.subr.bf16.mxu1 %v5797_v53 }
 0x23b   : > { %5013 = vmatpush3.bf16.msra.mxu1 %v5797_v53 }
 0x23c   : > { %5015 = vmatprep.subr.bf16.mxu1 %v5836_v13 }
 0x23f   : > { %5017 = vmatpush3.bf16.msra.mxu1 %v5836_v13 }
 0x240   : > { %5019 = vmatprep.subr.bf16.mxu1 %v6051_v23 }
 0x243   : > { %5021 = vmatpush3.bf16.msra.mxu1 %v6051_v23 }
 0x244   : > { %5023 = vmatprep.subr.bf16.mxu1 %v6133_v45 }
 0x246   : > { %4324 = vmatmul.mubr.f32.vlgmr.msra.gmra.mrb[0].mxu1 %v2071_v59 }
 0x247   : > { %5025 = vmatpush3.bf16.msra.mxu1 %v6133_v45  ;;  %4358 = vmatprep.mubr.f32.mxu1 %v6067_v63 }
 0x248   : > { %5027 = vmatprep.subr.bf16.mxu1 %v6141_v32 }
 0x24b   : > { %5029 = vmatpush3.bf16.msra.mxu1 %v6141_v32 }
 0x24c   : > { %5031 = vmatprep.subr.bf16.mxu1 %v6150_v30 }
 0x24f   : > { %5033 = vmatpush3.bf16.msra.mxu1 %v6150_v30 }
 0x250   : > { %5035 = vmatprep.subr.bf16.mxu1 %v6158_v35 }
 0x253   : > { %5037 = vmatpush3.bf16.msra.mxu1 %v6158_v35 }
 0x254   : > { %5039 = vmatprep.subr.bf16.mxu1 %v6166_v5 }
 0x257   : > { %5041 = vmatpush3.bf16.msra.mxu1 %v6166_v5 }
 0x258   : > { %5043 = vmatprep.subr.bf16.mxu1 %v6174_v27 }
 0x25b   : > { %5045 = vmatpush3.bf16.msra.mxu1 %v6174_v27 }
 0x25c   : > { %5047 = vmatprep.subr.bf16.mxu1 %v6182_v6 }
 0x25f   : > { %5049 = vmatpush3.bf16.msra.mxu1 %v6182_v6 }
 0x260   : > { %5051 = vmatprep.subr.bf16.mxu1 %v6190_v47 }
 0x263   : > { %5053 = vmatpush3.bf16.msra.mxu1 %v6190_v47 }
 0x264   : > { %5055 = vmatprep.subr.bf16.mxu1 %v5698_v48 }
 0x266   : > { %4359 = vmatmul.mubr.f32.vlgmr.msra.gmra.mrb[0].mxu1 %v6062_v11 }
 0x267   : > { %5057 = vmatpush3.bf16.msra.mxu1 %v5698_v48  ;;  %4393 = vmatprep.mubr.f32.mxu1 %v6067_v63 }
 0x268   : > { %5059 = vmatprep.subr.bf16.mxu1 %v5712_v54 }
 0x26b   : > { %5061 = vmatpush3.bf16.msra.mxu1 %v5712_v54 }
 0x26c   : > { %5063 = vmatprep.subr.bf16.mxu1 %v5716_v57 }
 0x26f   : > { %5065 = vmatpush3.bf16.msra.mxu1 %v5716_v57 }
 0x270   : > { %5067 = vmatprep.subr.bf16.mxu1 %v5743_v9 }
 0x273   : > { %5069 = vmatpush3.bf16.msra.mxu1 %v5743_v9 }
 0x274   : > { %5071 = vmatprep.subr.bf16.mxu1 %v5776_v39 }
 0x277   : > { %5073 = vmatpush3.bf16.msra.mxu1 %v5776_v39 }
 0x278   : > { %5075 = vmatprep.subr.bf16.mxu1 %v5797_v53 }
 0x27b   : > { %5077 = vmatpush3.bf16.msra.mxu1 %v5797_v53 }
 0x27c   : > { %5079 = vmatprep.subr.bf16.mxu1 %v5836_v13 }
 0x27f   : > { %5081 = vmatpush3.bf16.msra.mxu1 %v5836_v13 }
 0x280   : > { %5083 = vmatprep.subr.bf16.mxu1 %v6051_v23 }
 0x283   : > { %5085 = vmatpush3.bf16.msra.mxu1 %v6051_v23 }
 0x284   : > { %5087 = vmatprep.subr.bf16.mxu1 %v5698_v48 }
 0x286   : > { %4394 = vmatmul.mubr.f32.vlgmr.msra.gmra.mrb[0].mxu1 %v6062_v11  ;;  %v6240_v11 = vsub.f32 %v2663_v21, %v6235_v0 }
 0x287   : > { %5089 = vmatpush3.bf16.msra.mxu1 %v5698_v48  ;;  %4428 = vmatprep.mubr.f32.mxu1 %v2749_v42 }
 0x288   : > { %5091 = vmatprep.subr.bf16.mxu1 %v5712_v54  ;;  %v2757_v12 = vand.u32 4294901760, %v6240_v11 }
 0x28a   : > { %v2758_v63 = vsub.f32 %v6240_v11, %v2757_v12 }
 0x28b   : > { %5093 = vmatpush3.bf16.msra.mxu1 %v5712_v54 }
 0x28c   : > { %5095 = vmatprep.subr.bf16.mxu1 %v5716_v57  ;;  %v2759_v43 = vand.u32 4294901760, %v2758_v63 }
 0x28f   : > { %5097 = vmatpush3.bf16.msra.mxu1 %v5716_v57 }
 0x290   : > { %5099 = vmatprep.subr.bf16.mxu1 %v5743_v9 }
 0x293   : > { %5101 = vmatpush3.bf16.msra.mxu1 %v5743_v9 }
 0x294   : > { %5103 = vmatprep.subr.bf16.mxu1 %v5776_v39 }
 0x297   : > { %5105 = vmatpush3.bf16.msra.mxu1 %v5776_v39 }
 0x298   : > { %5107 = vmatprep.subr.bf16.mxu1 %v5797_v53 }
 0x29b   : > { %5109 = vmatpush3.bf16.msra.mxu1 %v5797_v53 }
 0x29c   : > { %5111 = vmatprep.subr.bf16.mxu1 %v5836_v13 }
 0x29f   : > { %5113 = vmatpush3.bf16.msra.mxu1 %v5836_v13 }
 0x2a0   : > { %5115 = vmatprep.subr.bf16.mxu1 %v6051_v23 }
 0x2a3   : > { %5117 = vmatpush3.bf16.msra.mxu1 %v6051_v23 }
 0x2a4   : > { %5119 = vmatprep.subr.bf16.mxu1 %v5765_v17 }
 0x2a6   : > { %4429 = vmatmul.mubr.f32.vlgmr.msra.gmra.mrb[2].mxu1 %v2759_v43 }
 0x2a7   : > { %5121 = vmatpush3.bf16.msra.mxu1 %v5765_v17  ;;  %4463 = vmatprep.mubr.f32.mxu1 %v6208_v14 }
 0x2a8   : > { %5123 = vmatprep.subr.bf16.mxu1 %v5767_v28 }
 0x2ab   : > { %5125 = vmatpush3.bf16.msra.mxu1 %v5767_v28 }
 0x2ac   : > { %5127 = vmatprep.subr.bf16.mxu1 %v5774_v38 }
 0x2af   : > { %5129 = vmatpush3.bf16.msra.mxu1 %v5774_v38 }
 0x2b0   : > { %5131 = vmatprep.subr.bf16.mxu1 %v5818_v15 }
 0x2b3   : > { %5133 = vmatpush3.bf16.msra.mxu1 %v5818_v15 }
 0x2b4   : > { %5135 = vmatprep.subr.bf16.mxu1 %v5854_v44 }
 0x2b7   : > { %5137 = vmatpush3.bf16.msra.mxu1 %v5854_v44 }
 0x2b8   : > { %5139 = vmatprep.subr.bf16.mxu1 %v5882_v16 }
 0x2bb   : > { %5141 = vmatpush3.bf16.msra.mxu1 %v5882_v16 }
 0x2bc   : > { %5143 = vmatprep.subr.bf16.mxu1 %v5904_v52 }
 0x2bf   : > { %5145 = vmatpush3.bf16.msra.mxu1 %v5904_v52 }
 0x2c0   : > { %5147 = vmatprep.subr.bf16.mxu1 %v6042_v56 }
 0x2c3   : > { %5149 = vmatpush3.bf16.msra.mxu1 %v6042_v56 }
 0x2c4   : > { %5151 = vmatprep.subr.bf16.mxu1 %v6048_v22 }
 0x2c6   : > { %4464 = vmatmul.mubr.f32.vlgmr.msra.gmra.mrb[2].mxu1 %v6235_v0 }
 0x2c7   : > { %5153 = vmatpush3.bf16.msra.mxu1 %v6048_v22  ;;  %4498 = vmatprep.mubr.f32.mxu1 %v6213_v29 }
 0x2c8   : > { %5155 = vmatprep.subr.bf16.mxu1 %v6073_v4 }
 0x2cb   : > { %5157 = vmatpush3.bf16.msra.mxu1 %v6073_v4 }
 0x2cc   : > { %5159 = vmatprep.subr.bf16.mxu1 %v6083_v24 }
 0x2cf   : > { %5161 = vmatpush3.bf16.msra.mxu1 %v6083_v24 }
 0x2d0   : > { %5163 = vmatprep.subr.bf16.mxu1 %v6089_v36 }
 0x2d3   : > { %5165 = vmatpush3.bf16.msra.mxu1 %v6089_v36 }
 0x2d4   : > { %5167 = vmatprep.subr.bf16.mxu1 %v6095_v37 }
 0x2d7   : > { %5169 = vmatpush3.bf16.msra.mxu1 %v6095_v37 }
 0x2d8   : > { %5171 = vmatprep.subr.bf16.mxu1 %v6101_v3 }
 0x2db   : > { %5173 = vmatpush3.bf16.msra.mxu1 %v6101_v3 }
 0x2dc   : > { %5175 = vmatprep.subr.bf16.mxu1 %v6107_v18 }
 0x2df   : > { %5177 = vmatpush3.bf16.msra.mxu1 %v6107_v18 }
 0x2e0   : > { %5179 = vmatprep.subr.bf16.mxu1 %v6057_v34 }
 0x2e1   : > { %v4220_v17 = vpop.f32.mrb[2].mxu0 }
 0x2e2   : > { %v2065_v28 = vpop.f32.mrb[3].mxu0 }
 0x2e3   : > { %5181 = vmatpush3.bf16.msra.mxu1 %v6057_v34 }
 0x2e4   : > { %5183 = vmatprep.subr.bf16.mxu1 %v5698_v48 }
 0x2e6   : > { %4499 = vmatmul.mubr.f32.vlgmr.msra.gmra.mrb[2].mxu1 %v6240_v11 }
 0x2e7   : > { %5185 = vmatpush3.bf16.msra.mxu1 %v5698_v48  ;;  %4533 = vmatprep.mubr.f32.mxu1 %v2747_v2 }
 0x2e8   : > { %5187 = vmatprep.subr.bf16.mxu1 %v5712_v54 }
 0x2eb   : > { %5189 = vmatpush3.bf16.msra.mxu1 %v5712_v54 }
 0x2ec   : > { %5191 = vmatprep.subr.bf16.mxu1 %v5716_v57 }
 0x2ef   : > { %5193 = vmatpush3.bf16.msra.mxu1 %v5716_v57 }
 0x2f0   : > { %5195 = vmatprep.subr.bf16.mxu1 %v5743_v9 }
 0x2f3   : > { %5197 = vmatpush3.bf16.msra.mxu1 %v5743_v9 }
 0x2f4   : > { %5199 = vmatprep.subr.bf16.mxu1 %v5776_v39 }
 0x2f7   : > { %5201 = vmatpush3.bf16.msra.mxu1 %v5776_v39 }
 0x2f8   : > { %5203 = vmatprep.subr.bf16.mxu1 %v5797_v53 }
 0x2fb   : > { %5205 = vmatpush3.bf16.msra.mxu1 %v5797_v53 }
 0x2fc   : > { %5207 = vmatprep.subr.bf16.mxu1 %v5836_v13 }
 0x2ff   : > { %5209 = vmatpush3.bf16.msra.mxu1 %v5836_v13 }
 0x300   : > { %5211 = vmatprep.subr.bf16.mxu1 %v6051_v23 }
 0x303   : > { %5213 = vmatpush3.bf16.msra.mxu1 %v6051_v23 }
 0x304   : > { %5215 = vmatprep.subr.bf16.mxu1 %v6133_v45 }
 0x306   : > { %4534 = vmatmul.mubr.f32.vlgmr.msra.gmra.mrb[2].mxu1 %v2757_v12 }
 0x307   : > { %5217 = vmatpush3.bf16.msra.mxu1 %v6133_v45  ;;  %4568 = vmatprep.mubr.f32.mxu1 %v6208_v14 }
 0x308   : > { %5219 = vmatprep.subr.bf16.mxu1 %v6141_v32 }
 0x30b   : > { %5221 = vmatpush3.bf16.msra.mxu1 %v6141_v32 }
 0x30c   : > { %5223 = vmatprep.subr.bf16.mxu1 %v6150_v30 }
 0x30f   : > { %5225 = vmatpush3.bf16.msra.mxu1 %v6150_v30 }
 0x310   : > { %5227 = vmatprep.subr.bf16.mxu1 %v6158_v35 }
 0x313   : > { %5229 = vmatpush3.bf16.msra.mxu1 %v6158_v35 }
 0x314   : > { %5231 = vmatprep.subr.bf16.mxu1 %v6166_v5 }
 0x317   : > { %5233 = vmatpush3.bf16.msra.mxu1 %v6166_v5 }
 0x318   : > { %5235 = vmatprep.subr.bf16.mxu1 %v6174_v27 }
 0x31b   : > { %5237 = vmatpush3.bf16.msra.mxu1 %v6174_v27 }
 0x31c   : > { %5239 = vmatprep.subr.bf16.mxu1 %v6182_v6 }
 0x31f   : > { %5241 = vmatpush3.bf16.msra.mxu1 %v6182_v6 }
 0x320   : > { %5243 = vmatprep.subr.bf16.mxu1 %v6190_v47 }
 0x323   : > { %5245 = vmatpush3.bf16.msra.mxu1 %v6190_v47 }
 0x324   : > { %5247 = vmatprep.subr.bf16.mxu1 %v5698_v48 }
 0x326   : > { %4569 = vmatmul.mubr.f32.vlgmr.msra.gmra.mrb[2].mxu1 %v6235_v0 }
 0x327   : > { %5249 = vmatpush3.bf16.msra.mxu1 %v5698_v48  ;;  %4603 = vmatprep.mubr.f32.mxu1 %v6208_v14 }
 0x328   : > { %5251 = vmatprep.subr.bf16.mxu1 %v5712_v54 }
 0x32b   : > { %5253 = vmatpush3.bf16.msra.mxu1 %v5712_v54 }
 0x32c   : > { %5255 = vmatprep.subr.bf16.mxu1 %v5716_v57 }
 0x32f   : > { %5257 = vmatpush3.bf16.msra.mxu1 %v5716_v57 }
 0x330   : > { %5259 = vmatprep.subr.bf16.mxu1 %v5743_v9 }
 0x333   : > { %5261 = vmatpush3.bf16.msra.mxu1 %v5743_v9 }
 0x334   : > { %5263 = vmatprep.subr.bf16.mxu1 %v5776_v39 }
 0x337   : > { %5265 = vmatpush3.bf16.msra.mxu1 %v5776_v39 }
 0x338   : > { %5267 = vmatprep.subr.bf16.mxu1 %v5797_v53 }
 0x33b   : > { %5269 = vmatpush3.bf16.msra.mxu1 %v5797_v53 }
 0x33c   : > { %5271 = vmatprep.subr.bf16.mxu1 %v5836_v13 }
 0x33f   : > { %5273 = vmatpush3.bf16.msra.mxu1 %v5836_v13 }
 0x340   : > { %5275 = vmatprep.subr.bf16.mxu1 %v6051_v23 }
 0x343   : > { %5277 = vmatpush3.bf16.msra.mxu1 %v6051_v23 }
 0x346   : > { %4604 = vmatmul.mubr.f32.vlgmr.msra.gmra.mrb[2].mxu1 %v6235_v0 }
 0x359   : > { %v4395_v48 = vpop.f32.mrb[0].mxu1 }
 0x35a   : > { %v5278_v54 = vadd.f32 %v4395_v48, %v4220_v17  ;;  %v2652_v57 = vpop.f32.mrb[1].mxu1 }
 0x35b   : > { %v5279_v9 = vadd.f32 %v2652_v57, %v2065_v28 }
 0x35c   : > { %v3350_v38 = vsel %vm3348_vm1, %v5278_v54, 0.0 }
 0x35d   : > { %v3349_v39 = vsel %vm3348_vm1, %v5279_v9, 0.0 }
 0x35e   : > { %v3351_v52 = vadd.f32 %v3350_v38, %v3349_v39 }
 0x360   : > { %v3352_v53 = vrot.slane %v3351_v52, 4 }
 0x362   : > { %v3353_v15 = vadd.f32 %v3352_v53, %v3351_v52 }
 0x364   : > { %v3354_v44 = vrot.slane %v3353_v15, 2 }
 0x366   : > { %v3355_v13 = vadd.f32 %v3354_v44, %v3353_v15 }
 0x368   : > { %v3356_v16 = vrot.slane %v3355_v13, 1 }
 0x36a   : > { %v3357_v56 = vadd.f32 %v3356_v16, %v3355_v13 }
 0x36c   : > { %3359 = vst.msk [vmem:[%s168_s27] sm:$0x1] %vm3358_vm2, %v3357_v56 }
 0x419   : > { %v4605_v22 = vpop.f32.mrb[2].mxu1 }
 0x41a   : > { %v3361_v23 = vsel %vm3348_vm1, %v4605_v22, 0.0  ;;  %v3338_v34 = vpop.f32.mrb[3].mxu1 }
 0x41b   : > { %v3360_v4 = vsel %vm3348_vm1, %v3338_v34, 0.0 }
 0x41c   : > { %v3362_v59 = vadd.f32 %v3361_v23, %v3360_v4 }
 0x41e   : > { %v3363_v60 = vrot.slane %v3362_v59, 4 }
 0x420   : > { %v3364_v24 = vadd.f32 %v3363_v60, %v3362_v59 }
 0x422   : > { %v3365_v41 = vrot.slane %v3364_v24, 2 }
 0x424   : > { %v3366_v61 = vadd.f32 %v3365_v41, %v3364_v24 }
 0x426   : > { %v3367_v8 = vrot.slane %v3366_v61, 1 }
 0x428   : > { %v3368_v31 = vadd.f32 %v3367_v8, %v3366_v61 }
 0x42a   : > { %3369 = vst.msk [vmem:[%s168_s27 + $0x1] sm:$0x1] %vm3358_vm2, %v3368_v31 }
 0x42b PF: > { %s13_s12 = sadd.s32 1, %s5347_s12  }
 0x42c   : > { %p10_p4 = scmp.ge.s32.totalorder %s13_s12, 4  }
 0x42e   :  { %12 = sbr.rel (!%p10_p4) target bundleno = 1 (0x1), region = 64 }

// kernel: encoder_block_forward.3
= control target key start
LH: loop header
LB: loop body
LE: loop exit
PB: predicated region body
PF: predicated region fallthrough
CT: control target
= control target key end

     0   :  { %s6693_s24 = smov 0   ;;  %s7826_s0 = inlined_call_operand.vmem [shape: f32[2,18,64], index: 0, kind: input, shape index: {}]   ;;  %s7827_s1 = inlined_call_operand.vmem [shape: f32[3,64,128], index: 1, kind: input, shape index: {}]   ;;  %s7828_s2 = inlined_call_operand.vmem [shape: f32[1,128], index: 2, kind: input, shape index: {}]   ;;  %s7829_s3 = inlined_call_operand.vmem [shape: f32[1,128], index: 3, kind: input, shape index: {}]   ;;  %s7830_s4 = inlined_call_operand.vmem [shape: f32[2,128,64], index: 4, kind: input, shape index: {}]   ;;  %s7831_s5 = inlined_call_operand.vmem [shape: f32[2,8,16], index: 5, kind: input, shape index: {}]   ;;  %s7832_s6 = inlined_call_operand.vmem [shape: f32[2,16,128], index: 6, kind: output, shape index: {0}]   ;;  %s7833_s7 = inlined_call_operand.vmem [shape: f32[2,8,64], index: 7, kind: output, shape index: {1}]  }
   0x1 LB: > { %s4524_s25 = sadd.s32 4294967295, %s6648_s24   ;;  %p4528_p0 = scmp.ge.s32.totalorder %s6648_s24, 1  ;;  %s6648_s24 = sphi %s6693_s24, %s18_s24  }
   0x2   : > { %p240_p1 = scmp.lt.s32.totalorder %s6648_s24, 3 }
   0x4   : > { %p241_p2 = pnand %p4528_p0, %p240_p1 }
   0x5   : > { %v4533_v0 = vld [vmem:[%s7827_s1 + $0x40] sm:$0xff] (!%p241_p2)  ;;  %v4534_v1 = vld [vmem:[%s7827_s1 + $0x48] sm:$0xff] (!%p241_p2)  ;;  %v4535_v2 = vld [vmem:[%s7827_s1 + $0x50] sm:$0xff] (!%p241_p2)  ;;  %p276_p3 = scmp.lt.s32.totalorder (!%p241_p2), %s4524_s25, 1  ;;  %vm311_vm0 = vcmask (!%p241_p2), 523264   ;;  %vm6651_vm1 = vmmov (!%p241_p2), 0  }
   0x6   : > { %244 = sbr.rel (%p241_p2) target bundleno = 1351 (0x547), region = 44  ;;  %v319_v3 = vand.u32 (!%p241_p2), 4294901760, %v4533_v0  ;;  %v322_v4 = vand.u32 (!%p241_p2), 4294901760, %v4534_v1  ;;  %v4536_v5 = vld [vmem:[%s7827_s1 + $0x58] sm:$0xff] (!%p241_p2)  ;;  %v325_v6 = vand.u32 (!%p241_p2), 4294901760, %v4535_v2  ;;  %v4537_v7 = vld [vmem:[%s7827_s1 + $0x60] sm:$0xff] (!%p241_p2) }
   0x7   : > { %v4538_v8 = vld [vmem:[%s7827_s1 + $0x68] sm:$0xff] (!%p241_p2)  ;;  %v328_v9 = vand.u32 (!%p241_p2), 4294901760, %v4536_v5  ;;  %v331_v10 = vand.u32 (!%p241_p2), 4294901760, %v4537_v7  ;;  %v4539_v11 = vld [vmem:[%s7827_s1 + $0x70] sm:$0xff] (!%p241_p2)  ;;  %v4540_v12 = vld [vmem:[%s7827_s1 + $0x78] sm:$0xff] (!%p241_p2)  ;;  %vm3509_vm2 = vcmask (!%p241_p2), 130048  }
   0x8   : > { %v6727_v13 = vpack.c.bf16 (!%p241_p2), %v322_v4, %v319_v3  ;;  %v334_v14 = vand.u32 (!%p241_p2), 4294901760, %v4538_v8  ;;  %v337_v15 = vand.u32 (!%p241_p2), 4294901760, %v4539_v11  ;;  %v6729_v16 = vsub.f32 (!%p241_p2), %v4533_v0, %v319_v3 }
   0x9   : > { %v6731_v17 = vpack.c.bf16 (!%p241_p2), %v328_v9, %v325_v6  ;;  %v340_v18 = vand.u32 (!%p241_p2), 4294901760, %v4540_v12  ;;  %v6734_v19 = vsub.f32 (!%p241_p2), %v4534_v1, %v322_v4  ;;  %v6736_v20 = vsub.f32 (!%p241_p2), %v4535_v2, %v325_v6 }
   0xa   : > { %5850 = vmatprep.subr.bf16.mxu0 (!%p241_p2), %v6727_v13  ;;  %v414_v21 = vand.u32 (!%p241_p2), 4294901760, %v6729_v16  ;;  %v6740_v22 = vsub.f32 (!%p241_p2), %v4536_v5, %v328_v9  ;;  %v6750_v25 = vsub.f32 (!%p241_p2), %v4537_v7, %v331_v10  ;;  %v6753_v26 = vpack.c.bf16 (!%p241_p2), %v334_v14, %v331_v10 }
   0xb   : > { %5852 = vmatpush3.bf16.msra.mxu0 (!%p241_p2), %v6727_v13  ;;  %v421_v23 = vand.u32 (!%p241_p2), 4294901760, %v6734_v19  ;;  %v428_v24 = vand.u32 (!%p241_p2), 4294901760, %v6736_v20  ;;  %v6761_v31 = vsub.f32 (!%p241_p2), %v4538_v8, %v334_v14  ;;  %v6763_v32 = vpack.c.bf16 (!%p241_p2), %v340_v18, %v337_v15 }
   0xc   : > { %5854 = vmatprep.subr.bf16.mxu0 (!%p241_p2), %v6731_v17  ;;  %v415_v28 = vsub.f32 (!%p241_p2), %v6729_v16, %v414_v21  ;;  %v435_v30 = vand.u32 (!%p241_p2), 4294901760, %v6740_v22  ;;  %v6777_v39 = vsub.f32 (!%p241_p2), %v4539_v11, %v337_v15  ;;  %v442_v43 = vand.u32 (!%p241_p2), 4294901760, %v6750_v25 }
   0xd   : > { %s7849_s25 = smov (!%p276_p3, %s4524_s25), 1  ;;  %v422_v34 = vsub.f32 %v6734_v19, %v421_v23  ;;  %v429_v38 = vsub.f32 %v6736_v20, %v428_v24  ;;  %v449_v46 = vand.u32 4294901760, %v6761_v31  ;;  %v6790_v47 = vsub.f32 %v4540_v12, %v340_v18 }
   0xe   : > { %s6630_s19 = smul.u32 24, %s7849_s25  ;;  %v416_v40 = vand.u32 4294901760, %v415_v28  ;;  %v436_v42 = vsub.f32 %v6740_v22, %v435_v30  ;;  %v443_v53 = vsub.f32 %v6750_v25, %v442_v43  ;;  %v456_v54 = vand.u32 4294901760, %v6777_v39  ;;  %s4570_s9 = sshll.u32 %s7849_s25, 4 }
   0xf   : > { %5856 = vmatpush3.bf16.msra.mxu0 %v6731_v17  ;;  %v423_v41 = vand.u32 4294901760, %v422_v34  ;;  %v430_v50 = vand.u32 4294901760, %v429_v38  ;;  %v450_v57 = vsub.f32 %v6761_v31, %v449_v46  ;;  %v463_v58 = vand.u32 4294901760, %v6790_v47  ;;  %v296_v34 = vld [vmem:[%s7827_s1 + $0x20] sm:$0xff]  ;;  %s285_s11 = scalar_lea.vmem %s7832_s6, %s4570_s9  ;;  %s4532_s30 = sshll.u32 %s7849_s25, 3 }
  0x10   : > { %s6746_s22 = scalar_lea.vmem %s7826_s0, %s6630_s19  ;;  %5858 = vmatprep.subr.bf16.mxu0 %v6753_v26  ;;  %v437_v52 = vand.u32 4294901760, %v436_v42  ;;  %v444_v61 = vand.u32 4294901760, %v443_v53  ;;  %v457_v0 = vsub.f32 %v6777_v39, %v456_v54  ;;  %v5881_v6 = vpack.c.bf16 %v6734_v19, %v6729_v16 }
  0x11   : > { %v300_v27 = vld [vmem:[%s6746_s22 + $0x1] sm:$0xff]  ;;  %v301_v29 = vld [vmem:[%s6746_s22 + $0x9] sm:$0xff]  ;;  %v5865_v51 = vpack.c.bf16 %v423_v41, %v416_v40  ;;  %v451_v63 = vand.u32 4294901760, %v450_v57  ;;  %v464_v1 = vsub.f32 %v6790_v47, %v463_v58  ;;  %v5885_v7 = vpack.c.bf16 %v6740_v22, %v6736_v20  ;;  %v299_v40 = vld [vmem:[%s7827_s1 + $0x38] sm:$0xff] }
  0x12   : > { %v313_v33 = vsel %vm311_vm0, %v300_v27, 0  ;;  %v316_v35 = vsel %vm311_vm0, %v301_v29, 0  ;;  %v5869_v62 = vpack.c.bf16 %v437_v52, %v430_v50  ;;  %v458_v3 = vand.u32 4294901760, %v457_v0  ;;  %v290_v15 = vld [vmem:[%s6746_s22] sm:$0xff]  ;;  %v295_v27 = vld [vmem:[%s7827_s1 + $0x18] sm:$0xff] }
  0x13   : > { %v6770_v36 = vand.u32 4294901760, %v313_v33  ;;  %v6772_v37 = vand.u32 4294901760, %v316_v35  ;;  %5860 = vmatpush3.bf16.msra.mxu0 %v6753_v26  ;;  %v5873_v2 = vpack.c.bf16 %v451_v63, %v444_v61  ;;  %v465_v4 = vand.u32 4294901760, %v464_v1  ;;  %v292_v20 = vld [vmem:[%s7827_s1] sm:$0xff] }
  0x14   : > { %5862 = vmatprep.subr.bf16.mxu0 %v6763_v32  ;;  %v5889_v8 = vpack.c.bf16 %v6761_v31, %v6750_v25  ;;  %v5893_v9 = vpack.c.bf16 %v6790_v47, %v6777_v39  ;;  %v5913_v10 = vpack.c.bf16 %v421_v23, %v414_v21  ;;  %v5917_v11 = vpack.c.bf16 %v435_v30, %v428_v24  ;;  %v293_v21 = vld [vmem:[%s7827_s1 + $0x8] sm:$0xff]  ;;  %v294_v25 = vld [vmem:[%s7827_s1 + $0x10] sm:$0xff] }
  0x15   : > { %v392_v44 = vsub.f32 %v313_v33, %v6770_v36  ;;  %v6787_v45 = vsub.f32 %v316_v35, %v6772_v37  ;;  %v5877_v5 = vpack.c.bf16 %v465_v4, %v458_v3  ;;  %v5921_v12 = vpack.c.bf16 %v449_v46, %v442_v43  ;;  %v291_v24 = vld [vmem:[%s6746_s22 + $0x8] sm:$0xff]  ;;  %v298_v39 = vld [vmem:[%s7827_s1 + $0x30] sm:$0xff] }
  0x16   : > { %v5925_v14 = vpack.c.bf16 %v463_v58, %v456_v54  ;;  %v899_v16 = vsel %vm311_vm0, %v290_v15, 0  ;;  %v908_v23 = vand.u32 4294901760, %v293_v21  ;;  %v902_v29 = vsel %vm311_vm0, %v291_v24, 0 }
  0x17   : > { %v393_v48 = vand.u32 4294901760, %v392_v44  ;;  %v403_v49 = vand.u32 4294901760, %v6787_v45  ;;  %5864 = vmatpush3.bf16.msra.mxu0 %v6763_v32  ;;  %v6845_v18 = vand.u32 4294901760, %v899_v16  ;;  %v911_v31 = vand.u32 4294901760, %v294_v25 }
  0x18   : > { %5866 = vmatprep.subr.bf16.mxu0 %v5865_v51  ;;  %v914_v33 = vand.u32 4294901760, %v295_v27  ;;  %v6884_v35 = vsub.f32 %v293_v21, %v908_v23  ;;  %v917_v38 = vand.u32 4294901760, %v296_v34  ;;  %v923_v47 = vand.u32 4294901760, %v298_v39 }
  0x19   : > { %v394_v55 = vsub.f32 %v392_v44, %v393_v48  ;;  %v404_v56 = vsub.f32 %v6787_v45, %v403_v49  ;;  %v6852_v19 = vsub.f32 %v899_v16, %v6845_v18  ;;  %v6899_v43 = vsub.f32 %v294_v25, %v911_v31 }
  0x1a   : > { %v6905_v46 = vsub.f32 %v295_v27, %v914_v33  ;;  %v6916_v52 = vsub.f32 %v296_v34, %v917_v38  ;;  %v6940_v0 = vsub.f32 %v298_v39, %v923_v47  ;;  %v2106_v34 = vld [vmem:[%s7830_s4 + $0x8] sm:$0xff] }
  0x1b   : > { %v395_v59 = vand.u32 4294901760, %v394_v55  ;;  %v405_v60 = vand.u32 4294901760, %v404_v56  ;;  %v979_v22 = vand.u32 4294901760, %v6852_v19  ;;  %v2125_v39 = vand.u32 4294901760, %v2106_v34 }
  0x1c   : > { %v1021_v55 = vand.u32 4294901760, %v6905_v46  ;;  %v5981_v25 = vpack.c.bf16 %v6905_v46, %v6899_v43 }
  0x1d   : > { %5019 = vmatprep.mubr.f32.mxu0 %v395_v59 }
  0x1e   : > { %5020 = vmatmul.mubr.f32.vlgmr.msra.gmra.mrb[0].mxu0 %v405_v60  ;;  %v1028_v60 = vand.u32 4294901760, %v6916_v52  ;;  %v1022_v63 = vsub.f32 %v6905_v46, %v1021_v55 }
  0x1f   : > { %5868 = vmatpush3.bf16.msra.mxu0 %v5865_v51  ;;  %5038 = vmatprep.mubr.f32.mxu0 %v6770_v36  ;;  %v1014_v51 = vand.u32 4294901760, %v6899_v43 }
  0x20   : > { %5870 = vmatprep.subr.bf16.mxu0 %v5869_v62  ;;  %v1029_v4 = vsub.f32 %v6916_v52, %v1028_v60 }
  0x21   : > { %v1015_v59 = vsub.f32 %v6899_v43, %v1014_v51  ;;  %v2110_v43 = vld [vmem:[%s7830_s4 + $0x28] sm:$0xff] }
  0x23   : > { %5872 = vmatpush3.bf16.msra.mxu0 %v5869_v62  ;;  %v1016_v3 = vand.u32 4294901760, %v1015_v59 }
  0x24   : > { %5874 = vmatprep.subr.bf16.mxu0 %v5873_v2 }
  0x27   : > { %5876 = vmatpush3.bf16.msra.mxu0 %v5873_v2 }
  0x28   : > { %5878 = vmatprep.subr.bf16.mxu0 %v5877_v5 }
  0x2b   : > { %5880 = vmatpush3.bf16.msra.mxu0 %v5877_v5 }
  0x2c   : > { %5882 = vmatprep.subr.bf16.mxu0 %v5881_v6 }
  0x2e   : > { %5039 = vmatmul.mubr.f32.vlgmr.msra.gmra.mrb[0].mxu0 %v6772_v37 }
  0x2f   : > { %5884 = vmatpush3.bf16.msra.mxu0 %v5881_v6  ;;  %5057 = vmatprep.mubr.f32.mxu0 %v392_v44  ;;  %v6902_v44 = vpack.c.bf16 %v914_v33, %v911_v31  ;;  %v1484_v31 = vld [vmem:[%s6746_s22 + $0x2] sm:$0xff] }
  0x30   : > { %5886 = vmatprep.subr.bf16.mxu0 %v5885_v7  ;;  %v2105_v33 = vld [vmem:[%s7830_s4] sm:$0xff] }
  0x33   : > { %5888 = vmatpush3.bf16.msra.mxu0 %v5885_v7  ;;  %v1023_v7 = vand.u32 4294901760, %v1022_v63 }
  0x34   : > { %5890 = vmatprep.subr.bf16.mxu0 %v5889_v8 }
  0x37   : > { %5892 = vmatpush3.bf16.msra.mxu0 %v5889_v8  ;;  %v1042_v8 = vand.u32 4294901760, %v6940_v0 }
  0x38   : > { %5894 = vmatprep.subr.bf16.mxu0 %v5893_v9 }
  0x39   : > { %v1043_v15 = vsub.f32 %v6940_v0, %v1042_v8 }
  0x3b   : > { %5896 = vmatpush3.bf16.msra.mxu0 %v5893_v9  ;;  %v1044_v21 = vand.u32 4294901760, %v1043_v15 }
  0x3c   : > { %5898 = vmatprep.subr.bf16.mxu0 %v6727_v13 }
  0x3e   : > { %5058 = vmatmul.mubr.f32.vlgmr.msra.gmra.mrb[0].mxu0 %v6787_v45 }
  0x3f   : > { %5900 = vmatpush3.bf16.msra.mxu0 %v6727_v13  ;;  %5076 = vmatprep.mubr.f32.mxu0 %v393_v48  ;;  %v926_v48 = vand.u32 4294901760, %v299_v40 }
  0x40   : > { %5902 = vmatprep.subr.bf16.mxu0 %v6731_v17 }
  0x41   : > { %v6927_v56 = vpack.c.bf16 %v926_v48, %v923_v47  ;;  %v6942_v1 = vsub.f32 %v299_v40, %v926_v48  ;;  %v2108_v40 = vld [vmem:[%s7830_s4 + $0x18] sm:$0xff]  ;;  %v2137_v47 = vand.u32 4294901760, %v2110_v43 }
  0x43   : > { %5904 = vmatpush3.bf16.msra.mxu0 %v6731_v17  ;;  %v1049_v9 = vand.u32 4294901760, %v6942_v1 }
  0x44   : > { %5906 = vmatprep.subr.bf16.mxu0 %v6753_v26 }
  0x45   : > { %v1050_v16 = vsub.f32 %v6942_v1, %v1049_v9 }
  0x47   : > { %5908 = vmatpush3.bf16.msra.mxu0 %v6753_v26 }
  0x48   : > { %5910 = vmatprep.subr.bf16.mxu0 %v6763_v32 }
  0x4b   : > { %5912 = vmatpush3.bf16.msra.mxu0 %v6763_v32 }
  0x4c   : > { %5914 = vmatprep.subr.bf16.mxu0 %v5913_v10 }
  0x4e   : > { %5077 = vmatmul.mubr.f32.vlgmr.msra.gmra.mrb[0].mxu0 %v403_v49 }
  0x4f   : > { %5916 = vmatpush3.bf16.msra.mxu0 %v5913_v10  ;;  %5095 = vmatprep.mubr.f32.mxu0 %v6770_v36 }
  0x50   : > { %5918 = vmatprep.subr.bf16.mxu0 %v5917_v11 }
  0x53   : > { %5920 = vmatpush3.bf16.msra.mxu0 %v5917_v11  ;;  %v1030_v11 = vand.u32 4294901760, %v1029_v4 }
  0x54   : > { %5922 = vmatprep.subr.bf16.mxu0 %v5921_v12 }
  0x57   : > { %5924 = vmatpush3.bf16.msra.mxu0 %v5921_v12  ;;  %v5965_v12 = vpack.c.bf16 %v1023_v7, %v1016_v3 }
  0x58   : > { %5926 = vmatprep.subr.bf16.mxu0 %v5925_v14 }
  0x5b   : > { %5928 = vmatpush3.bf16.msra.mxu0 %v5925_v14 }
  0x5c   : > { %5930 = vmatprep.subr.bf16.mxu0 %v6727_v13 }
  0x5e   : > { %5096 = vmatmul.mubr.f32.vlgmr.msra.gmra.mrb[0].mxu0 %v6772_v37 }
  0x5f   : > { %5932 = vmatpush3.bf16.msra.mxu0 %v6727_v13  ;;  %5114 = vmatprep.mubr.f32.mxu0 %v6770_v36  ;;  %v905_v13 = vand.u32 4294901760, %v292_v20  ;;  %v6889_v36 = vand.u32 4294901760, %v902_v29 }
  0x60   : > { %5934 = vmatprep.subr.bf16.mxu0 %v6731_v17 }
  0x61   : > { %v6875_v28 = vsub.f32 %v292_v20, %v905_v13  ;;  %v6879_v30 = vpack.c.bf16 %v908_v23, %v905_v13  ;;  %v6909_v49 = vsub.f32 %v902_v29, %v6889_v36  ;;  %v1051_v13 = vand.u32 4294901760, %v1050_v16 }
  0x63   : > { %5936 = vmatpush3.bf16.msra.mxu0 %v6731_v17  ;;  %v980_v17 = vsub.f32 %v6852_v19, %v979_v22  ;;  %v1000_v42 = vand.u32 4294901760, %v6875_v28  ;;  %v989_v57 = vand.u32 4294901760, %v6909_v49  ;;  %v5973_v23 = vpack.c.bf16 %v1051_v13, %v1044_v21  ;;  %v2115_v21 = vld [vmem:[%s7830_s4 + $0x50] sm:$0xff] }
  0x64   : > { %5938 = vmatprep.subr.bf16.mxu0 %v6753_v26  ;;  %v5977_v24 = vpack.c.bf16 %v6884_v35, %v6875_v28 }
  0x65   : > { %v981_v41 = vand.u32 4294901760, %v980_v17  ;;  %v1001_v50 = vsub.f32 %v6875_v28, %v1000_v42  ;;  %v990_v2 = vsub.f32 %v6909_v49, %v989_v57  ;;  %v5989_v17 = vpack.c.bf16 %v6942_v1, %v6940_v0 }
  0x67   : > { %5940 = vmatpush3.bf16.msra.mxu0 %v6753_v26  ;;  %v297_v26 = vld [vmem:[%s7827_s1 + $0x28] sm:$0xff]  ;;  %v1002_v58 = vand.u32 4294901760, %v1001_v50  ;;  %v991_v10 = vand.u32 4294901760, %v990_v2  ;;  %v7026_v50 = vsub.f32 %v2106_v34, %v2125_v39 }
  0x68   : > { %5942 = vmatprep.subr.bf16.mxu0 %v6763_v32  ;;  %v920_v45 = vand.u32 4294901760, %v297_v26 }
  0x6a   : > { %v6918_v53 = vsub.f32 %v297_v26, %v920_v45  ;;  %v6021_v26 = vpack.c.bf16 %v1049_v9, %v1042_v8 }
  0x6b   : > { %5944 = vmatpush3.bf16.msra.mxu0 %v6763_v32  ;;  %v1007_v32 = vand.u32 4294901760, %v6884_v35 }
  0x6c   : > { %5946 = vmatprep.subr.bf16.mxu0 %v6879_v30  ;;  %v1035_v61 = vand.u32 4294901760, %v6918_v53  ;;  %v5985_v27 = vpack.c.bf16 %v6918_v53, %v6916_v52  ;;  %v2111_v52 = vld [vmem:[%s7830_s4 + $0x30] sm:$0xff] }
  0x6d   : > { %v1008_v54 = vsub.f32 %v6884_v35, %v1007_v32  ;;  %v6009_v29 = vpack.c.bf16 %v1007_v32, %v1000_v42  ;;  %v2107_v35 = vld [vmem:[%s7830_s4 + $0x10] sm:$0xff]  ;;  %v2109_v42 = vld [vmem:[%s7830_s4 + $0x20] sm:$0xff]  ;;  %v2131_v32 = vand.u32 4294901760, %v2108_v40  ;;  %v2140_v1 = vand.u32 4294901760, %v2111_v52 }
  0x6e   : > { %5115 = vmatmul.mubr.f32.vlgmr.msra.gmra.mrb[0].mxu0 %v6772_v37  ;;  %v6921_v37 = vpack.c.bf16 %v920_v45, %v917_v38  ;;  %v1036_v5 = vsub.f32 %v6918_v53, %v1035_v61  ;;  %v6017_v28 = vpack.c.bf16 %v1035_v61, %v1028_v60  ;;  %v2122_v38 = vand.u32 4294901760, %v2105_v33  ;;  %v2112_v53 = vld [vmem:[%s7830_s4 + $0x38] sm:$0xff] }
  0x6f   : > { %5948 = vmatpush3.bf16.msra.mxu0 %v6879_v30  ;;  %5133 = vmatprep.mubr.f32.mxu0 %v981_v41  ;;  %v1009_v62 = vand.u32 4294901760, %v1008_v54  ;;  %v2128_v41 = vand.u32 4294901760, %v2107_v35  ;;  %v2134_v46 = vand.u32 4294901760, %v2109_v42  ;;  %v2232_v60 = vand.u32 4294901760, %v7026_v50 }
  0x70   : > { %5950 = vmatprep.subr.bf16.mxu0 %v6902_v44  ;;  %v1037_v14 = vand.u32 4294901760, %v1036_v5  ;;  %v7022_v48 = vpack.c.bf16 %v2125_v39, %v2122_v38  ;;  %v2143_v2 = vand.u32 4294901760, %v2112_v53 }
  0x71   : > { %v5961_v6 = vpack.c.bf16 %v1009_v62, %v1002_v58  ;;  %v7036_v54 = vpack.c.bf16 %v2131_v32, %v2128_v41  ;;  %v7042_v58 = vsub.f32 %v2109_v42, %v2134_v46  ;;  %v7047_v62 = vsub.f32 %v2110_v43, %v2137_v47 }
  0x72   : > { %v5969_v20 = vpack.c.bf16 %v1037_v14, %v1030_v11  ;;  %v2233_v4 = vsub.f32 %v7026_v50, %v2232_v60  ;;  %v7067_v9 = vpack.c.bf16 %v2143_v2, %v2140_v1  ;;  %v2113_v11 = vld [vmem:[%s7830_s4 + $0x40] sm:$0xff] }
  0x73   : > { %5952 = vmatpush3.bf16.msra.mxu0 %v6902_v44  ;;  %v2253_v0 = vand.u32 4294901760, %v7042_v58 }
  0x74   : > { %5954 = vmatprep.subr.bf16.mxu0 %v6921_v37  ;;  %v2234_v15 = vand.u32 4294901760, %v2233_v4 }
  0x75   : > { %v2254_v8 = vsub.f32 %v7042_v58, %v2253_v0 }
  0x77   : > { %5956 = vmatpush3.bf16.msra.mxu0 %v6921_v37 }
  0x78   : > { %5958 = vmatprep.subr.bf16.mxu0 %v6927_v56 }
  0x7b   : > { %5960 = vmatpush3.bf16.msra.mxu0 %v6927_v56 }
  0x7c   : > { %5962 = vmatprep.subr.bf16.mxu0 %v5961_v6 }
  0x7e   : > { %5134 = vmatmul.mubr.f32.vlgmr.msra.gmra.mrb[0].mxu0 %v991_v10  ;;  %v7069_v10 = vsub.f32 %v2111_v52, %v2140_v1 }
  0x7f   : > { %5964 = vmatpush3.bf16.msra.mxu0 %v5961_v6  ;;  %5152 = vmatprep.mubr.f32.mxu0 %v6845_v18  ;;  %v7840_v6 = vand.u32 4294901760, %v7047_v62 }
  0x80   : > { %5966 = vmatprep.subr.bf16.mxu0 %v5965_v12 }
  0x83   : > { %5968 = vmatpush3.bf16.msra.mxu0 %v5965_v12  ;;  %v2114_v12 = vld [vmem:[%s7830_s4 + $0x48] sm:$0xff] }
  0x84   : > { %5970 = vmatprep.subr.bf16.mxu0 %v5969_v20 }
  0x87   : > { %5972 = vmatpush3.bf16.msra.mxu0 %v5969_v20  ;;  %v2261_v20 = vsub.f32 %v7047_v62, %v7840_v6 }
  0x88   : > { %5974 = vmatprep.subr.bf16.mxu0 %v5973_v23 }
  0x8b   : > { %5976 = vmatpush3.bf16.msra.mxu0 %v5973_v23  ;;  %v2255_v23 = vand.u32 4294901760, %v2254_v8 }
  0x8c   : > { %5978 = vmatprep.subr.bf16.mxu0 %v5977_v24 }
  0x8e   : > { %5153 = vmatmul.mubr.f32.vlgmr.msra.gmra.mrb[0].mxu0 %v6889_v36 }
  0x8f   : > { %5980 = vmatpush3.bf16.msra.mxu0 %v5977_v24  ;;  %5171 = vmatprep.mubr.f32.mxu0 %v6852_v19  ;;  %v6013_v19 = vpack.c.bf16 %v1021_v55, %v1014_v51  ;;  %v7028_v51 = vsub.f32 %v2107_v35, %v2128_v41  ;;  %v7038_v55 = vsub.f32 %v2108_v40, %v2131_v32  ;;  %v7839_v24 = vand.u32 4294901760, %v7069_v10 }
  0x90   : > { %5982 = vmatprep.subr.bf16.mxu0 %v5981_v25  ;;  %v2152_v35 = vand.u32 4294901760, %v2115_v21 }
  0x91   : > { %v2239_v61 = vand.u32 4294901760, %v7028_v51  ;;  %v2246_v63 = vand.u32 4294901760, %v7038_v55 }
  0x92   : > { %v7103_v32 = vsub.f32 %v2115_v21, %v2152_v35  ;;  %v1485_v21 = vld [vmem:[%s6746_s22 + $0xa] sm:$0xff]  ;;  %s289_s22 = scalar_lea.vmem %s7833_s7, %s4532_s30 }
  0x93   : > { %5984 = vmatpush3.bf16.msra.mxu0 %v5981_v25  ;;  %v2240_v5 = vsub.f32 %v7028_v51, %v2239_v61  ;;  %v2247_v7 = vsub.f32 %v7038_v55, %v2246_v63  ;;  %v7084_v25 = vsub.f32 %v2112_v53, %v2143_v2 }
  0x94   : > { %5986 = vmatprep.subr.bf16.mxu0 %v5985_v27  ;;  %v7835_v2 = vand.u32 4294901760, %v7103_v32 }
  0x95   : > { %v2241_v16 = vand.u32 4294901760, %v2240_v5  ;;  %v2248_v13 = vand.u32 4294901760, %v2247_v7  ;;  %v7838_v34 = vand.u32 4294901760, %v7084_v25 }
  0x97   : > { %5988 = vmatpush3.bf16.msra.mxu0 %v5985_v27  ;;  %v2116_v27 = vld [vmem:[%s7830_s4 + $0x58] sm:$0xff]  ;;  %v2275_v42 = vsub.f32 %v7084_v25, %v7838_v34 }
  0x98   : > { %5990 = vmatprep.subr.bf16.mxu0 %v5989_v17  ;;  %v2155_v41 = vand.u32 4294901760, %v2116_v27 }
  0x99   : > { %v2276_v53 = vand.u32 4294901760, %v2275_v42 }
  0x9a   : > { %v7108_v52 = vsub.f32 %v2116_v27, %v2155_v41 }
  0x9b   : > { %5992 = vmatpush3.bf16.msra.mxu0 %v5989_v17 }
  0x9c   : > { %5994 = vmatprep.subr.bf16.mxu0 %v6879_v30  ;;  %v7834_v5 = vand.u32 4294901760, %v7108_v52 }
  0x9e   : > { %5172 = vmatmul.mubr.f32.vlgmr.msra.gmra.mrb[0].mxu0 %v6909_v49  ;;  %v7024_v49 = vsub.f32 %v2105_v33, %v2122_v38  ;;  %v2268_v33 = vsub.f32 %v7069_v10, %v7839_v24 }
  0x9f   : > { %5996 = vmatpush3.bf16.msra.mxu0 %v6879_v30  ;;  %5190 = vmatprep.mubr.f32.mxu0 %v979_v22  ;;  %v6992_v22 = vsel %vm311_vm0, %v1484_v31, 0  ;;  %v2146_v31 = vand.u32 4294901760, %v2113_v11 }
  0xa0   : > { %5998 = vmatprep.subr.bf16.mxu0 %v6902_v44  ;;  %v7020_v45 = vand.u32 4294901760, %v6992_v22  ;;  %v2225_v59 = vand.u32 4294901760, %v7024_v49 }
  0xa1   : > { %v7095_v40 = vsub.f32 %v2113_v11, %v2146_v31  ;;  %v2296_v11 = vsub.f32 %v7103_v32, %v7835_v2 }
  0xa2   : > { %v2226_v3 = vsub.f32 %v7024_v49, %v2225_v59 }
  0xa3   : > { %6000 = vmatpush3.bf16.msra.mxu0 %v6902_v44 }
  0xa4   : > { %6002 = vmatprep.subr.bf16.mxu0 %v6921_v37  ;;  %v2227_v14 = vand.u32 4294901760, %v2226_v3  ;;  %v7117_v3 = vsub.f32 %v6992_v22, %v7020_v45  ;;  %v4542_v22 = vld [vmem:[%s7827_s1 + $0x88] sm:$0xff] }
  0xa6   : > { %v6169_v17 = vpack.c.bf16 %v2234_v15, %v2227_v14  ;;  %v1576_v15 = vand.u32 4294901760, %v7117_v3 }
  0xa7   : > { %6004 = vmatpush3.bf16.msra.mxu0 %v6921_v37 }
  0xa8   : > { %6006 = vmatprep.subr.bf16.mxu0 %v6927_v56  ;;  %6170 = vmatprep.subr.bf16.mxu1 %v6169_v17 }
  0xa9   : > { %6172 = vmatpush3.bf16.msra.mxu1 %v6169_v17  ;;  %v2297_v17 = vand.u32 4294901760, %v2296_v11 }
  0xab   : > { %6008 = vmatpush3.bf16.msra.mxu0 %v6927_v56 }
  0xac   : > { %6010 = vmatprep.subr.bf16.mxu0 %v6009_v29 }
  0xae   : > { %5191 = vmatmul.mubr.f32.vlgmr.msra.gmra.mrb[0].mxu0 %v989_v57  ;;  %v7040_v57 = vpack.c.bf16 %v2137_v47, %v2134_v46  ;;  %v7837_v46 = vand.u32 4294901760, %v7095_v40  ;;  %v7106_v47 = vpack.c.bf16 %v2155_v41, %v2152_v35  ;;  %v4545_v41 = vld [vmem:[%s7827_s1 + $0xa0] sm:$0xff] }
  0xaf   : > { %6012 = vmatpush3.bf16.msra.mxu0 %v6009_v29  ;;  %5209 = vmatprep.mubr.f32.mxu0 %v6845_v18  ;;  %v2262_v29 = vand.u32 4294901760, %v2261_v20  ;;  %v1505_v20 = vand.u32 4294901760, %v4542_v22 }
  0xb0   : > { %6014 = vmatprep.subr.bf16.mxu0 %v6013_v19  ;;  %v2282_v4 = vsub.f32 %v7095_v40, %v7837_v46 }
  0xb1   : > { %v6177_v38 = vpack.c.bf16 %v2262_v29, %v2255_v23  ;;  %v4544_v23 = vld [vmem:[%s7827_s1 + $0x98] sm:$0xff] }
  0xb2   : > { %v2283_v8 = vand.u32 4294901760, %v2282_v4  ;;  %v4547_v4 = vld [vmem:[%s7827_s1 + $0xb0] sm:$0xff] }
  0xb3   : > { %6016 = vmatpush3.bf16.msra.mxu0 %v6013_v19  ;;  %v2149_v19 = vand.u32 4294901760, %v2114_v12 }
  0xb4   : > { %6018 = vmatprep.subr.bf16.mxu0 %v6017_v28 }
  0xb5   : > { %v7093_v39 = vpack.c.bf16 %v2149_v19, %v2146_v31  ;;  %v7101_v43 = vsub.f32 %v2114_v12, %v2149_v19  ;;  %v2303_v12 = vsub.f32 %v7108_v52, %v7834_v5  ;;  %v1577_v31 = vsub.f32 %v7117_v3, %v1576_v15 }
  0xb6   : > { %v7155_v19 = vsub.f32 %v4542_v22, %v1505_v20 }
  0xb7   : > { %6020 = vmatpush3.bf16.msra.mxu0 %v6017_v28  ;;  %v6173_v28 = vpack.c.bf16 %v2248_v13, %v2241_v16  ;;  %v7836_v1 = vand.u32 4294901760, %v7101_v43  ;;  %v4543_v13 = vld [vmem:[%s7827_s1 + $0x90] sm:$0xff] }
  0xb8   : > { %6022 = vmatprep.subr.bf16.mxu0 %v6021_v26  ;;  %v1508_v35 = vand.u32 4294901760, %v4543_v13  ;;  %v1604_v22 = vand.u32 4294901760, %v7155_v19 }
  0xb9   : > { %6174 = vmatprep.subr.bf16.mxu1 %v6173_v28 }
  0xba   : > { %6176 = vmatpush3.bf16.msra.mxu1 %v6173_v28  ;;  %v1499_v28 = vsel %vm311_vm0, %v1485_v21, 0 }
  0xbb   : > { %6024 = vmatpush3.bf16.msra.mxu0 %v6021_v26  ;;  %v2269_v26 = vand.u32 4294901760, %v2268_v33  ;;  %6178 = vmatprep.subr.bf16.mxu1 %v6177_v38 }
  0xbc   : > { %6026 = vmatprep.subr.bf16.mxu0 %v6879_v30 }
  0xbd   : > { %v6181_v7 = vpack.c.bf16 %v2276_v53, %v2269_v26  ;;  %v7168_v53 = vand.u32 4294901760, %v1499_v28 }
  0xbe   : > { %5210 = vmatmul.mubr.f32.vlgmr.msra.gmra.mrb[0].mxu0 %v6889_v36  ;;  %6180 = vmatpush3.bf16.msra.mxu1 %v6177_v38  ;;  %v1511_v38 = vand.u32 4294901760, %v4544_v23 }
  0xbf   : > { %6028 = vmatpush3.bf16.msra.mxu0 %v6879_v30  ;;  %5228 = vmatprep.mubr.f32.mxu0 %v6845_v18  ;;  %v2289_v30 = vsub.f32 %v7101_v43, %v7836_v1  ;;  %v4541_v18 = vld [vmem:[%s7827_s1 + $0x80] sm:$0xff] }
  0xc0   : > { %6030 = vmatprep.subr.bf16.mxu0 %v6902_v44  ;;  %v1502_v16 = vand.u32 4294901760, %v4541_v18  ;;  %6182 = vmatprep.subr.bf16.mxu1 %v6181_v7  ;;  %v7183_v11 = vpack.c.bf16 %v1511_v38, %v1508_v35 }
  0xc1   : > { %v2290_v14 = vand.u32 4294901760, %v2289_v30  ;;  %v4548_v30 = vld [vmem:[%s7827_s1 + $0xb8] sm:$0xff] }
  0xc2   : > { %v7149_v29 = vsub.f32 %v4541_v18, %v1502_v16  ;;  %v7159_v33 = vpack.c.bf16 %v1505_v20, %v1502_v16  ;;  %6184 = vmatpush3.bf16.msra.mxu1 %v6181_v7  ;;  %v1578_v18 = vand.u32 4294901760, %v1577_v31  ;;  %v7178_v7 = vsub.f32 %v4543_v13, %v1508_v35 }
  0xc3   : > { %6032 = vmatpush3.bf16.msra.mxu0 %v6902_v44  ;;  %v6185_v27 = vpack.c.bf16 %v2290_v14, %v2283_v8  ;;  %v2304_v44 = vand.u32 4294901760, %v2303_v12  ;;  %v7180_v8 = vsub.f32 %v4544_v23, %v1511_v38  ;;  %v1520_v14 = vand.u32 4294901760, %v4547_v4 }
  0xc4   : > { %6034 = vmatprep.subr.bf16.mxu0 %v6921_v37  ;;  %v1597_v26 = vand.u32 4294901760, %v7149_v29  ;;  %v1523_v16 = vand.u32 4294901760, %v4548_v30  ;;  %v7187_v20 = vsub.f32 %v1499_v28, %v7168_v53  ;;  %v1605_v13 = vsub.f32 %v7155_v19, %v1604_v22 }
  0xc5   : > { %6186 = vmatprep.subr.bf16.mxu1 %v6185_v27  ;;  %v6189_v42 = vpack.c.bf16 %v2304_v44, %v2297_v17  ;;  %v1611_v23 = vand.u32 4294901760, %v7178_v7 }
  0xc6   : > { %6188 = vmatpush3.bf16.msra.mxu1 %v6185_v27  ;;  %v1598_v21 = vsub.f32 %v7149_v29, %v1597_v26  ;;  %v7205_v31 = vpack.c.bf16 %v1523_v16, %v1520_v14  ;;  %v1586_v28 = vand.u32 4294901760, %v7187_v20  ;;  %v1606_v38 = vand.u32 4294901760, %v1605_v13 }
  0xc7   : > { %6036 = vmatpush3.bf16.msra.mxu0 %v6921_v37  ;;  %v4546_v37 = vld [vmem:[%s7827_s1 + $0xa8] sm:$0xff]  ;;  %6190 = vmatprep.subr.bf16.mxu1 %v6189_v42 }
  0xc8   : > { %6038 = vmatprep.subr.bf16.mxu0 %v6927_v56  ;;  %v1517_v12 = vand.u32 4294901760, %v4546_v37  ;;  %v1599_v35 = vand.u32 4294901760, %v1598_v21  ;;  %v1587_v21 = vsub.f32 %v7187_v20, %v1586_v28 }
  0xca   : > { %v7203_v44 = vsub.f32 %v4546_v37, %v1517_v12  ;;  %6192 = vmatpush3.bf16.msra.mxu1 %v6189_v42  ;;  %v6057_v13 = vpack.c.bf16 %v1606_v38, %v1599_v35 }
  0xcb   : > { %6040 = vmatpush3.bf16.msra.mxu0 %v6927_v56  ;;  %v1514_v56 = vand.u32 4294901760, %v4545_v41 }
  0xcc   : > { %6042 = vmatprep.subr.bf16.mxu0 %v7159_v33  ;;  %v1632_v42 = vand.u32 4294901760, %v7203_v44 }
  0xcd   : > { %v7199_v27 = vpack.c.bf16 %v1517_v12, %v1514_v56  ;;  %v7201_v17 = vsub.f32 %v4545_v41, %v1514_v56  ;;  %v7218_v56 = vsub.f32 %v4547_v4, %v1520_v14  ;;  %v7220_v12 = vsub.f32 %v4548_v30, %v1523_v16 }
  0xce   : > { %5229 = vmatmul.mubr.f32.vlgmr.msra.gmra.mrb[0].mxu0 %v6889_v36  ;;  %v1618_v36 = vand.u32 4294901760, %v7180_v8  ;;  %v1633_v4 = vsub.f32 %v7203_v44, %v1632_v42  ;;  %v1588_v16 = vand.u32 4294901760, %v1587_v21 }
  0xcf   : > { %6044 = vmatpush3.bf16.msra.mxu0 %v7159_v33  ;;  %5247 = vmatprep.mubr.f32.mxu0 %v1578_v18  ;;  %v1612_v18 = vsub.f32 %v7178_v7, %v1611_v23  ;;  %v1625_v37 = vand.u32 4294901760, %v7201_v17  ;;  %v1639_v30 = vand.u32 4294901760, %v7218_v56  ;;  %v1646_v14 = vand.u32 4294901760, %v7220_v12 }
  0xd0   : > { %6046 = vmatprep.subr.bf16.mxu0 %v7183_v11  ;;  %v1619_v41 = vsub.f32 %v7180_v8, %v1618_v36 }
  0xd1   : > { %v1613_v5 = vand.u32 4294901760, %v1612_v18  ;;  %v1626_v1 = vsub.f32 %v7201_v17, %v1625_v37  ;;  %v1634_v18 = vand.u32 4294901760, %v1633_v4  ;;  %v1647_v46 = vsub.f32 %v7220_v12, %v1646_v14 }
  0xd2   : > { %v1620_v2 = vand.u32 4294901760, %v1619_v41  ;;  %v1640_v41 = vsub.f32 %v7218_v56, %v1639_v30 }
  0xd3   : > { %6048 = vmatpush3.bf16.msra.mxu0 %v7183_v11  ;;  %v1627_v38 = vand.u32 4294901760, %v1626_v1  ;;  %v1648_v6 = vand.u32 4294901760, %v1647_v46  ;;  %v6073_v1 = vpack.c.bf16 %v7155_v19, %v7149_v29  ;;  %v6081_v46 = vpack.c.bf16 %v7203_v44, %v7201_v17 }
  0xd4   : > { %6050 = vmatprep.subr.bf16.mxu0 %v7199_v27  ;;  %v6061_v35 = vpack.c.bf16 %v1620_v2, %v1613_v5  ;;  %v1641_v24 = vand.u32 4294901760, %v1640_v41  ;;  %v6077_v2 = vpack.c.bf16 %v7180_v8, %v7178_v7  ;;  %v6117_v5 = vpack.c.bf16 %v1646_v14, %v1639_v30  ;;  %v4549_v41 = vld [vmem:[%s7828_s2] ss:$0 sm:$0xff] }
  0xd5   : > { %v6065_v34 = vpack.c.bf16 %v1634_v18, %v1627_v38  ;;  %v6201_v14 = vpack.c.bf16 %v7026_v50, %v7024_v49  ;;  %v7841_v49 = vand.u32 4294901760, %v7047_v62 }
  0xd6   : > { %v6069_v21 = vpack.c.bf16 %v1648_v6, %v1641_v24  ;;  %v6085_v6 = vpack.c.bf16 %v7220_v12, %v7218_v56  ;;  %v6105_v24 = vpack.c.bf16 %v1604_v22, %v1597_v26  ;;  %v2120_v22 = vld [vmem:[%s7830_s4 + $0x78] sm:$0xff] }
  0xd7   : > { %6052 = vmatpush3.bf16.msra.mxu0 %v7199_v27  ;;  %v6273_v50 = vpack.c.bf16 %v7841_v49, %v2253_v0 }
  0xd8   : > { %6054 = vmatprep.subr.bf16.mxu0 %v7205_v31 }
  0xdb   : > { %6056 = vmatpush3.bf16.msra.mxu0 %v7205_v31 }
  0xdc   : > { %6058 = vmatprep.subr.bf16.mxu0 %v6057_v13 }
  0xde   : > { %5248 = vmatmul.mubr.f32.vlgmr.msra.gmra.mrb[0].mxu0 %v1588_v16 }
  0xdf   : > { %6060 = vmatpush3.bf16.msra.mxu0 %v6057_v13  ;;  %5266 = vmatprep.mubr.f32.mxu0 %v7020_v45 }
  0xe0   : > { %6062 = vmatprep.subr.bf16.mxu0 %v6061_v35 }
  0xe3   : > { %6064 = vmatpush3.bf16.msra.mxu0 %v6061_v35 }
  0xe4   : > { %6066 = vmatprep.subr.bf16.mxu0 %v6065_v34 }
  0xe7   : > { %6068 = vmatpush3.bf16.msra.mxu0 %v6065_v34  ;;  %v6109_v34 = vpack.c.bf16 %v1618_v36, %v1611_v23 }
  0xe8   : > { %6070 = vmatprep.subr.bf16.mxu0 %v6069_v21 }
  0xeb   : > { %6072 = vmatpush3.bf16.msra.mxu0 %v6069_v21 }
  0xec   : > { %6074 = vmatprep.subr.bf16.mxu0 %v6073_v1 }
  0xee   : > { %5267 = vmatmul.mubr.f32.vlgmr.msra.gmra.mrb[0].mxu0 %v7168_v53 }
  0xef   : > { %6076 = vmatpush3.bf16.msra.mxu0 %v6073_v1  ;;  %5285 = vmatprep.mubr.f32.mxu0 %v7117_v3  ;;  %v6113_v3 = vpack.c.bf16 %v1632_v42, %v1625_v37  ;;  %v4550_v1 = vld [vmem:[%s7829_s3] ss:$0 sm:$0xff] }
  0xf0   : > { %6078 = vmatprep.subr.bf16.mxu0 %v6077_v2 }
  0xf3   : > { %6080 = vmatpush3.bf16.msra.mxu0 %v6077_v2 }
  0xf4   : > { %6082 = vmatprep.subr.bf16.mxu0 %v6081_v46 }
  0xf7   : > { %6084 = vmatpush3.bf16.msra.mxu0 %v6081_v46 }
  0xf8   : > { %6086 = vmatprep.subr.bf16.mxu0 %v6085_v6 }
  0xfb   : > { %6088 = vmatpush3.bf16.msra.mxu0 %v6085_v6 }
  0xfc   : > { %6090 = vmatprep.subr.bf16.mxu0 %v7159_v33 }
  0xfe   : > { %5286 = vmatmul.mubr.f32.vlgmr.msra.gmra.mrb[0].mxu0 %v7187_v20  ;;  %v2167_v20 = vand.u32 4294901760, %v2120_v22 }
  0xff   : > { %6092 = vmatpush3.bf16.msra.mxu0 %v7159_v33  ;;  %5304 = vmatprep.mubr.f32.mxu0 %v1576_v15  ;;  %v2118_v15 = vld [vmem:[%s7830_s4 + $0x68] sm:$0xff] }
 0x100   : > { %6094 = vmatprep.subr.bf16.mxu0 %v7183_v11  ;;  %v2161_v19 = vand.u32 4294901760, %v2118_v15  ;;  %v7324_v17 = vsub.f32 %v2120_v22, %v2167_v20 }
 0x102   : > { %v7306_v26 = vsub.f32 %v2118_v15, %v2161_v19  ;;  %v2330_v37 = vand.u32 4294901760, %v7324_v17 }
 0x103   : > { %6096 = vmatpush3.bf16.msra.mxu0 %v7183_v11 }
 0x104   : > { %6098 = vmatprep.subr.bf16.mxu0 %v7199_v27  ;;  %v2316_v8 = vand.u32 4294901760, %v7306_v26  ;;  %v2331_v12 = vsub.f32 %v7324_v17, %v2330_v37 }
 0x106   : > { %v2317_v36 = vsub.f32 %v7306_v26, %v2316_v8  ;;  %v2332_v4 = vand.u32 4294901760, %v2331_v12  ;;  %v6221_v12 = vpack.c.bf16 %v7108_v52, %v7103_v32 }
 0x107   : > { %6100 = vmatpush3.bf16.msra.mxu0 %v7199_v27 }
 0x108   : > { %6102 = vmatprep.subr.bf16.mxu0 %v7205_v31 }
 0x10b   : > { %6104 = vmatpush3.bf16.msra.mxu0 %v7205_v31 }
 0x10c   : > { %6106 = vmatprep.subr.bf16.mxu0 %v6105_v24 }
 0x10e   : > { %5305 = vmatmul.mubr.f32.vlgmr.msra.gmra.mrb[0].mxu0 %v1586_v28 }
 0x10f   : > { %6108 = vmatpush3.bf16.msra.mxu0 %v6105_v24  ;;  %5323 = vmatprep.mubr.f32.mxu0 %v7020_v45 }
 0x110   : > { %6110 = vmatprep.subr.bf16.mxu0 %v6109_v34 }
 0x113   : > { %6112 = vmatpush3.bf16.msra.mxu0 %v6109_v34 }
 0x114   : > { %6114 = vmatprep.subr.bf16.mxu0 %v6113_v3 }
 0x117   : > { %6116 = vmatpush3.bf16.msra.mxu0 %v6113_v3 }
 0x118   : > { %6118 = vmatprep.subr.bf16.mxu0 %v6117_v5 }
 0x11b   : > { %6120 = vmatpush3.bf16.msra.mxu0 %v6117_v5 }
 0x11c   : > { %6122 = vmatprep.subr.bf16.mxu0 %v7159_v33 }
 0x11e   : > { %5324 = vmatmul.mubr.f32.vlgmr.msra.gmra.mrb[0].mxu0 %v7168_v53 }
 0x11f   : > { %6124 = vmatpush3.bf16.msra.mxu0 %v7159_v33  ;;  %5342 = vmatprep.mubr.f32.mxu0 %v7020_v45  ;;  %v2117_v45 = vld [vmem:[%s7830_s4 + $0x60] sm:$0xff] }
 0x120   : > { %6126 = vmatprep.subr.bf16.mxu0 %v7183_v11  ;;  %v2158_v29 = vand.u32 4294901760, %v2117_v45 }
 0x122   : > { %v7304_v33 = vsub.f32 %v2117_v45, %v2158_v29  ;;  %v7336_v16 = vpack.c.bf16 %v2161_v19, %v2158_v29  ;;  %v6205_v19 = vpack.c.bf16 %v7038_v55, %v7028_v51  ;;  %v7843_v51 = vand.u32 4294901760, %v7084_v25 }
 0x123   : > { %6128 = vmatpush3.bf16.msra.mxu0 %v7183_v11  ;;  %v7844_v55 = vand.u32 4294901760, %v7095_v40 }
 0x124   : > { %6130 = vmatprep.subr.bf16.mxu0 %v7199_v27  ;;  %v2309_v7 = vand.u32 4294901760, %v7304_v33  ;;  %v6225_v38 = vpack.c.bf16 %v7306_v26, %v7304_v33 }
 0x126   : > { %v2310_v23 = vsub.f32 %v7304_v33, %v2309_v7  ;;  %v4556_v33 = vld [vmem:[%s7830_s4 + $0xa8] sm:$0xff] }
 0x127   : > { %6132 = vmatpush3.bf16.msra.mxu0 %v7199_v27 }
 0x128   : > { %6134 = vmatprep.subr.bf16.mxu0 %v7205_v31  ;;  %v2311_v44 = vand.u32 4294901760, %v2310_v23 }
 0x12b   : > { %6136 = vmatpush3.bf16.msra.mxu0 %v7205_v31  ;;  %v2318_v31 = vand.u32 4294901760, %v2317_v36 }
 0x12c   : > { %6138 = vmatprep.subr.bf16.mxu0 %v7022_v48 }
 0x12d   : > { %v6193_v42 = vpack.c.bf16 %v2318_v31, %v2311_v44 }
 0x12e   : > { %5343 = vmatmul.mubr.f32.vlgmr.msra.gmra.mrb[0].mxu0 %v7168_v53  ;;  %v2119_v53 = vld [vmem:[%s7830_s4 + $0x70] sm:$0xff] }
 0x12f   : > { %6140 = vmatpush3.bf16.msra.mxu0 %v7022_v48  ;;  %v2164_v11 = vand.u32 4294901760, %v2119_v53  ;;  %6194 = vmatprep.subr.bf16.mxu1 %v6193_v42 }
 0x130   : > { %6142 = vmatprep.subr.bf16.mxu0 %v7036_v54  ;;  %6196 = vmatpush3.bf16.msra.mxu1 %v6193_v42  ;;  %v6213_v42 = vpack.c.bf16 %v7084_v25, %v7069_v10 }
 0x131   : > { %v7322_v27 = vsub.f32 %v2119_v53, %v2164_v11  ;;  %v7338_v35 = vpack.c.bf16 %v2167_v20, %v2164_v11  ;;  %v6209_v20 = vpack.c.bf16 %v7047_v62, %v7042_v58  ;;  %v7846_v58 = vand.u32 4294901760, %v7103_v32 }
 0x132   : > { %v7847_v62 = vand.u32 4294901760, %v7108_v52  ;;  %v4555_v52 = vld [vmem:[%s7830_s4 + $0xa0] sm:$0xff] }
 0x133   : > { %6144 = vmatpush3.bf16.msra.mxu0 %v7036_v54  ;;  %v2323_v28 = vand.u32 4294901760, %v7322_v27  ;;  %v6229_v18 = vpack.c.bf16 %v7324_v17, %v7322_v27  ;;  %v4558_v17 = vld [vmem:[%s7830_s4 + $0xb8] sm:$0xff] }
 0x134   : > { %6146 = vmatprep.subr.bf16.mxu0 %v7040_v57  ;;  %v6285_v0 = vpack.c.bf16 %v7847_v62, %v7846_v58 }
 0x135   : > { %v2324_v56 = vsub.f32 %v7322_v27, %v2323_v28  ;;  %v6293_v25 = vpack.c.bf16 %v2330_v37, %v2323_v28  ;;  %v4557_v27 = vld [vmem:[%s7830_s4 + $0xb0] sm:$0xff] }
 0x136   : > { %v2841_v37 = vand.u32 4294901760, %v4557_v27 }
 0x137   : > { %6148 = vmatpush3.bf16.msra.mxu0 %v7040_v57  ;;  %v2325_v13 = vand.u32 4294901760, %v2324_v56  ;;  %v6217_v56 = vpack.c.bf16 %v7101_v43, %v7095_v40  ;;  %v4554_v40 = vld [vmem:[%s7830_s4 + $0x98] sm:$0xff] }
 0x138   : > { %6150 = vmatprep.subr.bf16.mxu0 %v7067_v9 }
 0x139   : > { %v6197_v30 = vpack.c.bf16 %v2332_v4, %v2325_v13  ;;  %v6265_v13 = vpack.c.bf16 %v2232_v60, %v2225_v59  ;;  %v6269_v4 = vpack.c.bf16 %v2246_v63, %v2239_v61  ;;  %v7842_v59 = vand.u32 4294901760, %v7069_v10 }
 0x13a   : > { %v7845_v61 = vand.u32 4294901760, %v7101_v43  ;;  %v6289_v10 = vpack.c.bf16 %v2316_v8, %v2309_v7  ;;  %v2835_v7 = vand.u32 4294901760, %v4555_v52  ;;  %v2838_v8 = vand.u32 4294901760, %v4556_v33 }
 0x13b   : > { %6152 = vmatpush3.bf16.msra.mxu0 %v7067_v9  ;;  %6198 = vmatprep.subr.bf16.mxu1 %v6197_v30  ;;  %v6277_v60 = vpack.c.bf16 %v7843_v51, %v7842_v59 }
 0x13c   : > { %6154 = vmatprep.subr.bf16.mxu0 %v7093_v39  ;;  %6200 = vmatpush3.bf16.msra.mxu1 %v6197_v30  ;;  %v6281_v63 = vpack.c.bf16 %v7845_v61, %v7844_v55  ;;  %v7500_v28 = vpack.c.bf16 %v2838_v8, %v2835_v7  ;;  %v2844_v30 = vand.u32 4294901760, %v4558_v17  ;;  %v7576_v55 = vsub.f32 %v4555_v52, %v2835_v7 }
 0x13d   : > { %6202 = vmatprep.subr.bf16.mxu1 %v6201_v14  ;;  %v7578_v61 = vsub.f32 %v4556_v33, %v2838_v8 }
 0x13e   : > { %v7582_v58 = vsub.f32 %v4558_v17, %v2844_v30 }
 0x13f   : > { %6156 = vmatpush3.bf16.msra.mxu0 %v7093_v39 }
 0x140   : > { %6158 = vmatprep.subr.bf16.mxu0 %v7106_v47 }
 0x143   : > { %6160 = vmatpush3.bf16.msra.mxu0 %v7106_v47 }
 0x144   : > { %6162 = vmatprep.subr.bf16.mxu0 %v7336_v16 }
 0x147   : > { %6164 = vmatpush3.bf16.msra.mxu0 %v7336_v16 }
 0x148   : > { %6166 = vmatprep.subr.bf16.mxu0 %v7338_v35 }
 0x14b   : > { %6168 = vmatpush3.bf16.msra.mxu0 %v7338_v35 }
 0x201   : > { %v5344_v21 = vpop.f32.mrb[0].mxu0 }
 0x202   : > { %v2091_v2 = vmul.f32 %v5344_v21, %v4549_v41  ;;  %v2071_v46 = vpop.f32.mrb[1].mxu0  ;;  %v4562_v21 = vld [vmem:[%s7830_s4 + $0xd8] sm:$0xff] }
 0x203   : > { %v2090_v6 = vmul.f32 %v4549_v41, %v2071_v46  ;;  %v4561_v41 = vld [vmem:[%s7830_s4 + $0xd0] sm:$0xff] }
 0x204   : > { %v2100_v24 = vadd.f32 %v4550_v1, %v2091_v2  ;;  %v7527_v2 = vld [vmem:[%s7830_s4 + $0xe8] sm:$0xff] }
 0x205   : > { %v2099_v34 = vadd.f32 %v4550_v1, %v2090_v6  ;;  %v7522_v1 = vld [vmem:[%s7830_s4 + $0xe0] sm:$0xff] }
 0x206   : > { %v2102_v3 = vmax.f32 %v2100_v24, 0.0 }
 0x207   : > { %v2101_v5 = vmax.f32 %v2099_v34, 0.0  ;;  %v2853_v34 = vand.u32 4294901760, %v4561_v41 }
 0x208   : > { %2104 = vst [vmem:[%s285_s11 + $0x8] sm:$0xff] %v2102_v3  ;;  %v7358_v45 = vand.u32 4294901760, %v2102_v3 }
 0x209   : > { %2103 = vst [vmem:[%s285_s11] sm:$0xff] %v2101_v5  ;;  %v7360_v15 = vand.u32 4294901760, %v2101_v5 }
 0x20a   : > { %v7363_v29 = vsub.f32 %v2102_v3, %v7358_v45  ;;  %v2856_v3 = vand.u32 4294901760, %v4562_v21 }
 0x20b   : > { %5412 = vmatprep.mubr.f32.mxu1 %v7360_v15  ;;  %v7369_v53 = vsub.f32 %v2101_v5, %v7360_v15  ;;  %v2859_v5 = vand.u32 4294901760, %v7522_v1 }
 0x20c   : > { %5413 = vmatmul.mubr.f32.vlgmr.msra.gmra.mrb[0].mxu1 %v7358_v45  ;;  %v7373_v22 = vand.u32 4294901760, %v7363_v29 }
 0x20d   : > { %6204 = vmatpush3.bf16.msra.mxu1 %v6201_v14  ;;  %5447 = vmatprep.mubr.f32.mxu1 %v7369_v53  ;;  %v7377_v11 = vand.u32 4294901760, %v7369_v53  ;;  %v4559_v14 = vld [vmem:[%s7830_s4 + $0xc0] sm:$0xff] }
 0x20e   : > { %6206 = vmatprep.subr.bf16.mxu1 %v6205_v19  ;;  %v2215_v23 = vsub.f32 %v7363_v29, %v7373_v22 }
 0x20f   : > { %v2205_v36 = vsub.f32 %v7369_v53, %v7377_v11 }
 0x210   : > { %v7387_v31 = vand.u32 4294901760, %v2215_v23 }
 0x211   : > { %6208 = vmatpush3.bf16.msra.mxu1 %v6205_v19  ;;  %v7385_v44 = vand.u32 4294901760, %v2205_v36  ;;  %v2862_v19 = vand.u32 4294901760, %v7527_v2  ;;  %v7542_v36 = vpack.c.bf16 %v2856_v3, %v2853_v34 }
 0x212   : > { %6210 = vmatprep.subr.bf16.mxu1 %v6209_v20 }
 0x213   : > { %5377 = vmatprep.mubr.f32.mxu0 %v7385_v44 }
 0x214   : > { %5378 = vmatmul.mubr.f32.vlgmr.msra.gmra.mrb[2].mxu0 %v7387_v31 }
 0x215   : > { %6212 = vmatpush3.bf16.msra.mxu1 %v6209_v20 }
 0x216   : > { %6214 = vmatprep.subr.bf16.mxu1 %v6213_v42 }
 0x219   : > { %6216 = vmatpush3.bf16.msra.mxu1 %v6213_v42  ;;  %v7552_v42 = vld [vmem:[%s7830_s4 + $0xf8] sm:$0xff] }
 0x21a   : > { %6218 = vmatprep.subr.bf16.mxu1 %v6217_v56  ;;  %v2868_v49 = vand.u32 4294901760, %v7552_v42 }
 0x21d   : > { %6220 = vmatpush3.bf16.msra.mxu1 %v6217_v56 }
 0x21e   : > { %6222 = vmatprep.subr.bf16.mxu1 %v6221_v12 }
 0x221   : > { %6224 = vmatpush3.bf16.msra.mxu1 %v6221_v12 }
 0x222   : > { %6226 = vmatprep.subr.bf16.mxu1 %v6225_v38 }
 0x225   : > { %6228 = vmatpush3.bf16.msra.mxu1 %v6225_v38  ;;  %v2847_v38 = vand.u32 4294901760, %v4559_v14 }
 0x226   : > { %6230 = vmatprep.subr.bf16.mxu1 %v6229_v18 }
 0x229   : > { %6232 = vmatpush3.bf16.msra.mxu1 %v6229_v18 }
 0x22a   : > { %6234 = vmatprep.subr.bf16.mxu1 %v7022_v48 }
 0x22c   : > { %5448 = vmatmul.mubr.f32.vlgmr.msra.gmra.mrb[0].mxu1 %v7363_v29 }
 0x22d   : > { %6236 = vmatpush3.bf16.msra.mxu1 %v7022_v48  ;;  %5482 = vmatprep.mubr.f32.mxu1 %v7377_v11 }
 0x22e   : > { %6238 = vmatprep.subr.bf16.mxu1 %v7036_v54 }
 0x231   : > { %6240 = vmatpush3.bf16.msra.mxu1 %v7036_v54 }
 0x232   : > { %6242 = vmatprep.subr.bf16.mxu1 %v7040_v57 }
 0x235   : > { %6244 = vmatpush3.bf16.msra.mxu1 %v7040_v57 }
 0x236   : > { %6246 = vmatprep.subr.bf16.mxu1 %v7067_v9 }
 0x239   : > { %6248 = vmatpush3.bf16.msra.mxu1 %v7067_v9 }
 0x23a   : > { %6250 = vmatprep.subr.bf16.mxu1 %v7093_v39 }
 0x23d   : > { %6252 = vmatpush3.bf16.msra.mxu1 %v7093_v39 }
 0x23e   : > { %6254 = vmatprep.subr.bf16.mxu1 %v7106_v47 }
 0x241   : > { %6256 = vmatpush3.bf16.msra.mxu1 %v7106_v47 }
 0x242   : > { %6258 = vmatprep.subr.bf16.mxu1 %v7336_v16 }
 0x245   : > { %6260 = vmatpush3.bf16.msra.mxu1 %v7336_v16 }
 0x246   : > { %6262 = vmatprep.subr.bf16.mxu1 %v7338_v35 }
 0x249   : > { %6264 = vmatpush3.bf16.msra.mxu1 %v7338_v35 }
 0x24a   : > { %6266 = vmatprep.subr.bf16.mxu1 %v6265_v13 }
 0x24c   : > { %5483 = vmatmul.mubr.f32.vlgmr.msra.gmra.mrb[0].mxu1 %v7373_v22 }
 0x24d   : > { %6268 = vmatpush3.bf16.msra.mxu1 %v6265_v13  ;;  %5517 = vmatprep.mubr.f32.mxu1 %v7360_v15  ;;  %v7562_v13 = vpack.c.bf16 %v2862_v19, %v2859_v5 }
 0x24e   : > { %6270 = vmatprep.subr.bf16.mxu1 %v6269_v4 }
 0x251   : > { %6272 = vmatpush3.bf16.msra.mxu1 %v6269_v4 }
 0x252   : > { %6274 = vmatprep.subr.bf16.mxu1 %v6273_v50 }
 0x255   : > { %6276 = vmatpush3.bf16.msra.mxu1 %v6273_v50 }
 0x256   : > { %6278 = vmatprep.subr.bf16.mxu1 %v6277_v60 }
 0x259   : > { %6280 = vmatpush3.bf16.msra.mxu1 %v6277_v60 }
 0x25a   : > { %6282 = vmatprep.subr.bf16.mxu1 %v6281_v63 }
 0x25d   : > { %6284 = vmatpush3.bf16.msra.mxu1 %v6281_v63  ;;  %v7580_v63 = vsub.f32 %v4557_v27, %v2841_v37 }
 0x25e   : > { %6286 = vmatprep.subr.bf16.mxu1 %v6285_v0 }
 0x261   : > { %6288 = vmatpush3.bf16.msra.mxu1 %v6285_v0 }
 0x262   : > { %6290 = vmatprep.subr.bf16.mxu1 %v6289_v10 }
 0x265   : > { %6292 = vmatpush3.bf16.msra.mxu1 %v6289_v10 }
 0x266   : > { %6294 = vmatprep.subr.bf16.mxu1 %v6293_v25 }
 0x269   : > { %6296 = vmatpush3.bf16.msra.mxu1 %v6293_v25 }
 0x26a   : > { %6298 = vmatprep.subr.bf16.mxu1 %v7022_v48 }
 0x26c   : > { %5518 = vmatmul.mubr.f32.vlgmr.msra.gmra.mrb[0].mxu1 %v7358_v45 }
 0x26d   : > { %6300 = vmatpush3.bf16.msra.mxu1 %v7022_v48  ;;  %5552 = vmatprep.mubr.f32.mxu1 %v7360_v15  ;;  %v4551_v48 = vld [vmem:[%s7830_s4 + $0x80] sm:$0xff] }
 0x26e   : > { %6302 = vmatprep.subr.bf16.mxu1 %v7036_v54 }
 0x271   : > { %6304 = vmatpush3.bf16.msra.mxu1 %v7036_v54  ;;  %v4552_v54 = vld [vmem:[%s7830_s4 + $0x88] sm:$0xff] }
 0x272   : > { %6306 = vmatprep.subr.bf16.mxu1 %v7040_v57 }
 0x275   : > { %6308 = vmatpush3.bf16.msra.mxu1 %v7040_v57  ;;  %v2823_v57 = vand.u32 4294901760, %v4551_v48 }
 0x276   : > { %6310 = vmatprep.subr.bf16.mxu1 %v7067_v9 }
 0x277   : > { %v7529_v46 = vsub.f32 %v4551_v48, %v2823_v57 }
 0x279   : > { %6312 = vmatpush3.bf16.msra.mxu1 %v7067_v9  ;;  %v2826_v9 = vand.u32 4294901760, %v4552_v54  ;;  %v2926_v20 = vand.u32 4294901760, %v7529_v46 }
 0x27a   : > { %6314 = vmatprep.subr.bf16.mxu1 %v7093_v39 }
 0x27b   : > { %v7478_v43 = vpack.c.bf16 %v2826_v9, %v2823_v57  ;;  %v7531_v6 = vsub.f32 %v4552_v54, %v2826_v9  ;;  %v2927_v50 = vsub.f32 %v7529_v46, %v2926_v20  ;;  %v2954_v54 = vand.u32 4294901760, %v7576_v55 }
 0x27c   : > { %v2961_v57 = vand.u32 4294901760, %v7578_v61  ;;  %v2968_v9 = vand.u32 4294901760, %v7580_v63 }
 0x27d   : > { %6316 = vmatpush3.bf16.msra.mxu1 %v7093_v39  ;;  %v4553_v39 = vld [vmem:[%s7830_s4 + $0x90] sm:$0xff]  ;;  %v2933_v23 = vand.u32 4294901760, %v7531_v6  ;;  %v2928_v0 = vand.u32 4294901760, %v2927_v50  ;;  %v2955_v7 = vsub.f32 %v7576_v55, %v2954_v54 }
 0x27e   : > { %6318 = vmatprep.subr.bf16.mxu1 %v7106_v47  ;;  %v2829_v32 = vand.u32 4294901760, %v4553_v39  ;;  %v2962_v8 = vsub.f32 %v7578_v61, %v2961_v57  ;;  %v2969_v27 = vsub.f32 %v7580_v63, %v2968_v9 }
 0x27f   : > { %v2934_v59 = vsub.f32 %v7531_v6, %v2933_v23 }
 0x280   : > { %v7554_v56 = vsub.f32 %v4553_v39, %v2829_v32  ;;  %v2975_v39 = vand.u32 4294901760, %v7582_v58  ;;  %v2963_v50 = vand.u32 4294901760, %v2962_v8 }
 0x281   : > { %6320 = vmatpush3.bf16.msra.mxu1 %v7106_v47  ;;  %v2832_v47 = vand.u32 4294901760, %v4554_v40  ;;  %v2935_v10 = vand.u32 4294901760, %v2934_v59  ;;  %v2970_v59 = vand.u32 4294901760, %v2969_v27 }
 0x282   : > { %6322 = vmatprep.subr.bf16.mxu1 %v7336_v16  ;;  %v2940_v51 = vand.u32 4294901760, %v7554_v56  ;;  %v2976_v17 = vsub.f32 %v7582_v58, %v2975_v39 }
 0x283   : > { %v7488_v26 = vpack.c.bf16 %v2832_v47, %v2829_v32  ;;  %v7556_v12 = vsub.f32 %v4554_v40, %v2832_v47  ;;  %v6361_v40 = vpack.c.bf16 %v2935_v10, %v2928_v0  ;;  %v7603_v32 = vsub.f32 %v4559_v14, %v2847_v38 }
 0x284   : > { %v2941_v25 = vsub.f32 %v7554_v56, %v2940_v51  ;;  %v7623_v14 = vsub.f32 %v4561_v41, %v2853_v34  ;;  %v2977_v0 = vand.u32 4294901760, %v2976_v17 }
 0x285   : > { %6324 = vmatpush3.bf16.msra.mxu1 %v7336_v16  ;;  %v4560_v16 = vld [vmem:[%s7830_s4 + $0xc8] sm:$0xff]  ;;  %v2947_v60 = vand.u32 4294901760, %v7556_v12 }
 0x286   : > { %6326 = vmatprep.subr.bf16.mxu1 %v7338_v35  ;;  %v2850_v18 = vand.u32 4294901760, %v4560_v16  ;;  %v2942_v52 = vand.u32 4294901760, %v2941_v25  ;;  %v7645_v25 = vsub.f32 %v7527_v2, %v2862_v19  ;;  %v7663_v19 = vsub.f32 %v7552_v42, %v2868_v49 }
 0x287   : > { %v2948_v48 = vsub.f32 %v7556_v12, %v2947_v60 }
 0x288   : > { %v7534_v24 = vpack.c.bf16 %v2850_v18, %v2847_v38  ;;  %v7605_v47 = vsub.f32 %v4560_v16, %v2850_v18  ;;  %v7625_v16 = vsub.f32 %v4562_v21, %v2856_v3  ;;  %v2956_v18 = vand.u32 4294901760, %v2955_v7 }
 0x289   : > { %6328 = vmatpush3.bf16.msra.mxu1 %v7338_v35  ;;  %v7510_v35 = vpack.c.bf16 %v2844_v30, %v2841_v37  ;;  %v2949_v33 = vand.u32 4294901760, %v2948_v48  ;;  %v2982_v37 = vand.u32 4294901760, %v7603_v32  ;;  %v2996_v21 = vand.u32 4294901760, %v7623_v14 }
 0x28a   : > { %6330 = vmatprep.subr.bf16.mxu1 %v7478_v43  ;;  %v2989_v30 = vand.u32 4294901760, %v7605_v47  ;;  %v3003_v34 = vand.u32 4294901760, %v7625_v16  ;;  %v6369_v3 = vpack.c.bf16 %v2963_v50, %v2956_v18  ;;  %v6373_v48 = vpack.c.bf16 %v2977_v0, %v2970_v59 }
 0x28b   : > { %v6365_v38 = vpack.c.bf16 %v2949_v33, %v2942_v52  ;;  %v2983_v10 = vsub.f32 %v7603_v32, %v2982_v37  ;;  %v2997_v33 = vsub.f32 %v7623_v14, %v2996_v21 }
 0x28c   : > { %5553 = vmatmul.mubr.f32.vlgmr.msra.gmra.mrb[0].mxu1 %v7358_v45  ;;  %v2990_v41 = vsub.f32 %v7605_v47, %v2989_v30  ;;  %v3004_v7 = vsub.f32 %v7625_v16, %v3003_v34 }
 0x28d   : > { %6332 = vmatpush3.bf16.msra.mxu1 %v7478_v43  ;;  %5587 = vmatprep.mubr.f32.mxu1 %v7385_v44  ;;  %v7547_v44 = vld [vmem:[%s7830_s4 + $0xf0] sm:$0xff]  ;;  %v2998_v27 = vand.u32 4294901760, %v2997_v33  ;;  %v6401_v33 = vpack.c.bf16 %v7578_v61, %v7576_v55 }
 0x28e   : > { %6334 = vmatprep.subr.bf16.mxu1 %v7488_v26  ;;  %v2865_v4 = vand.u32 4294901760, %v7547_v44  ;;  %v2991_v52 = vand.u32 4294901760, %v2990_v41  ;;  %v3005_v17 = vand.u32 4294901760, %v3004_v7  ;;  %v6405_v7 = vpack.c.bf16 %v7582_v58, %v7580_v63 }
 0x290   : > { %v7589_v62 = vpack.c.bf16 %v2868_v49, %v2865_v4  ;;  %v7658_v2 = vsub.f32 %v7547_v44, %v2865_v4  ;;  %v3031_v4 = vand.u32 4294901760, %v7663_v19  ;;  %v6381_v42 = vpack.c.bf16 %v3005_v17, %v2998_v27 }
 0x291   : > { %6336 = vmatpush3.bf16.msra.mxu1 %v7488_v26  ;;  %v6413_v27 = vpack.c.bf16 %v7625_v16, %v7623_v14 }
 0x292   : > { %6338 = vmatprep.subr.bf16.mxu1 %v7500_v28  ;;  %v3024_v44 = vand.u32 4294901760, %v7658_v2  ;;  %v3032_v0 = vsub.f32 %v7663_v19, %v3031_v4  ;;  %v6421_v17 = vpack.c.bf16 %v7663_v19, %v7658_v2 }
 0x294   : > { %v3025_v59 = vsub.f32 %v7658_v2, %v3024_v44 }
 0x295   : > { %6340 = vmatpush3.bf16.msra.mxu1 %v7500_v28 }
 0x296   : > { %6342 = vmatprep.subr.bf16.mxu1 %v7510_v35  ;;  %v3026_v41 = vand.u32 4294901760, %v3025_v59 }
 0x299   : > { %6344 = vmatpush3.bf16.msra.mxu1 %v7510_v35 }
 0x29a   : > { %6346 = vmatprep.subr.bf16.mxu1 %v7534_v24 }
 0x29d   : > { %6348 = vmatpush3.bf16.msra.mxu1 %v7534_v24 }
 0x29e   : > { %6350 = vmatprep.subr.bf16.mxu1 %v7542_v36 }
 0x2a1   : > { %6352 = vmatpush3.bf16.msra.mxu1 %v7542_v36 }
 0x2a2   : > { %6354 = vmatprep.subr.bf16.mxu1 %v7562_v13 }
 0x2a5   : > { %6356 = vmatpush3.bf16.msra.mxu1 %v7562_v13 }
 0x2a6   : > { %6358 = vmatprep.subr.bf16.mxu1 %v7589_v62 }
 0x2a9   : > { %6360 = vmatpush3.bf16.msra.mxu1 %v7589_v62 }
 0x2aa   : > { %6362 = vmatprep.subr.bf16.mxu1 %v6361_v40 }
 0x2ac   : > { %5588 = vmatmul.mubr.f32.vlgmr.msra.gmra.mrb[2].mxu1 %v7387_v31  ;;  %v7640_v31 = vsub.f32 %v7522_v1, %v2859_v5  ;;  %v3017_v5 = vand.u32 4294901760, %v7645_v25 }
 0x2ad   : > { %6364 = vmatpush3.bf16.msra.mxu1 %v6361_v40  ;;  %5622 = vmatprep.mubr.f32.mxu1 %v7360_v15  ;;  %v2984_v40 = vand.u32 4294901760, %v2983_v10 }
 0x2ae   : > { %6366 = vmatprep.subr.bf16.mxu1 %v6365_v38  ;;  %v3010_v1 = vand.u32 4294901760, %v7640_v31  ;;  %v3018_v18 = vsub.f32 %v7645_v25, %v3017_v5 }
 0x2af   : > { %v6377_v8 = vpack.c.bf16 %v2991_v52, %v2984_v40  ;;  %v6393_v40 = vpack.c.bf16 %v7531_v6, %v7529_v46  ;;  %v6397_v52 = vpack.c.bf16 %v7556_v12, %v7554_v56  ;;  %v6465_v46 = vpack.c.bf16 %v2961_v57, %v2954_v54 }
 0x2b0   : > { %v3019_v50 = vand.u32 4294901760, %v3018_v18  ;;  %v6469_v6 = vpack.c.bf16 %v2975_v39, %v2968_v9  ;;  %v6485_v56 = vpack.c.bf16 %v3031_v4, %v3024_v44 }
 0x2b1   : > { %6368 = vmatpush3.bf16.msra.mxu1 %v6365_v38  ;;  %v3011_v38 = vsub.f32 %v7640_v31, %v3010_v1 }
 0x2b2   : > { %6370 = vmatprep.subr.bf16.mxu1 %v6369_v3 }
 0x2b3   : > { %v3012_v49 = vand.u32 4294901760, %v3011_v38 }
 0x2b5   : > { %6372 = vmatpush3.bf16.msra.mxu1 %v6369_v3  ;;  %v6385_v10 = vpack.c.bf16 %v3019_v50, %v3012_v49  ;;  %v3033_v3 = vand.u32 4294901760, %v3032_v0 }
 0x2b6   : > { %6374 = vmatprep.subr.bf16.mxu1 %v6373_v48 }
 0x2b9   : > { %6376 = vmatpush3.bf16.msra.mxu1 %v6373_v48  ;;  %v6389_v48 = vpack.c.bf16 %v3033_v3, %v3026_v41 }
 0x2ba   : > { %6378 = vmatprep.subr.bf16.mxu1 %v6377_v8 }
 0x2bd   : > { %6380 = vmatpush3.bf16.msra.mxu1 %v6377_v8  ;;  %v6409_v8 = vpack.c.bf16 %v7605_v47, %v7603_v32 }
 0x2be   : > { %6382 = vmatprep.subr.bf16.mxu1 %v6381_v42 }
 0x2c1   : > { %6384 = vmatpush3.bf16.msra.mxu1 %v6381_v42 }
 0x2c2   : > { %6386 = vmatprep.subr.bf16.mxu1 %v6385_v10 }
 0x2c5   : > { %6388 = vmatpush3.bf16.msra.mxu1 %v6385_v10 }
 0x2c6   : > { %6390 = vmatprep.subr.bf16.mxu1 %v6389_v48 }
 0x2c9   : > { %6392 = vmatpush3.bf16.msra.mxu1 %v6389_v48 }
 0x2ca   : > { %6394 = vmatprep.subr.bf16.mxu1 %v6393_v40 }
 0x2cc   : > { %5623 = vmatmul.mubr.f32.vlgmr.msra.gmra.mrb[2].mxu1 %v7358_v45 }
 0x2cd   : > { %6396 = vmatpush3.bf16.msra.mxu1 %v6393_v40  ;;  %5657 = vmatprep.mubr.f32.mxu1 %v7369_v53  ;;  %v6417_v53 = vpack.c.bf16 %v7645_v25, %v7640_v31 }
 0x2ce   : > { %6398 = vmatprep.subr.bf16.mxu1 %v6397_v52 }
 0x2d1   : > { %6400 = vmatpush3.bf16.msra.mxu1 %v6397_v52 }
 0x2d2   : > { %6402 = vmatprep.subr.bf16.mxu1 %v6401_v33 }
 0x2d5   : > { %6404 = vmatpush3.bf16.msra.mxu1 %v6401_v33 }
 0x2d6   : > { %6406 = vmatprep.subr.bf16.mxu1 %v6405_v7 }
 0x2d9   : > { %6408 = vmatpush3.bf16.msra.mxu1 %v6405_v7 }
 0x2da   : > { %6410 = vmatprep.subr.bf16.mxu1 %v6409_v8 }
 0x2dd   : > { %6412 = vmatpush3.bf16.msra.mxu1 %v6409_v8 }
 0x2de   : > { %6414 = vmatprep.subr.bf16.mxu1 %v6413_v27 }
 0x2e1   : > { %6416 = vmatpush3.bf16.msra.mxu1 %v6413_v27 }
 0x2e2   : > { %6418 = vmatprep.subr.bf16.mxu1 %v6417_v53 }
 0x2e5   : > { %6420 = vmatpush3.bf16.msra.mxu1 %v6417_v53 }
 0x2e6   : > { %6422 = vmatprep.subr.bf16.mxu1 %v6421_v17 }
 0x2e7   : > { %v7697_v38 = vpop.f32.mrb[2].mxu0 }
 0x2e8   : > { %v7699_v18 = vpop.f32.mrb[3].mxu0 }
 0x2e9   : > { %6424 = vmatpush3.bf16.msra.mxu1 %v6421_v17 }
 0x2ea   : > { %6426 = vmatprep.subr.bf16.mxu1 %v7478_v43 }
 0x2ec   : > { %5658 = vmatmul.mubr.f32.vlgmr.msra.gmra.mrb[2].mxu1 %v7363_v29  ;;  %v6457_v29 = vpack.c.bf16 %v2933_v23, %v2926_v20  ;;  %v6477_v20 = vpack.c.bf16 %v3003_v34, %v2996_v21  ;;  %v6481_v23 = vpack.c.bf16 %v3017_v5, %v3010_v1  ;;  %v4567_v1 = vld [vmem:[%s7831_s5 + $0x8] sm:$0xff] }
 0x2ed   : > { %6428 = vmatpush3.bf16.msra.mxu1 %v7478_v43  ;;  %5692 = vmatprep.mubr.f32.mxu1 %v7377_v11  ;;  %v6461_v11 = vpack.c.bf16 %v2947_v60, %v2940_v51  ;;  %v3975_v5 = vsel %vm3509_vm2, %v4567_v1, 0 }
 0x2ee   : > { %6430 = vmatprep.subr.bf16.mxu1 %v7488_v26  ;;  %v4044_v2 = vand.u32 4294901760, %v3975_v5 }
 0x2f0   : > { %v4045_v19 = vsub.f32 %v3975_v5, %v4044_v2 }
 0x2f1   : > { %6432 = vmatpush3.bf16.msra.mxu1 %v7488_v26 }
 0x2f2   : > { %6434 = vmatprep.subr.bf16.mxu1 %v7500_v28  ;;  %v4046_v44 = vand.u32 4294901760, %v4045_v19 }
 0x2f4   : > { %v4047_v4 = vsub.f32 %v4045_v19, %v4046_v44 }
 0x2f5   : > { %6436 = vmatpush3.bf16.msra.mxu1 %v7500_v28 }
 0x2f6   : > { %6438 = vmatprep.subr.bf16.mxu1 %v7510_v35  ;;  %v4048_v42 = vand.u32 4294901760, %v4047_v4 }
 0x2f9   : > { %6440 = vmatpush3.bf16.msra.mxu1 %v7510_v35 }
 0x2fa   : > { %6442 = vmatprep.subr.bf16.mxu1 %v7534_v24 }
 0x2fd   : > { %6444 = vmatpush3.bf16.msra.mxu1 %v7534_v24 }
 0x2fe   : > { %6446 = vmatprep.subr.bf16.mxu1 %v7542_v36 }
 0x301   : > { %6448 = vmatpush3.bf16.msra.mxu1 %v7542_v36 }
 0x302   : > { %6450 = vmatprep.subr.bf16.mxu1 %v7562_v13 }
 0x305   : > { %6452 = vmatpush3.bf16.msra.mxu1 %v7562_v13 }
 0x306   : > { %6454 = vmatprep.subr.bf16.mxu1 %v7589_v62 }
 0x309   : > { %6456 = vmatpush3.bf16.msra.mxu1 %v7589_v62 }
 0x30a   : > { %6458 = vmatprep.subr.bf16.mxu1 %v6457_v29 }
 0x30c   : > { %5693 = vmatmul.mubr.f32.vlgmr.msra.gmra.mrb[2].mxu1 %v7373_v22  ;;  %v6473_v22 = vpack.c.bf16 %v2989_v30, %v2982_v37 }
 0x30d   : > { %6460 = vmatpush3.bf16.msra.mxu1 %v6457_v29  ;;  %5727 = vmatprep.mubr.f32.mxu1 %v7360_v15 }
 0x30e   : > { %6462 = vmatprep.subr.bf16.mxu1 %v6461_v11 }
 0x311   : > { %6464 = vmatpush3.bf16.msra.mxu1 %v6461_v11 }
 0x312   : > { %6466 = vmatprep.subr.bf16.mxu1 %v6465_v46 }
 0x315   : > { %6468 = vmatpush3.bf16.msra.mxu1 %v6465_v46 }
 0x316   : > { %6470 = vmatprep.subr.bf16.mxu1 %v6469_v6 }
 0x319   : > { %6472 = vmatpush3.bf16.msra.mxu1 %v6469_v6 }
 0x31a   : > { %6474 = vmatprep.subr.bf16.mxu1 %v6473_v22 }
 0x31d   : > { %6476 = vmatpush3.bf16.msra.mxu1 %v6473_v22 }
 0x31e   : > { %6478 = vmatprep.subr.bf16.mxu1 %v6477_v20 }
 0x321   : > { %6480 = vmatpush3.bf16.msra.mxu1 %v6477_v20 }
 0x322   : > { %6482 = vmatprep.subr.bf16.mxu1 %v6481_v23 }
 0x325   : > { %6484 = vmatpush3.bf16.msra.mxu1 %v6481_v23 }
 0x326   : > { %6486 = vmatprep.subr.bf16.mxu1 %v6485_v56 }
 0x329   : > { %6488 = vmatpush3.bf16.msra.mxu1 %v6485_v56 }
 0x32a   : > { %6490 = vmatprep.subr.bf16.mxu1 %v7478_v43 }
 0x32c   : > { %5728 = vmatmul.mubr.f32.vlgmr.msra.gmra.mrb[2].mxu1 %v7358_v45 }
 0x32d   : > { %6492 = vmatpush3.bf16.msra.mxu1 %v7478_v43  ;;  %5762 = vmatprep.mubr.f32.mxu1 %v7360_v15 }
 0x32e   : > { %6494 = vmatprep.subr.bf16.mxu1 %v7488_v26 }
 0x331   : > { %6496 = vmatpush3.bf16.msra.mxu1 %v7488_v26 }
 0x332   : > { %6498 = vmatprep.subr.bf16.mxu1 %v7500_v28 }
 0x335   : > { %6500 = vmatpush3.bf16.msra.mxu1 %v7500_v28 }
 0x336   : > { %6502 = vmatprep.subr.bf16.mxu1 %v7510_v35 }
 0x339   : > { %6504 = vmatpush3.bf16.msra.mxu1 %v7510_v35  ;;  %v6650_v35 = vmov 0.0|0.0  }
 0x33a   : > { %6506 = vmatprep.subr.bf16.mxu1 %v7534_v24  ;;  %6527 = vmatprep.subr.bf16.mxu0 %v6650_v35 }
 0x33d   : > { %6508 = vmatpush3.bf16.msra.mxu1 %v7534_v24  ;;  %v6652_v24 = vmov 0.0  }
 0x33e   : > { %6510 = vmatprep.subr.bf16.mxu1 %v7542_v36  ;;  %5783 = vmatprep.mubr.msk.f32.mxu0 %vm6651_vm1, %v6652_v24 }
 0x341   : > { %6512 = vmatpush3.bf16.msra.mxu1 %v7542_v36 }
 0x342   : > { %6514 = vmatprep.subr.bf16.mxu1 %v7562_v13 }
 0x345   : > { %6516 = vmatpush3.bf16.msra.mxu1 %v7562_v13 }
 0x346   : > { %6518 = vmatprep.subr.bf16.mxu1 %v7589_v62 }
 0x349   : > { %6520 = vmatpush3.bf16.msra.mxu1 %v7589_v62 }
 0x34a   : > { %6521 = vmatprep.subr.bf16.mxu1 %v6650_v35 }
 0x34c   : > { %5763 = vmatmul.mubr.f32.vlgmr.msra.gmra.mrb[2].mxu1 %v7358_v45  ;;  %v3508_v45 = vld [vmem:[%s7831_s5] sm:$0xff] }
 0x34d   : > { %5769 = vmatprep.mubr.msk.f32.mxu1 %vm6651_vm1, %v6652_v24  ;;  %v3511_v36 = vsel %vm3509_vm2, %v3508_v45, 0 }
 0x34e   : > { %v3580_v12 = vand.u32 4294901760, %v3511_v36 }
 0x350   : > { %v3581_v13 = vsub.f32 %v3511_v36, %v3580_v12 }
 0x352   : > { %v3582_v51 = vand.u32 4294901760, %v3581_v13 }
 0x354   : > { %v3583_v62 = vsub.f32 %v3581_v13, %v3582_v51 }
 0x356   : > { %v3584_v47 = vand.u32 4294901760, %v3583_v62 }
 0x35f   : > { %v5554_v15 = vpop.f32.mrb[0].mxu1 }
 0x360   : > { %v6557_v43 = vadd.f32 %v5554_v15, %v7697_v38  ;;  %v2795_v26 = vpop.f32.mrb[1].mxu1 }
 0x361   : > { %v6558_v28 = vadd.f32 %v2795_v26, %v7699_v18 }
 0x41f   : > { %v5764_v60 = vpop.f32.mrb[2].mxu1 }
 0x420   : > { %v3507_v55 = vmax.f32 %v6557_v43, %v5764_v60  ;;  %v3496_v61 = vpop.f32.mrb[3].mxu1 }
 0x421   : > { %v3506_v63 = vmax.f32 %v6558_v28, %v3496_v61 }
 0x422   : > { %v3517_v58 = vand.u32 4294901760, %v3507_v55 }
 0x423   : > { %v3514_v54 = vand.u32 4294901760, %v3506_v63 }
 0x424   : > { %v3599_v57 = vsub.f32 %v3507_v55, %v3517_v58 }
 0x425   : > { %v6522_v9 = vpack.c.bf16 %v3517_v58, %v3514_v54  ;;  %v3592_v39 = vsub.f32 %v3506_v63, %v3514_v54 }
 0x426   : > { %v3600_v32 = vand.u32 4294901760, %v3599_v57 }
 0x427   : > { %v3593_v37 = vand.u32 4294901760, %v3592_v39  ;;  %v6528_v30 = vpack.c.bf16 %v3599_v57, %v3592_v39  ;;  %6523 = vmatpush3.bf16.msra.mxu1 %v6522_v9 }
 0x428   : > { %v3601_v14 = vsub.f32 %v3599_v57, %v3600_v32  ;;  %6524 = vmatprep.subr.bf16.mxu1 %v6650_v35 }
 0x429   : > { %v3594_v16 = vsub.f32 %v3592_v39, %v3593_v37  ;;  %6529 = vmatpush3.bf16.msra.mxu0 %v6528_v30  ;;  %v6534_v21 = vpack.c.bf16 %v3600_v32, %v3593_v37 }
 0x42a   : > { %v3602_v34 = vand.u32 4294901760, %v3601_v14  ;;  %6530 = vmatprep.subr.bf16.mxu0 %v6650_v35  ;;  %5770 = vmatmul.mubr.f32.vlgmr.msra.gmra.mrb[4].mxu1 %v3584_v47 }
 0x42b   : > { %v3595_v31 = vand.u32 4294901760, %v3594_v16  ;;  %5776 = vmatprep.mubr.msk.f32.mxu1 %vm6651_vm1, %v6652_v24 }
 0x42c   : > { %5784 = vmatmul.mubr.f32.vlgmr.msra.gmra.mrb[4].mxu0 %v3581_v13 }
 0x42d   : > { %6532 = vmatpush3.bf16.msra.mxu0 %v6522_v9  ;;  %v6525_v25 = vpack.c.bf16 %v3602_v34, %v3595_v31  ;;  %5790 = vmatprep.mubr.msk.f32.mxu0 %vm6651_vm1, %v6652_v24 }
 0x42e   : > { %6533 = vmatprep.subr.bf16.mxu0 %v6650_v35 }
 0x42f   : > { %6526 = vmatpush3.bf16.msra.mxu1 %v6525_v25 }
 0x432   : > { %5777 = vmatmul.mubr.f32.vlgmr.msra.gmra.mrb[4].mxu1 %v3580_v12 }
 0x434   : > { %5791 = vmatmul.mubr.f32.vlgmr.msra.gmra.mrb[4].mxu0 %v3582_v51 }
 0x435   : > { %6535 = vmatpush3.bf16.msra.mxu0 %v6534_v21  ;;  %5797 = vmatprep.mubr.msk.f32.mxu0 %vm6651_vm1, %v6652_v24 }
 0x436   : > { %6536 = vmatprep.subr.bf16.mxu0 %v6650_v35 }
 0x43c   : > { %5798 = vmatmul.mubr.f32.vlgmr.msra.gmra.mrb[4].mxu0 %v3580_v12 }
 0x43d   : > { %6538 = vmatpush3.bf16.msra.mxu0 %v6522_v9  ;;  %5804 = vmatprep.mubr.msk.f32.mxu0 %vm6651_vm1, %v6652_v24 }
 0x43e   : > { %6539 = vmatprep.subr.bf16.mxu0 %v6650_v35 }
 0x444   : > { %5805 = vmatmul.mubr.f32.vlgmr.msra.gmra.mrb[4].mxu0 %v3580_v12 }
 0x445   : > { %6541 = vmatpush3.bf16.msra.mxu0 %v6522_v9  ;;  %5811 = vmatprep.mubr.msk.f32.mxu0 %vm6651_vm1, %v6652_v24 }
 0x446   : > { %6542 = vmatprep.subr.bf16.mxu0 %v6650_v35 }
 0x448   : > { %5812 = vmatmul.mubr.f32.vlgmr.msra.gmra.mrb[6].mxu0 %v4048_v42 }
 0x449   : > { %6544 = vmatpush3.bf16.msra.mxu0 %v6525_v25  ;;  %5818 = vmatprep.mubr.msk.f32.mxu0 %vm6651_vm1, %v6652_v24 }
 0x44a   : > { %6545 = vmatprep.subr.bf16.mxu0 %v6650_v35 }
 0x450   : > { %5819 = vmatmul.mubr.f32.vlgmr.msra.gmra.mrb[6].mxu0 %v4044_v2 }
 0x451   : > { %6547 = vmatpush3.bf16.msra.mxu0 %v6528_v30  ;;  %5825 = vmatprep.mubr.msk.f32.mxu0 %vm6651_vm1, %v6652_v24 }
 0x452   : > { %6548 = vmatprep.subr.bf16.mxu0 %v6650_v35 }
 0x458   : > { %5826 = vmatmul.mubr.f32.vlgmr.msra.gmra.mrb[6].mxu0 %v4045_v19 }
 0x459   : > { %6550 = vmatpush3.bf16.msra.mxu0 %v6522_v9  ;;  %5832 = vmatprep.mubr.msk.f32.mxu0 %vm6651_vm1, %v6652_v24 }
 0x45a   : > { %6551 = vmatprep.subr.bf16.mxu0 %v6650_v35 }
 0x460   : > { %5833 = vmatmul.mubr.f32.vlgmr.msra.gmra.mrb[6].mxu0 %v4046_v44 }
 0x461   : > { %6553 = vmatpush3.bf16.msra.mxu0 %v6534_v21  ;;  %5839 = vmatprep.mubr.msk.f32.mxu0 %vm6651_vm1, %v6652_v24 }
 0x462   : > { %6554 = vmatprep.subr.bf16.mxu0 %v6650_v35 }
 0x468   : > { %5840 = vmatmul.mubr.f32.vlgmr.msra.gmra.mrb[6].mxu0 %v4044_v2 }
 0x469   : > { %6556 = vmatpush3.bf16.msra.mxu0 %v6522_v9  ;;  %5846 = vmatprep.mubr.msk.f32.mxu0 %vm6651_vm1, %v6652_v24 }
 0x470   : > { %5847 = vmatmul.mubr.f32.vlgmr.msra.gmra.mrb[6].mxu0 %v4044_v2 }
 0x505   : > { %v3667_v49 = vpop.f32.mrb[4].mxu1 }
 0x506   : > { %v5778_v50 = vpop.f32.mrb[5].mxu1 }
 0x517   : > { %v3968_v59 = vpop.f32.mrb[4].mxu0 }
 0x518   : > { %v6559_v0 = vadd.f32 %v3968_v59, %v3667_v49  ;;  %v5806_v10 = vpop.f32.mrb[5].mxu0 }
 0x543   : > { %v4432_v41 = vpop.f32.mrb[6].mxu0 }
 0x544   : > { %v4436_v3 = vmax.f32 %v6559_v0, %v4432_v41  ;;  %v5848_v48 = vpop.f32.mrb[7].mxu0 }
 0x546   : > { %4437 = vst.msk [vmem:[%s289_s22] sm:$0xff] %vm311_vm0, %v4436_v3 }
 0x547 PF: > { %s18_s24 = sadd.s32 1, %s6648_s24  }
 0x548   : > { %p15_p4 = scmp.ge.s32.totalorder %s18_s24, 4  }
 0x54a   :  { %17 = sbr.rel (!%p15_p4) target bundleno = 1 (0x1), region = 90 }

</bundles_post_ra>
